<compile_context>
chip_gen: v7x
topology: tpu7x:2x2x1
jax: 0.10.0
libtpu: 0.0.40
codegen_flags: <defaults>
</compile_context>

<pallas_src>
import functools

import jax
import jax.numpy as jnp
from jax.experimental import pallas as pl
from jax.experimental.pallas import tpu as pltpu

_EPS = 1e-5     # InstanceNorm2d default eps
_SLOPE = 0.2    # LeakyReLU negative slope


# ---------------------------------------------------------------------------
# Pallas kernels
# ---------------------------------------------------------------------------
def _conv_bias_act_kernel(a_ref, w_ref, b_ref, o_ref, *, neg_slope):
    """(TM, K) x (K, Cout) MXU tile of an im2col conv + bias (+ LeakyReLU).

    a_ref / w_ref are bf16 (MXU inputs); accumulation, bias add and the
    optional LeakyReLU epilogue are f32.
    """
    acc = jnp.dot(a_ref[...], w_ref[...], preferred_element_type=jnp.float32)
    acc = acc + b_ref[...]                       # bias broadcast over rows
    if neg_slope is not None:
        acc = jnp.where(acc >= 0.0, acc, neg_slope * acc)
    o_ref[...] = acc


def _conv_instnorm_lrelu_kernel(a_ref, w_ref, b_ref, o_ref):
    """Fused conv (im2col matmul) + InstanceNorm2d + LeakyReLU, one sample.

    a_ref: (1, H*W, K) bf16, w_ref: (K, Cout) bf16, b_ref: (1, Cout) f32.
    Stats use a centered two-pass (data already resident in VMEM) for better
    f32 accuracy than E[x^2]-E[x]^2.
    """
    a = a_ref[0]                                            # (HW, K)
    x = jnp.dot(a, w_ref[...], preferred_element_type=jnp.float32)
    x = x + b_ref[...]
    inv_hw = 1.0 / x.shape[0]
    mean = jnp.sum(x, axis=0, keepdims=True) * inv_hw
    xc = x - mean
    var = jnp.sum(xc * xc, axis=0, keepdims=True) * inv_hw  # biased variance
    y = xc * jax.lax.rsqrt(var + _EPS)
    o_ref[0] = jnp.where(y >= 0.0, y, _SLOPE * y)


def _instnorm_lrelu_kernel(x_ref, o_ref):
    """Standalone InstanceNorm2d + LeakyReLU, one sample (fallback path)."""
    x = x_ref[0]                                            # (HW, C) f32
    inv_hw = 1.0 / x.shape[0]
    mean = jnp.sum(x, axis=0, keepdims=True) * inv_hw
    xc = x - mean
    var = jnp.sum(xc * xc, axis=0, keepdims=True) * inv_hw
    y = xc * jax.lax.rsqrt(var + _EPS)
    o_ref[0] = jnp.where(y >= 0.0, y, _SLOPE * y)


# ---------------------------------------------------------------------------
# Layer wrappers (glue in plain JAX, hot path in Pallas)
# ---------------------------------------------------------------------------
def _im2col_bf16(x, stride):
    """x: (N, H, W, Cin) f32 -> (N, Ho*Wo, 9*Cin) bf16 patches, (kh, kw, cin)."""
    N, H, W, Cin = x.shape
    Ho = (H + 2 - 3) // stride + 1
    Wo = (W + 2 - 3) // stride + 1
    # TODO(synk): replace the JAX-side im2col with an in-kernel 9-tap halo-DMA
    # reduction to remove the A-side HBM inflation for the stride-1 layers.
    xp = jnp.pad(x, ((0, 0), (1, 1), (1, 1), (0, 0))).astype(jnp.bfloat16)
    cols = []
    for kh in range(3):
        for kw in range(3):
            cols.append(
                xp[:, kh:kh + (Ho - 1) * stride + 1:stride,
                      kw:kw + (Wo - 1) * stride + 1:stride, :])
    a = jnp.stack(cols, axis=3).reshape(N, Ho * Wo, 9 * Cin)
    return a, Ho, Wo


def _matmul_conv(a2d, wm, bm, cout_p, neg_slope,
                 tile_m=512, a_tile_budget=4 << 20):
    """M-tiled (M, K) x (K, cout_p) conv matmul. a2d/wm bf16, bm f32."""
    M, K = a2d.shape
    # Keep the A tile under ~4 MiB so double-buffered tiles + resident weights
    # fit the default scoped-VMEM limit on every chip generation.
    tm_cap = max(8, ((a_tile_budget // (K * 2)) // 8) * 8)
    tm = min(tile_m, tm_cap, M)
    return pl.pallas_call(
        functools.partial(_conv_bias_act_kernel, neg_slope=neg_slope),
        out_shape=jax.ShapeDtypeStruct((M, cout_p), jnp.float32),
        grid=(pl.cdiv(M, tm),),
        in_specs=[
            pl.BlockSpec((tm, K), lambda i: (i, 0)),        # A tile, pipelined
            pl.BlockSpec((K, cout_p), lambda i: (0, 0)),    # weights resident
            pl.BlockSpec((1, cout_p), lambda i: (0, 0)),    # bias resident
        ],
        out_specs=pl.BlockSpec((tm, cout_p), lambda i: (i, 0)),
        compiler_params=pltpu.CompilerParams(
            dimension_semantics=("parallel",)),
    )(a2d, wm, bm)


def conv2d_3x3(x, w, b, stride, *, neg_slope=None):
    """Plain 3x3 conv (+ optional fused LeakyReLU). x: (N, H, W, Cin) NHWC."""
    N, H, W, Cin = x.shape
    Cout = w.shape[-1]
    a, Ho, Wo = _im2col_bf16(x, stride)
    K = a.shape[-1]

    # Lane-dense output stores for tiny Cout (final 512 -> 1 layer).
    cout_p = 128 if Cout < 64 else Cout
    wm = w.reshape(K, Cout)
    bm = b.reshape(1, Cout).astype(jnp.float32)
    if cout_p != Cout:
        wm = jnp.pad(wm, ((0, 0), (0, cout_p - Cout)))
        bm = jnp.pad(bm, ((0, 0), (0, cout_p - Cout)))
    wm = wm.astype(jnp.bfloat16)

    out = _matmul_conv(a.reshape(N * Ho * Wo, K), wm, bm, cout_p, neg_slope)
    if cout_p != Cout:
        out = out[:, :Cout]
    return out.reshape(N, Ho, Wo, Cout)


def conv2d_3x3_instnorm_lrelu(x, w, b, stride, *, fuse_budget_bytes=6 << 20):
    """3x3 conv -> InstanceNorm2d(affine=False) -> LeakyReLU(0.2). NHWC."""
    N, H, W, Cin = x.shape
    Cout = w.shape[-1]
    a, Ho, Wo = _im2col_bf16(x, stride)
    K = a.shape[-1]
    hw = Ho * Wo
    wm = w.reshape(K, Cout).astype(jnp.bfloat16)
    bm = b.reshape(1, Cout).astype(jnp.float32)

    per_sample_bytes = hw * K * 2 + hw * Cout * 4   # A tile (bf16) + out (f32)
    if per_sample_bytes <= fuse_budget_bytes:
        # Fully fused: conv output never round-trips through HBM.
        out = pl.pallas_call(
            _conv_instnorm_lrelu_kernel,
            out_shape=jax.ShapeDtypeStruct((N, hw, Cout), jnp.float32),
            grid=(N,),
            in_specs=[
                pl.BlockSpec((1, hw, K), lambda n: (n, 0, 0)),   # sample patches
                pl.BlockSpec((K, Cout), lambda n: (0, 0)),       # weights resident
                pl.BlockSpec((1, Cout), lambda n: (0, 0)),       # bias resident
            ],
            out_specs=pl.BlockSpec((1, hw, Cout), lambda n: (n, 0, 0)),
            compiler_params=pltpu.CompilerParams(
                dimension_semantics=("parallel",)),
        )(a, wm, bm)
        return out.reshape(N, Ho, Wo, Cout)

    # Fallback for very large samples: M-tiled conv, then per-sample norm.
    # TODO(synk): add a tiled two-pass InstanceNorm for samples exceeding VMEM.
    y = _matmul_conv(a.reshape(N * hw, K), wm, bm, Cout, None).reshape(N, hw, Cout)
    out = pl.pallas_call(
        _instnorm_lrelu_kernel,
        out_shape=jax.ShapeDtypeStruct((N, hw, Cout), jnp.float32),
        grid=(N,),
        in_specs=[pl.BlockSpec((1, hw, Cout), lambda n: (n, 0, 0))],
        out_specs=pl.BlockSpec((1, hw, Cout), lambda n: (n, 0, 0)),
        compiler_params=pltpu.CompilerParams(
            dimension_semantics=("parallel",)),
    )(y)
    return out.reshape(N, Ho, Wo, Cout)


# ---------------------------------------------------------------------------
# Model: deterministic parameter init + forward
# ---------------------------------------------------------------------------
_CONFIG = [
    # (cout, stride, instance_norm)
    (64, 2, False),
    (128, 2, True),
    (256, 2, True),
    (512, 1, True),
    (1, 1, False),     # final conv, no activation
]


def init_params(key, channels=3):
    params = []
    cin = channels
    for cout, _, _ in _CONFIG:
        key, kw, kb = jax.random.split(key, 3)
        bound = (9 * cin) ** -0.5
        w = jax.random.uniform(kw, (3, 3, cin, cout), jnp.float32, -bound, bound)
        b = jax.random.uniform(kb, (cout,), jnp.float32, -bound, bound)
        params.append((w, b))
        cin = cout
    return params


def ce_discriminator(img_nchw, params):
    """img_nchw: (N, C, H, W) like the PyTorch module; returns (N, 1, H/8, W/8)."""
    x = jnp.transpose(img_nchw, (0, 2, 3, 1)).astype(jnp.float32)   # -> NHWC
    n_layers = len(_CONFIG)
    for idx, ((cout, stride, norm), (w, b)) in enumerate(zip(_CONFIG, params)):
        is_last = idx == n_layers - 1
        if norm:
            x = conv2d_3x3_instnorm_lrelu(x, w, b, stride)
        elif is_last:
            x = conv2d_3x3(x, w, b, stride, neg_slope=None)
        else:   # first block: no norm, LeakyReLU fused into the conv kernel
            x = conv2d_3x3(x, w, b, stride, neg_slope=_SLOPE)
    return jnp.transpose(x, (0, 3, 1, 2))   # back to NCHW to match PyTorch


# ---------------------------------------------------------------------------
if __name__ == "__main__":
    key = jax.random.PRNGKey(0)
    k_img, k_par = jax.random.split(key)

    # Small but consistent shapes: batch=2, channels=3, 16x16 spatial.
    img = jax.random.normal(k_img, (2, 3, 16, 16), dtype=jnp.float32)
    params = init_params(k_par, channels=3)

    fwd = jax.jit(ce_discriminator)
    out = jax.block_until_ready(fwd(img, params))

    # 16 -> 8 -> 4 -> 2 (three stride-2 convs), then two stride-1 convs.
    assert out.shape == (2, 1, 2, 2), out.shape
    assert bool(jnp.all(jnp.isfinite(out)))
    print("KERNEL_OK")
</pallas_src>

<mosaic_0001>
module attributes {stable_mosaic.version = 11 : i64} {
  func.func @_conv_bias_act_kernel(%arg0: i32, %arg1: memref<128x27xbf16, #tpu.memory_space<vmem>>, %arg2: memref<27x64xbf16, #tpu.memory_space<vmem>>, %arg3: memref<1x64xf32, #tpu.memory_space<vmem>>, %arg4: memref<128x64xf32, #tpu.memory_space<vmem>>) attributes {dimension_semantics = [#tpu.dimension_semantics<parallel>], iteration_bounds = array<i64: 1>, scalar_prefetch = 0 : i64, scratch_operands = 0 : i64, tpu.core_type = #tpu.core_type<tc>, window_params = [{transform_indices = @transform_0, window_bounds = array<i64: 128, 27>}, {pipeline_mode = #tpu.pipeline_mode<synchronous>, transform_indices = @transform_1, window_bounds = array<i64: 27, 64>}, {pipeline_mode = #tpu.pipeline_mode<synchronous>, transform_indices = @transform_2, window_bounds = array<i64: 1, 64>}, {transform_indices = @transform_3, window_bounds = array<i64: 128, 64>}]} {
    %c0 = arith.constant 0 : index
    %c0_0 = arith.constant 0 : index
    %0 = vector.load %arg1[%c0, %c0_0] : memref<128x27xbf16, #tpu.memory_space<vmem>>, vector<128x27xbf16>
    %c0_1 = arith.constant 0 : index
    %c0_2 = arith.constant 0 : index
    %1 = vector.load %arg2[%c0_1, %c0_2] : memref<27x64xbf16, #tpu.memory_space<vmem>>, vector<27x64xbf16>
    %cst = arith.constant dense<0.000000e+00> : vector<128x64xf32>
    %2 = tpu.matmul %0, %1, %cst {dimension_numbers = #tpu.dot_dimension_numbers<[1], [0], [0], [1], [0, 0, 1, 1], [], []>} : vector<128x27xbf16>, vector<27x64xbf16>, vector<128x64xf32> -> vector<128x64xf32>
    %c0_3 = arith.constant 0 : index
    %c0_4 = arith.constant 0 : index
    %3 = vector.load %arg3[%c0_3, %c0_4] : memref<1x64xf32, #tpu.memory_space<vmem>>, vector<1x64xf32>
    %4 = vector.broadcast %3 : vector<1x64xf32> to vector<128x64xf32>
    %5 = arith.addf %2, %4 : vector<128x64xf32>
    %cst_5 = arith.constant 0.000000e+00 : f32
    %6 = vector.broadcast %cst_5 : f32 to vector<128x64xf32>
    %7 = arith.cmpf oge, %5, %6 : vector<128x64xf32>
    %cst_6 = arith.constant 2.000000e-01 : f32
    %8 = vector.broadcast %cst_6 : f32 to vector<128x64xf32>
    %9 = arith.mulf %8, %5 : vector<128x64xf32>
    %10 = arith.select %7, %5, %9 : vector<128x64xi1>, vector<128x64xf32>
    %c0_7 = arith.constant 0 : index
    %c0_8 = arith.constant 0 : index
    %11 = vector.load %arg4[%c0_7, %c0_8] : memref<128x64xf32, #tpu.memory_space<vmem>>, vector<128x64xf32>
    tpu.vector_store %arg4[%c0_7, %c0_8], %10 {strides = array<i32>} : memref<128x64xf32, #tpu.memory_space<vmem>>, vector<128x64xf32>,
    return
  }
  func.func @transform_0(%arg0: i32) -> (i32, i32) {
    %c0_i32 = arith.constant 0 : i32
    %c0_i32_0 = arith.constant 0 : i32
    return %arg0, %c0_i32 : i32, i32
  }
  func.func @transform_1(%arg0: i32) -> (i32, i32) {
    %c0_i32 = arith.constant 0 : i32
    %c0_i32_0 = arith.constant 0 : i32
    %c0_i32_1 = arith.constant 0 : i32
    return %c0_i32, %c0_i32_0 : i32, i32
  }
  func.func @transform_2(%arg0: i32) -> (i32, i32) {
    %c0_i32 = arith.constant 0 : i32
    %c0_i32_0 = arith.constant 0 : i32
    %c0_i32_1 = arith.constant 0 : i32
    return %c0_i32, %c0_i32_0 : i32, i32
  }
  func.func @transform_3(%arg0: i32) -> (i32, i32) {
    %c0_i32 = arith.constant 0 : i32
    %c0_i32_0 = arith.constant 0 : i32
    return %arg0, %c0_i32 : i32, i32
  }
}

module attributes {stable_mosaic.version = 11 : i64} {
  func.func @_conv_instnorm_lrelu_kernel(%arg0: i32, %arg1: memref<1x16x576xbf16, #tpu.memory_space<vmem>>, %arg2: memref<576x128xbf16, #tpu.memory_space<vmem>>, %arg3: memref<1x128xf32, #tpu.memory_space<vmem>>, %arg4: memref<1x16x128xf32, #tpu.memory_space<vmem>>) attributes {dimension_semantics = [#tpu.dimension_semantics<parallel>], iteration_bounds = array<i64: 2>, scalar_prefetch = 0 : i64, scratch_operands = 0 : i64, tpu.core_type = #tpu.core_type<tc>, window_params = [{transform_indices = @transform_0, window_bounds = array<i64: 1, 16, 576>}, {pipeline_mode = #tpu.pipeline_mode<synchronous>, transform_indices = @transform_1, window_bounds = array<i64: 576, 128>}, {pipeline_mode = #tpu.pipeline_mode<synchronous>, transform_indices = @transform_2, window_bounds = array<i64: 1, 128>}, {transform_indices = @transform_3, window_bounds = array<i64: 1, 16, 128>}]} {
    %c0 = arith.constant 0 : index
    %c0_0 = arith.constant 0 : index
    %c0_1 = arith.constant 0 : index
    %0 = vector.load %arg1[%c0, %c0_0, %c0_1] : memref<1x16x576xbf16, #tpu.memory_space<vmem>>, vector<1x16x576xbf16>
    %1 = vector.shape_cast %0 : vector<1x16x576xbf16> to vector<16x576xbf16>
    %c0_2 = arith.constant 0 : index
    %c0_3 = arith.constant 0 : index
    %2 = vector.load %arg2[%c0_2, %c0_3] : memref<576x128xbf16, #tpu.memory_space<vmem>>, vector<576x128xbf16>
    %cst = arith.constant dense<0.000000e+00> : vector<16x128xf32>
    %3 = tpu.matmul %1, %2, %cst {dimension_numbers = #tpu.dot_dimension_numbers<[1], [0], [0], [1], [0, 0, 1, 1], [], []>} : vector<16x576xbf16>, vector<576x128xbf16>, vector<16x128xf32> -> vector<16x128xf32>
    %c0_4 = arith.constant 0 : index
    %c0_5 = arith.constant 0 : index
    %4 = vector.load %arg3[%c0_4, %c0_5] : memref<1x128xf32, #tpu.memory_space<vmem>>, vector<1x128xf32>
    %5 = vector.broadcast %4 : vector<1x128xf32> to vector<16x128xf32>
    %6 = arith.addf %3, %5 : vector<16x128xf32>
    %cst_6 = arith.constant dense<0.000000e+00> : vector<128xf32>
    %7 = vector.multi_reduction <add>, %6, %cst_6 [0] : vector<16x128xf32> to vector<128xf32>
    %8 = vector.shape_cast %7 : vector<128xf32> to vector<1x128xf32>
    %cst_7 = arith.constant 6.250000e-02 : f32
    %9 = vector.broadcast %cst_7 : f32 to vector<1x128xf32>
    %10 = arith.mulf %8, %9 : vector<1x128xf32>
    %11 = vector.broadcast %10 : vector<1x128xf32> to vector<16x128xf32>
    %12 = arith.subf %6, %11 : vector<16x128xf32>
    %13 = arith.mulf %12, %12 : vector<16x128xf32>
    %cst_8 = arith.constant dense<0.000000e+00> : vector<128xf32>
    %14 = vector.multi_reduction <add>, %13, %cst_8 [0] : vector<16x128xf32> to vector<128xf32>
    %15 = vector.shape_cast %14 : vector<128xf32> to vector<1x128xf32>
    %cst_9 = arith.constant 6.250000e-02 : f32
    %16 = vector.broadcast %cst_9 : f32 to vector<1x128xf32>
    %17 = arith.mulf %15, %16 : vector<1x128xf32>
    %cst_10 = arith.constant 9.99999974E-6 : f32
    %18 = vector.broadcast %cst_10 : f32 to vector<1x128xf32>
    %19 = arith.addf %17, %18 : vector<1x128xf32>
    %20 = math.rsqrt %19 : vector<1x128xf32>
    %21 = vector.broadcast %20 : vector<1x128xf32> to vector<16x128xf32>
    %22 = arith.mulf %12, %21 : vector<16x128xf32>
    %cst_11 = arith.constant 0.000000e+00 : f32
    %23 = vector.broadcast %cst_11 : f32 to vector<16x128xf32>
    %24 = arith.cmpf oge, %22, %23 : vector<16x128xf32>
    %cst_12 = arith.constant 2.000000e-01 : f32
    %25 = vector.broadcast %cst_12 : f32 to vector<16x128xf32>
    %26 = arith.mulf %25, %22 : vector<16x128xf32>
    %27 = arith.select %24, %22, %26 : vector<16x128xi1>, vector<16x128xf32>
    %c0_13 = arith.constant 0 : index
    %c0_14 = arith.constant 0 : index
    %c0_15 = arith.constant 0 : index
    %28 = vector.load %arg4[%c0_13, %c0_14, %c0_15] : memref<1x16x128xf32, #tpu.memory_space<vmem>>, vector<1x16x128xf32>
    %29 = vector.shape_cast %28 : vector<1x16x128xf32> to vector<16x128xf32>
    %30 = vector.shape_cast %27 : vector<16x128xf32> to vector<1x16x128xf32>
    tpu.vector_store %arg4[%c0_13, %c0_14, %c0_15], %30 {strides = array<i32>} : memref<1x16x128xf32, #tpu.memory_space<vmem>>, vector<1x16x128xf32>,
    return
  }
  func.func @transform_0(%arg0: i32) -> (i32, i32, i32) {
    %c0_i32 = arith.constant 0 : i32
    %c0_i32_0 = arith.constant 0 : i32
    %c0_i32_1 = arith.constant 0 : i32
    return %arg0, %c0_i32, %c0_i32_0 : i32, i32, i32
  }
  func.func @transform_1(%arg0: i32) -> (i32, i32) {
    %c0_i32 = arith.constant 0 : i32
    %c0_i32_0 = arith.constant 0 : i32
    %c0_i32_1 = arith.constant 0 : i32
    return %c0_i32, %c0_i32_0 : i32, i32
  }
  func.func @transform_2(%arg0: i32) -> (i32, i32) {
    %c0_i32 = arith.constant 0 : i32
    %c0_i32_0 = arith.constant 0 : i32
    %c0_i32_1 = arith.constant 0 : i32
    return %c0_i32, %c0_i32_0 : i32, i32
  }
  func.func @transform_3(%arg0: i32) -> (i32, i32, i32) {
    %c0_i32 = arith.constant 0 : i32
    %c0_i32_0 = arith.constant 0 : i32
    %c0_i32_1 = arith.constant 0 : i32
    return %arg0, %c0_i32, %c0_i32_0 : i32, i32, i32
  }
}

module attributes {stable_mosaic.version = 11 : i64} {
  func.func @_conv_instnorm_lrelu_kernel(%arg0: i32, %arg1: memref<1x4x1152xbf16, #tpu.memory_space<vmem>>, %arg2: memref<1152x256xbf16, #tpu.memory_space<vmem>>, %arg3: memref<1x256xf32, #tpu.memory_space<vmem>>, %arg4: memref<1x4x256xf32, #tpu.memory_space<vmem>>) attributes {dimension_semantics = [#tpu.dimension_semantics<parallel>], iteration_bounds = array<i64: 2>, scalar_prefetch = 0 : i64, scratch_operands = 0 : i64, tpu.core_type = #tpu.core_type<tc>, window_params = [{transform_indices = @transform_0, window_bounds = array<i64: 1, 4, 1152>}, {pipeline_mode = #tpu.pipeline_mode<synchronous>, transform_indices = @transform_1, window_bounds = array<i64: 1152, 256>}, {pipeline_mode = #tpu.pipeline_mode<synchronous>, transform_indices = @transform_2, window_bounds = array<i64: 1, 256>}, {transform_indices = @transform_3, window_bounds = array<i64: 1, 4, 256>}]} {
    %c0 = arith.constant 0 : index
    %c0_0 = arith.constant 0 : index
    %c0_1 = arith.constant 0 : index
    %0 = vector.load %arg1[%c0, %c0_0, %c0_1] : memref<1x4x1152xbf16, #tpu.memory_space<vmem>>, vector<1x4x1152xbf16>
    %1 = vector.shape_cast %0 : vector<1x4x1152xbf16> to vector<4x1152xbf16>
    %c0_2 = arith.constant 0 : index
    %c0_3 = arith.constant 0 : index
    %2 = vector.load %arg2[%c0_2, %c0_3] : memref<1152x256xbf16, #tpu.memory_space<vmem>>, vector<1152x256xbf16>
    %cst = arith.constant dense<0.000000e+00> : vector<4x256xf32>
    %3 = tpu.matmul %1, %2, %cst {dimension_numbers = #tpu.dot_dimension_numbers<[1], [0], [0], [1], [0, 0, 1, 1], [], []>} : vector<4x1152xbf16>, vector<1152x256xbf16>, vector<4x256xf32> -> vector<4x256xf32>
    %c0_4 = arith.constant 0 : index
    %c0_5 = arith.constant 0 : index
    %4 = vector.load %arg3[%c0_4, %c0_5] : memref<1x256xf32, #tpu.memory_space<vmem>>, vector<1x256xf32>
    %5 = vector.broadcast %4 : vector<1x256xf32> to vector<4x256xf32>
    %6 = arith.addf %3, %5 : vector<4x256xf32>
    %cst_6 = arith.constant dense<0.000000e+00> : vector<256xf32>
    %7 = vector.multi_reduction <add>, %6, %cst_6 [0] : vector<4x256xf32> to vector<256xf32>
    %8 = vector.shape_cast %7 : vector<256xf32> to vector<1x256xf32>
    %cst_7 = arith.constant 2.500000e-01 : f32
    %9 = vector.broadcast %cst_7 : f32 to vector<1x256xf32>
    %10 = arith.mulf %8, %9 : vector<1x256xf32>
    %11 = vector.broadcast %10 : vector<1x256xf32> to vector<4x256xf32>
    %12 = arith.subf %6, %11 : vector<4x256xf32>
    %13 = arith.mulf %12, %12 : vector<4x256xf32>
    %cst_8 = arith.constant dense<0.000000e+00> : vector<256xf32>
    %14 = vector.multi_reduction <add>, %13, %cst_8 [0] : vector<4x256xf32> to vector<256xf32>
    %15 = vector.shape_cast %14 : vector<256xf32> to vector<1x256xf32>
    %cst_9 = arith.constant 2.500000e-01 : f32
    %16 = vector.broadcast %cst_9 : f32 to vector<1x256xf32>
    %17 = arith.mulf %15, %16 : vector<1x256xf32>
    %cst_10 = arith.constant 9.99999974E-6 : f32
    %18 = vector.broadcast %cst_10 : f32 to vector<1x256xf32>
    %19 = arith.addf %17, %18 : vector<1x256xf32>
    %20 = math.rsqrt %19 : vector<1x256xf32>
    %21 = vector.broadcast %20 : vector<1x256xf32> to vector<4x256xf32>
    %22 = arith.mulf %12, %21 : vector<4x256xf32>
    %cst_11 = arith.constant 0.000000e+00 : f32
    %23 = vector.broadcast %cst_11 : f32 to vector<4x256xf32>
    %24 = arith.cmpf oge, %22, %23 : vector<4x256xf32>
    %cst_12 = arith.constant 2.000000e-01 : f32
    %25 = vector.broadcast %cst_12 : f32 to vector<4x256xf32>
    %26 = arith.mulf %25, %22 : vector<4x256xf32>
    %27 = arith.select %24, %22, %26 : vector<4x256xi1>, vector<4x256xf32>
    %c0_13 = arith.constant 0 : index
    %c0_14 = arith.constant 0 : index
    %c0_15 = arith.constant 0 : index
    %28 = vector.load %arg4[%c0_13, %c0_14, %c0_15] : memref<1x4x256xf32, #tpu.memory_space<vmem>>, vector<1x4x256xf32>
    %29 = vector.shape_cast %28 : vector<1x4x256xf32> to vector<4x256xf32>
    %30 = vector.shape_cast %27 : vector<4x256xf32> to vector<1x4x256xf32>
    tpu.vector_store %arg4[%c0_13, %c0_14, %c0_15], %30 {strides = array<i32>} : memref<1x4x256xf32, #tpu.memory_space<vmem>>, vector<1x4x256xf32>,
    return
  }
  func.func @transform_0(%arg0: i32) -> (i32, i32, i32) {
    %c0_i32 = arith.constant 0 : i32
    %c0_i32_0 = arith.constant 0 : i32
    %c0_i32_1 = arith.constant 0 : i32
    return %arg0, %c0_i32, %c0_i32_0 : i32, i32, i32
  }
  func.func @transform_1(%arg0: i32) -> (i32, i32) {
    %c0_i32 = arith.constant 0 : i32
    %c0_i32_0 = arith.constant 0 : i32
    %c0_i32_1 = arith.constant 0 : i32
    return %c0_i32, %c0_i32_0 : i32, i32
  }
  func.func @transform_2(%arg0: i32) -> (i32, i32) {
    %c0_i32 = arith.constant 0 : i32
    %c0_i32_0 = arith.constant 0 : i32
    %c0_i32_1 = arith.constant 0 : i32
    return %c0_i32, %c0_i32_0 : i32, i32
  }
  func.func @transform_3(%arg0: i32) -> (i32, i32, i32) {
    %c0_i32 = arith.constant 0 : i32
    %c0_i32_0 = arith.constant 0 : i32
    %c0_i32_1 = arith.constant 0 : i32
    return %arg0, %c0_i32, %c0_i32_0 : i32, i32, i32
  }
}

module attributes {stable_mosaic.version = 11 : i64} {
  func.func @_conv_instnorm_lrelu_kernel(%arg0: i32, %arg1: memref<1x4x2304xbf16, #tpu.memory_space<vmem>>, %arg2: memref<2304x512xbf16, #tpu.memory_space<vmem>>, %arg3: memref<1x512xf32, #tpu.memory_space<vmem>>, %arg4: memref<1x4x512xf32, #tpu.memory_space<vmem>>) attributes {dimension_semantics = [#tpu.dimension_semantics<parallel>], iteration_bounds = array<i64: 2>, scalar_prefetch = 0 : i64, scratch_operands = 0 : i64, tpu.core_type = #tpu.core_type<tc>, window_params = [{transform_indices = @transform_0, window_bounds = array<i64: 1, 4, 2304>}, {pipeline_mode = #tpu.pipeline_mode<synchronous>, transform_indices = @transform_1, window_bounds = array<i64: 2304, 512>}, {pipeline_mode = #tpu.pipeline_mode<synchronous>, transform_indices = @transform_2, window_bounds = array<i64: 1, 512>}, {transform_indices = @transform_3, window_bounds = array<i64: 1, 4, 512>}]} {
    %c0 = arith.constant 0 : index
    %c0_0 = arith.constant 0 : index
    %c0_1 = arith.constant 0 : index
    %0 = vector.load %arg1[%c0, %c0_0, %c0_1] : memref<1x4x2304xbf16, #tpu.memory_space<vmem>>, vector<1x4x2304xbf16>
    %1 = vector.shape_cast %0 : vector<1x4x2304xbf16> to vector<4x2304xbf16>
    %c0_2 = arith.constant 0 : index
    %c0_3 = arith.constant 0 : index
    %2 = vector.load %arg2[%c0_2, %c0_3] : memref<2304x512xbf16, #tpu.memory_space<vmem>>, vector<2304x512xbf16>
    %cst = arith.constant dense<0.000000e+00> : vector<4x512xf32>
    %3 = tpu.matmul %1, %2, %cst {dimension_numbers = #tpu.dot_dimension_numbers<[1], [0], [0], [1], [0, 0, 1, 1], [], []>} : vector<4x2304xbf16>, vector<2304x512xbf16>, vector<4x512xf32> -> vector<4x512xf32>
    %c0_4 = arith.constant 0 : index
    %c0_5 = arith.constant 0 : index
    %4 = vector.load %arg3[%c0_4, %c0_5] : memref<1x512xf32, #tpu.memory_space<vmem>>, vector<1x512xf32>
    %5 = vector.broadcast %4 : vector<1x512xf32> to vector<4x512xf32>
    %6 = arith.addf %3, %5 : vector<4x512xf32>
    %cst_6 = arith.constant dense<0.000000e+00> : vector<512xf32>
    %7 = vector.multi_reduction <add>, %6, %cst_6 [0] : vector<4x512xf32> to vector<512xf32>
    %8 = vector.shape_cast %7 : vector<512xf32> to vector<1x512xf32>
    %cst_7 = arith.constant 2.500000e-01 : f32
    %9 = vector.broadcast %cst_7 : f32 to vector<1x512xf32>
    %10 = arith.mulf %8, %9 : vector<1x512xf32>
    %11 = vector.broadcast %10 : vector<1x512xf32> to vector<4x512xf32>
    %12 = arith.subf %6, %11 : vector<4x512xf32>
    %13 = arith.mulf %12, %12 : vector<4x512xf32>
    %cst_8 = arith.constant dense<0.000000e+00> : vector<512xf32>
    %14 = vector.multi_reduction <add>, %13, %cst_8 [0] : vector<4x512xf32> to vector<512xf32>
    %15 = vector.shape_cast %14 : vector<512xf32> to vector<1x512xf32>
    %cst_9 = arith.constant 2.500000e-01 : f32
    %16 = vector.broadcast %cst_9 : f32 to vector<1x512xf32>
    %17 = arith.mulf %15, %16 : vector<1x512xf32>
    %cst_10 = arith.constant 9.99999974E-6 : f32
    %18 = vector.broadcast %cst_10 : f32 to vector<1x512xf32>
    %19 = arith.addf %17, %18 : vector<1x512xf32>
    %20 = math.rsqrt %19 : vector<1x512xf32>
    %21 = vector.broadcast %20 : vector<1x512xf32> to vector<4x512xf32>
    %22 = arith.mulf %12, %21 : vector<4x512xf32>
    %cst_11 = arith.constant 0.000000e+00 : f32
    %23 = vector.broadcast %cst_11 : f32 to vector<4x512xf32>
    %24 = arith.cmpf oge, %22, %23 : vector<4x512xf32>
    %cst_12 = arith.constant 2.000000e-01 : f32
    %25 = vector.broadcast %cst_12 : f32 to vector<4x512xf32>
    %26 = arith.mulf %25, %22 : vector<4x512xf32>
    %27 = arith.select %24, %22, %26 : vector<4x512xi1>, vector<4x512xf32>
    %c0_13 = arith.constant 0 : index
    %c0_14 = arith.constant 0 : index
    %c0_15 = arith.constant 0 : index
    %28 = vector.load %arg4[%c0_13, %c0_14, %c0_15] : memref<1x4x512xf32, #tpu.memory_space<vmem>>, vector<1x4x512xf32>
    %29 = vector.shape_cast %28 : vector<1x4x512xf32> to vector<4x512xf32>
    %30 = vector.shape_cast %27 : vector<4x512xf32> to vector<1x4x512xf32>
    tpu.vector_store %arg4[%c0_13, %c0_14, %c0_15], %30 {strides = array<i32>} : memref<1x4x512xf32, #tpu.memory_space<vmem>>, vector<1x4x512xf32>,
    return
  }
  func.func @transform_0(%arg0: i32) -> (i32, i32, i32) {
    %c0_i32 = arith.constant 0 : i32
    %c0_i32_0 = arith.constant 0 : i32
    %c0_i32_1 = arith.constant 0 : i32
    return %arg0, %c0_i32, %c0_i32_0 : i32, i32, i32
  }
  func.func @transform_1(%arg0: i32) -> (i32, i32) {
    %c0_i32 = arith.constant 0 : i32
    %c0_i32_0 = arith.constant 0 : i32
    %c0_i32_1 = arith.constant 0 : i32
    return %c0_i32, %c0_i32_0 : i32, i32
  }
  func.func @transform_2(%arg0: i32) -> (i32, i32) {
    %c0_i32 = arith.constant 0 : i32
    %c0_i32_0 = arith.constant 0 : i32
    %c0_i32_1 = arith.constant 0 : i32
    return %c0_i32, %c0_i32_0 : i32, i32
  }
  func.func @transform_3(%arg0: i32) -> (i32, i32, i32) {
    %c0_i32 = arith.constant 0 : i32
    %c0_i32_0 = arith.constant 0 : i32
    %c0_i32_1 = arith.constant 0 : i32
    return %arg0, %c0_i32, %c0_i32_0 : i32, i32, i32
  }
}

module attributes {stable_mosaic.version = 11 : i64} {
  func.func @_conv_bias_act_kernel(%arg0: i32, %arg1: memref<8x4608xbf16, #tpu.memory_space<vmem>>, %arg2: memref<4608x128xbf16, #tpu.memory_space<vmem>>, %arg3: memref<1x128xf32, #tpu.memory_space<vmem>>, %arg4: memref<8x128xf32, #tpu.memory_space<vmem>>) attributes {dimension_semantics = [#tpu.dimension_semantics<parallel>], iteration_bounds = array<i64: 1>, scalar_prefetch = 0 : i64, scratch_operands = 0 : i64, tpu.core_type = #tpu.core_type<tc>, window_params = [{transform_indices = @transform_0, window_bounds = array<i64: 8, 4608>}, {pipeline_mode = #tpu.pipeline_mode<synchronous>, transform_indices = @transform_1, window_bounds = array<i64: 4608, 128>}, {pipeline_mode = #tpu.pipeline_mode<synchronous>, transform_indices = @transform_2, window_bounds = array<i64: 1, 128>}, {transform_indices = @transform_3, window_bounds = array<i64: 8, 128>}]} {
    %c0 = arith.constant 0 : index
    %c0_0 = arith.constant 0 : index
    %0 = vector.load %arg1[%c0, %c0_0] : memref<8x4608xbf16, #tpu.memory_space<vmem>>, vector<8x4608xbf16>
    %c0_1 = arith.constant 0 : index
    %c0_2 = arith.constant 0 : index
    %1 = vector.load %arg2[%c0_1, %c0_2] : memref<4608x128xbf16, #tpu.memory_space<vmem>>, vector<4608x128xbf16>
    %cst = arith.constant dense<0.000000e+00> : vector<8x128xf32>
    %2 = tpu.matmul %0, %1, %cst {dimension_numbers = #tpu.dot_dimension_numbers<[1], [0], [0], [1], [0, 0, 1, 1], [], []>} : vector<8x4608xbf16>, vector<4608x128xbf16>, vector<8x128xf32> -> vector<8x128xf32>
    %c0_3 = arith.constant 0 : index
    %c0_4 = arith.constant 0 : index
    %3 = vector.load %arg3[%c0_3, %c0_4] : memref<1x128xf32, #tpu.memory_space<vmem>>, vector<1x128xf32>
    %4 = vector.broadcast %3 : vector<1x128xf32> to vector<8x128xf32>
    %5 = arith.addf %2, %4 : vector<8x128xf32>
    %c0_5 = arith.constant 0 : index
    %c0_6 = arith.constant 0 : index
    %6 = vector.load %arg4[%c0_5, %c0_6] : memref<8x128xf32, #tpu.memory_space<vmem>>, vector<8x128xf32>
    tpu.vector_store %arg4[%c0_5, %c0_6], %5 {strides = array<i32>} : memref<8x128xf32, #tpu.memory_space<vmem>>, vector<8x128xf32>,
    return
  }
  func.func @transform_0(%arg0: i32) -> (i32, i32) {
    %c0_i32 = arith.constant 0 : i32
    %c0_i32_0 = arith.constant 0 : i32
    return %arg0, %c0_i32 : i32, i32
  }
  func.func @transform_1(%arg0: i32) -> (i32, i32) {
    %c0_i32 = arith.constant 0 : i32
    %c0_i32_0 = arith.constant 0 : i32
    %c0_i32_1 = arith.constant 0 : i32
    return %c0_i32, %c0_i32_0 : i32, i32
  }
  func.func @transform_2(%arg0: i32) -> (i32, i32) {
    %c0_i32 = arith.constant 0 : i32
    %c0_i32_0 = arith.constant 0 : i32
    %c0_i32_1 = arith.constant 0 : i32
    return %c0_i32, %c0_i32_0 : i32, i32
  }
  func.func @transform_3(%arg0: i32) -> (i32, i32) {
    %c0_i32 = arith.constant 0 : i32
    %c0_i32_0 = arith.constant 0 : i32
    return %arg0, %c0_i32 : i32, i32
  }
}

</mosaic_0001>

<bundles_post_ra>
// kernel: ce_discriminator.5
= control target key start
LH: loop header
LB: loop body
LE: loop exit
PB: predicated region body
PF: predicated region fallthrough
CT: control target
= control target key end

     0   :  { %8 = vsyncpa [#allocation3], 0  ;;  %s393_s12 = smov [#allocation2]   ;;  %s547_s0 = inlined_call_operand.vmem [shape: bf16[128,27], index: 0, kind: input, shape index: {}]   ;;  %s548_s1 = inlined_call_operand.vmem [shape: bf16[27,64], index: 1, kind: input, shape index: {}]   ;;  %s549_s2 = inlined_call_operand.hbm [shape: f32[1,64], index: 2, kind: input, shape index: {}]   ;;  %s550_s3 = inlined_call_operand.vmem [shape: f32[128,64], index: 3, kind: output, shape index: {}]  }
   0x1   :  { %s19_s13 = sshll.u32 %s393_s12, 4  ;;  %s369_s16 = scalar_lea.hbm %s549_s2, 16  ;;  %s20_s13 = int_to_ptr.vmem [resolvable:$true] %s19_s13 }
   0x2   :  { %p370_p0 = scmp.ne.s32.totalorder %s549_s2, %s369_s16  ;;  %p373_p1 = scmp.lt.u32.totalorder %s369_s16, %s549_s2 }
   0x4   :  { %p375_p2 = pnand %p373_p1, %p370_p0 }
   0x6   :  { %378 = shalt.err (!%p375_p2)
}
   0x7   :  { %s379_s21 = scalar_lea.vmem %s20_s13, 16  ;;  %s383_s22 = scalar_lea.vmem %s20_s13, 32 }
   0x8   :  { %p380_p3 = scmp.ne.s32.totalorder %s20_s13, %s379_s21  ;;  %p384_p4 = scmp.lt.s32.totalorder %s20_s13, %s20_s13 }
   0x9   :  { %p385_p5 = scmp.lt.s32.totalorder %s383_s22, %s379_s21 }
   0xb   :  { %p386_p6 = por %p385_p5, %p384_p4 }
   0xd   :  { %p387_p7 = pnand %p386_p6, %p380_p3 }
   0xf   :  { %390 = shalt.err (!%p387_p7)
}
  0x10   :  { %22 = dma.hbm_to_vmem [thread:$0]  %s549_s2, 16, %s20_s13, [#allocation3]  }
  0x11   :  { %391 = dma.done.wait [#allocation3], 16  }
  0x12   :  { %392 = vsyncadd [#allocation3], 4294967280  ;;  %vm130_vm0 = vcmask 1044480   ;;  %vm131_vm1 = vcmask 1045504   ;;  %v394_v0 = vmov 65535   ;;  %vm105_vm2 = vcmask 220160  }
  0x13   :  { %v132_v1 = vsel %vm130_vm0, 4294967295, %v394_v0  ;;  %v359_v2 = vld [vmem:[%s548_s1] sm:$0xff]   ;;  %v360_v4 = vld [vmem:[%s548_s1 + $0x8] sm:$0x3f]   ;;  %v365_v10 = vld [vmem:[%s547_s0 + $0x10] sm:$0xff]   ;;  %vm282_vm3 = vcmask 523264  }
  0x14   :  { %v133_v3 = vsel %vm131_vm1, %v132_v1, 0  ;;  %333 = vmatprep.subr.bf16.mxu0 %v359_v2  ;;  %353 = vmatprep.subr.bf16.mxu1 %v359_v2  ;;  %v361_v5 = vld [vmem:[%s547_s0] sm:$0xff]   ;;  %v363_v8 = vld [vmem:[%s547_s0 + $0x8] sm:$0xff]   ;;  %v366_v11 = vld [vmem:[%s547_s0 + $0x30] sm:$0xff]  }
  0x15   :  { %334 = vmatpush3.bf16.msra.mxu0 %v359_v2  ;;  %355 = vmatpush3.bf16.msra.mxu1 %v359_v2  ;;  %v135_v6 = vand.u32 %v360_v4, %v133_v3  ;;  %v362_v7 = vld [vmem:[%s547_s0 + $0x20] sm:$0xff]   ;;  %v364_v9 = vld [vmem:[%s547_s0 + $0x28] sm:$0xff]   ;;  %v367_v12 = vld [vmem:[%s547_s0 + $0x18] sm:$0xff]  }
  0x16   :  { %337 = vmatprep.mubr.msk.bf16.mxu0 %vm105_vm2, %v361_v5  ;;  %345 = vmatprep.mubr.msk.bf16.mxu1 %vm105_vm2, %v362_v7  ;;  %v368_v13 = vld [vmem:[%s547_s0 + $0x38] sm:$0xff]   ;;  %v465_v14 = vld [vmem:[#allocation2] ss:$0 sm:$0xff] }
  0x17   :  { %335 = vmatprep.subr.bf16.mxu0 %v135_v6  ;;  %354 = vmatprep.subr.bf16.mxu1 %v135_v6 }
  0x19   :  { %336 = vmatpush3.bf16.msra.mxu0 %v135_v6  ;;  %356 = vmatpush3.bf16.msra.mxu1 %v135_v6 }
  0x1c   :  { %338 = vmatmul.mubr.msk.bf16.vlgmr.msra.gmra.mrb[0].mxu0 %vm105_vm2, %v363_v8  ;;  %346 = vmatmul.mubr.msk.bf16.vlgmr.msra.gmra.mrb[0].mxu1 %vm105_vm2, %v364_v9 }
  0x1d   :  { %341 = vmatprep.mubr.msk.bf16.mxu0 %vm105_vm2, %v365_v10  ;;  %349 = vmatprep.mubr.msk.bf16.mxu1 %vm105_vm2, %v366_v11 }
  0x24   :  { %342 = vmatmul.mubr.msk.bf16.gmra.mrb[4].mxu0 %vm105_vm2, %v367_v12  ;;  %350 = vmatmul.mubr.msk.bf16.gmra.mrb[4].mxu1 %vm105_vm2, %v368_v13 }
  0xef   :  { %v339_v15 = vpop.f32.mrb[0].mxu0  ;;  %v347_v16 = vpop.f32.mrb[0].mxu1 }
  0xf0   :  { %v180_v17 = vadd.f32 %v339_v15, %v465_v14  ;;  %v212_v18 = vadd.f32 %v347_v16, %v465_v14  ;;  %v171_v19 = vpop.f32.mrb[1].mxu0  ;;  %v203_v20 = vpop.f32.mrb[1].mxu1 }
  0xf1   :  { %v172_v21 = vadd.f32 %v465_v14, %v171_v19  ;;  %v204_v22 = vadd.f32 %v465_v14, %v203_v20  ;;  %v340_v23 = vpop.f32.mrb[2].mxu0  ;;  %v348_v24 = vpop.f32.mrb[2].mxu1 }
  0xf2   :  { %vm236_vm4 = vcmp.ge.f32.partialorder %v180_v17, 0.0  ;;  %v252_v25 = vmul.f32 0.2, %v180_v17  ;;  %vm244_vm5 = vcmp.ge.f32.partialorder %v212_v18, 0.0  ;;  %v260_v26 = vmul.f32 0.2, %v212_v18 }
  0xf3   :  { %vm234_vm6 = vcmp.ge.f32.partialorder %v172_v21, 0.0  ;;  %v250_v27 = vmul.f32 0.2, %v172_v21  ;;  %vm242_vm7 = vcmp.ge.f32.partialorder %v204_v22, 0.0  ;;  %v258_v28 = vmul.f32 0.2, %v204_v22 }
  0xf4   :  { %v268_v29 = vsel %vm236_vm4, %v180_v17, %v252_v25  ;;  %v276_v30 = vsel %vm244_vm5, %v212_v18, %v260_v26  ;;  %v183_v31 = vadd.f32 %v340_v23, %v465_v14  ;;  %v215_v32 = vadd.f32 %v348_v24, %v465_v14  ;;  %v174_v33 = vpop.f32.mrb[3].mxu0  ;;  %v206_v34 = vpop.f32.mrb[3].mxu1 }
  0xf5   :  { %285 = vst.msk [vmem:[%s550_s3 + $0x10] sm:$0xff] %vm282_vm3, %v268_v29  ;;  %293 = vst.msk [vmem:[%s550_s3 + $0x50] sm:$0xff] %vm282_vm3, %v276_v30  ;;  %v266_v35 = vsel %vm234_vm6, %v172_v21, %v250_v27  ;;  %v274_v36 = vsel %vm242_vm7, %v204_v22, %v258_v28  ;;  %v175_v37 = vadd.f32 %v465_v14, %v174_v33 }
  0xf6   :  { %v207_v38 = vadd.f32 %v465_v14, %v206_v34  ;;  %283 = vst.msk [vmem:[%s550_s3] sm:$0xff] %vm282_vm3, %v266_v35  ;;  %291 = vst.msk [vmem:[%s550_s3 + $0x40] sm:$0xff] %vm282_vm3, %v274_v36  ;;  %vm237_vm8 = vcmp.ge.f32.partialorder %v183_v31, 0.0  ;;  %v253_v39 = vmul.f32 0.2, %v183_v31  ;;  %vm245_vm9 = vcmp.ge.f32.partialorder %v215_v32, 0.0 }
  0xf7   :  { %v261_v40 = vmul.f32 0.2, %v215_v32  ;;  %vm235_vm10 = vcmp.ge.f32.partialorder %v175_v37, 0.0  ;;  %v251_v41 = vmul.f32 0.2, %v175_v37  ;;  %v343_v45 = vpop.f32.mrb[4].mxu0 }
  0xf8   :  { %vm243_vm11 = vcmp.ge.f32.partialorder %v207_v38, 0.0  ;;  %v259_v42 = vmul.f32 0.2, %v207_v38  ;;  %v269_v43 = vsel %vm237_vm8, %v183_v31, %v253_v39  ;;  %v351_v46 = vpop.f32.mrb[4].mxu1  ;;  %v196_v49 = vadd.f32 %v343_v45, %v465_v14  ;;  %v187_v51 = vpop.f32.mrb[5].mxu0 }
  0xf9   :  { %v277_v44 = vsel %vm245_vm9, %v215_v32, %v261_v40  ;;  %286 = vst.msk [vmem:[%s550_s3 + $0x18] sm:$0xff] %vm282_vm3, %v269_v43  ;;  %v267_v47 = vsel %vm235_vm10, %v175_v37, %v251_v41  ;;  %v228_v50 = vadd.f32 %v351_v46, %v465_v14  ;;  %v219_v52 = vpop.f32.mrb[5].mxu1  ;;  %v188_v53 = vadd.f32 %v465_v14, %v187_v51  ;;  %v344_v55 = vpop.f32.mrb[6].mxu0 }
  0xfa   :  { %294 = vst.msk [vmem:[%s550_s3 + $0x58] sm:$0xff] %vm282_vm3, %v277_v44  ;;  %v275_v48 = vsel %vm243_vm11, %v207_v38, %v259_v42  ;;  %284 = vst.msk [vmem:[%s550_s3 + $0x8] sm:$0xff] %vm282_vm3, %v267_v47  ;;  %v220_v54 = vadd.f32 %v465_v14, %v219_v52  ;;  %v352_v56 = vpop.f32.mrb[6].mxu1  ;;  %vm240_vm12 = vcmp.ge.f32.partialorder %v196_v49, 0.0  ;;  %v256_v57 = vmul.f32 0.2, %v196_v49 }
  0xfb   :  { %292 = vst.msk [vmem:[%s550_s3 + $0x48] sm:$0xff] %vm282_vm3, %v275_v48  ;;  %vm248_vm13 = vcmp.ge.f32.partialorder %v228_v50, 0.0  ;;  %v264_v58 = vmul.f32 0.2, %v228_v50  ;;  %vm238_vm14 = vcmp.ge.f32.partialorder %v188_v53, 0.0  ;;  %v199_v63 = vadd.f32 %v344_v55, %v465_v14  ;;  %v190_v1 = vpop.f32.mrb[7].mxu0 }
  0xfc   :  { %v254_v59 = vmul.f32 0.2, %v188_v53  ;;  %vm246_vm15 = vcmp.ge.f32.partialorder %v220_v54, 0.0  ;;  %v262_v60 = vmul.f32 0.2, %v220_v54  ;;  %v272_v61 = vsel %vm240_vm12, %v196_v49, %v256_v57  ;;  %v222_v2 = vpop.f32.mrb[7].mxu1 }
  0xfd   :  { %v280_v62 = vsel %vm248_vm13, %v228_v50, %v264_v58  ;;  %v231_v0 = vadd.f32 %v352_v56, %v465_v14  ;;  %289 = vst.msk [vmem:[%s550_s3 + $0x30] sm:$0xff] %vm282_vm3, %v272_v61  ;;  %v191_v5 = vadd.f32 %v465_v14, %v190_v1  ;;  %v223_v6 = vadd.f32 %v465_v14, %v222_v2 }
  0xfe   :  { %297 = vst.msk [vmem:[%s550_s3 + $0x70] sm:$0xff] %vm282_vm3, %v280_v62  ;;  %v270_v3 = vsel %vm238_vm14, %v188_v53, %v254_v59  ;;  %v278_v4 = vsel %vm246_vm15, %v220_v54, %v262_v60  ;;  %vm241_vm0 = vcmp.ge.f32.partialorder %v199_v63, 0.0  ;;  %v257_v7 = vmul.f32 0.2, %v199_v63 }
  0xff   :  { %287 = vst.msk [vmem:[%s550_s3 + $0x20] sm:$0xff] %vm282_vm3, %v270_v3  ;;  %295 = vst.msk [vmem:[%s550_s3 + $0x60] sm:$0xff] %vm282_vm3, %v278_v4  ;;  %vm249_vm1 = vcmp.ge.f32.partialorder %v231_v0, 0.0  ;;  %v265_v8 = vmul.f32 0.2, %v231_v0  ;;  %vm239_vm2 = vcmp.ge.f32.partialorder %v191_v5, 0.0 }
 0x100   :  { %v255_v9 = vmul.f32 0.2, %v191_v5  ;;  %vm247_vm4 = vcmp.ge.f32.partialorder %v223_v6, 0.0  ;;  %v263_v10 = vmul.f32 0.2, %v223_v6  ;;  %v273_v11 = vsel %vm241_vm0, %v199_v63, %v257_v7 }
 0x101   :  { %v281_v12 = vsel %vm249_vm1, %v231_v0, %v265_v8  ;;  %290 = vst.msk [vmem:[%s550_s3 + $0x38] sm:$0xff] %vm282_vm3, %v273_v11 }
 0x102   :  { %298 = vst.msk [vmem:[%s550_s3 + $0x78] sm:$0xff] %vm282_vm3, %v281_v12  ;;  %v271_v13 = vsel %vm239_vm2, %v191_v5, %v255_v9  ;;  %v279_v14 = vsel %vm247_vm4, %v223_v6, %v263_v10 }
 0x103   :  { %288 = vst.msk [vmem:[%s550_s3 + $0x28] sm:$0xff] %vm282_vm3, %v271_v13  ;;  %296 = vst.msk [vmem:[%s550_s3 + $0x68] sm:$0xff] %vm282_vm3, %v279_v14 }
 0x104   :  { %303 = vsyncpa [#allocation3], 1 }

// kernel: ce_discriminator.6
= control target key start
LH: loop header
LB: loop body
LE: loop exit
PB: predicated region body
PF: predicated region fallthrough
CT: control target
= control target key end

     0   :  { %s913_s12 = smov 0   ;;  %s1056_s0 = inlined_call_operand.vmem [shape: bf16[2,16,576], index: 0, kind: input, shape index: {}]   ;;  %s1057_s1 = inlined_call_operand.vmem [shape: bf16[576,128], index: 1, kind: input, shape index: {}]   ;;  %s1058_s2 = inlined_call_operand.vmem [shape: f32[1,128], index: 2, kind: input, shape index: {}]   ;;  %s1059_s3 = inlined_call_operand.vmem [shape: f32[2,16,128], index: 3, kind: output, shape index: {}]  }
   0x1 LB: > { %s712_s13 = sadd.s32 4294967295, %s889_s12   ;;  %p716_p0 = scmp.ge.s32.totalorder %s889_s12, 1  ;;  %s889_s12 = sphi %s913_s12, %s13_s12  }
   0x2   : > { %p137_p1 = scmp.lt.s32.totalorder %s889_s12, 3 }
   0x4   : > { %p138_p2 = pnand %p716_p0, %p137_p1 }
   0x5   : > { %v838_v0 = vld [vmem:[%s1057_s1 + $0x40] sm:$0xff] (!%p138_p2)   ;;  %v842_v4 = vld [vmem:[%s1057_s1 + $0x48] sm:$0xff] (!%p138_p2)   ;;  %v846_v8 = vld [vmem:[%s1057_s1 + $0x50] sm:$0xff] (!%p138_p2)   ;;  %p161_p3 = scmp.lt.s32.totalorder (!%p138_p2), %s712_s13, 1  ;;  %v891_v33 = vmov (!%p138_p2), 0.0   ;;  %vm892_vm0 = vmmov (!%p138_p2), 0  }
   0x6   : > { %141 = sbr.rel (%p138_p2) target bundleno = 325 (0x145), region = 32  ;;  %v839_v1 = vld [vmem:[%s1057_s1] sm:$0xff] (!%p138_p2)   ;;  %766 = vmatprep.subr.bf16.mxu0 (!%p138_p2), %v838_v0  ;;  %v843_v5 = vld [vmem:[%s1057_s1 + $0x8] sm:$0xff] (!%p138_p2)   ;;  %v847_v9 = vld [vmem:[%s1057_s1 + $0x10] sm:$0xff] (!%p138_p2)   ;;  %vm498_vm1 = vcmask (!%p138_p2), 523264  }
   0x7   : > { %v840_v2 = vld [vmem:[%s1057_s1 + $0xc0] sm:$0xff] (!%p138_p2)   ;;  %767 = vmatpush3.bf16.msra.mxu0 (!%p138_p2), %v839_v1  ;;  %v844_v6 = vld [vmem:[%s1057_s1 + $0xc8] sm:$0xff] (!%p138_p2)   ;;  %v848_v10 = vld [vmem:[%s1057_s1 + $0xd0] sm:$0xff] (!%p138_p2)  }
   0x8   : > { %v841_v3 = vld [vmem:[%s1057_s1 + $0x80] sm:$0xff] (!%p138_p2)   ;;  %788 = vmatprep.subr.bf16.mxu1 (!%p138_p2), %v840_v2  ;;  %768 = vmatprep.subr.bf16.mxu0 (!%p138_p2), %v842_v4  ;;  %v845_v7 = vld [vmem:[%s1057_s1 + $0x88] sm:$0xff] (!%p138_p2)   ;;  %v849_v11 = vld [vmem:[%s1057_s1 + $0x90] sm:$0xff] (!%p138_p2)  }
   0x9   : > { %789 = vmatpush3.bf16.msra.mxu1 (!%p138_p2), %v841_v3  ;;  %v850_v12 = vld [vmem:[%s1057_s1 + $0x58] sm:$0xff] (!%p138_p2)   ;;  %v854_v16 = vld [vmem:[%s1057_s1 + $0x60] sm:$0xff] (!%p138_p2)   ;;  %v858_v20 = vld [vmem:[%s1057_s1 + $0x68] sm:$0xff] (!%p138_p2)  }
   0xa   : > { %790 = vmatprep.subr.bf16.mxu1 (!%p138_p2), %v844_v6  ;;  %v851_v13 = vld [vmem:[%s1057_s1 + $0x18] sm:$0xff] (!%p138_p2)   ;;  %v855_v17 = vld [vmem:[%s1057_s1 + $0x20] sm:$0xff] (!%p138_p2)   ;;  %v859_v21 = vld [vmem:[%s1057_s1 + $0x28] sm:$0xff] (!%p138_p2)  }
   0xb   : > { %769 = vmatpush3.bf16.msra.mxu0 (!%p138_p2), %v843_v5  ;;  %v852_v14 = vld [vmem:[%s1057_s1 + $0xd8] sm:$0xff] (!%p138_p2)   ;;  %v856_v18 = vld [vmem:[%s1057_s1 + $0xe0] sm:$0xff] (!%p138_p2)   ;;  %v860_v22 = vld [vmem:[%s1057_s1 + $0xe8] sm:$0xff] (!%p138_p2)  }
   0xc   : > { %770 = vmatprep.subr.bf16.mxu0 (!%p138_p2), %v846_v8  ;;  %v853_v15 = vld [vmem:[%s1057_s1 + $0x98] sm:$0xff] (!%p138_p2)   ;;  %v857_v19 = vld [vmem:[%s1057_s1 + $0xa0] sm:$0xff] (!%p138_p2)   ;;  %v861_v23 = vld [vmem:[%s1057_s1 + $0xa8] sm:$0xff] (!%p138_p2)  }
   0xd   : > { %791 = vmatpush3.bf16.msra.mxu1 %v845_v7  ;;  %s1061_s13 = smov (!%p161_p3, %s712_s13), 1  ;;  %v862_v24 = vld [vmem:[%s1057_s1 + $0x70] sm:$0xff]   ;;  %v866_v28 = vld [vmem:[%s1057_s1 + $0x78] sm:$0xff]   ;;  %v876_v37 = vld [vmem:[%s1057_s1 + $0x100] sm:$0xff]  }
   0xe   : > { %792 = vmatprep.subr.bf16.mxu1 %v848_v10  ;;  %s827_s14 = smul.u32 40, %s1061_s13  ;;  %v863_v25 = vld [vmem:[%s1057_s1 + $0x30] sm:$0xff]   ;;  %v867_v29 = vld [vmem:[%s1057_s1 + $0x38] sm:$0xff]   ;;  %v877_v38 = vld [vmem:[%s1057_s1 + $0x108] sm:$0xff]   ;;  %s765_s17 = sshll.u32 %s1061_s13, 4 }
   0xf   : > { %771 = vmatpush3.bf16.msra.mxu0 %v847_v9  ;;  %v864_v26 = vld [vmem:[%s1057_s1 + $0xf0] sm:$0xff]   ;;  %v868_v30 = vld [vmem:[%s1057_s1 + $0xf8] sm:$0xff]   ;;  %v720_v43 = vld [vmem:[%s1058_s2] ss:$0 sm:$0xff]  ;;  %s170_s20 = scalar_lea.vmem %s1059_s3, %s765_s17 }
  0x10   : > { %772 = vmatprep.subr.bf16.mxu0 %v850_v12  ;;  %v865_v27 = vld [vmem:[%s1057_s1 + $0xb0] sm:$0xff]   ;;  %s1018_s25 = scalar_lea.vmem %s1056_s0, %s827_s14  ;;  %v872_v34 = vld [vmem:[%s1057_s1 + $0xb8] sm:$0xff]  }
  0x11   : > { %793 = vmatpush3.bf16.msra.mxu1 %v849_v11  ;;  %v869_v31 = vld [vmem:[%s1018_s25] ss:$20 sps:$4 sm:$0xff]   ;;  %v871_v32 = vld [vmem:[%s1018_s25 + $0x4] ss:$20 sps:$4 sm:$0xff]   ;;  %v873_v35 = vld [vmem:[%s1018_s25 + $0x8] ss:$20 sps:$4 sm:$0xff]  }
  0x12   : > { %794 = vmatprep.subr.bf16.mxu1 %v852_v14  ;;  %534 = vmatprep.mubr.bf16.mxu0 %v871_v32  ;;  %v875_v36 = vld [vmem:[%s1018_s25 + $0xc] ss:$20 sps:$4 sm:$0xff]   ;;  %v878_v39 = vld [vmem:[%s1057_s1 + $0x110] sm:$0xff]   ;;  %v879_v40 = vld [vmem:[%s1057_s1 + $0x118] sm:$0xff]  }
  0x13   : > { %773 = vmatpush3.bf16.msra.mxu0 %v851_v13  ;;  %575 = vmatprep.mubr.bf16.mxu1 %v875_v36  ;;  %v880_v41 = vld [vmem:[%s1018_s25 + $0x10] ss:$20 sps:$4 sm:$0xff]  }
  0x14   : > { %774 = vmatprep.subr.bf16.mxu0 %v854_v16 }
  0x15   : > { %795 = vmatpush3.bf16.msra.mxu1 %v853_v15 }
  0x16   : > { %796 = vmatprep.subr.bf16.mxu1 %v856_v18 }
  0x17   : > { %775 = vmatpush3.bf16.msra.mxu0 %v855_v17 }
  0x18   : > { %776 = vmatprep.subr.bf16.mxu0 %v858_v20 }
  0x19   : > { %797 = vmatpush3.bf16.msra.mxu1 %v857_v19 }
  0x1a   : > { %798 = vmatprep.subr.bf16.mxu1 %v860_v22 }
  0x1b   : > { %777 = vmatpush3.bf16.msra.mxu0 %v859_v21 }
  0x1c   : > { %778 = vmatprep.subr.bf16.mxu0 %v862_v24 }
  0x1d   : > { %799 = vmatpush3.bf16.msra.mxu1 %v861_v23 }
  0x1e   : > { %800 = vmatprep.subr.bf16.mxu1 %v864_v26 }
  0x1f   : > { %779 = vmatpush3.bf16.msra.mxu0 %v863_v25 }
  0x20   : > { %780 = vmatprep.subr.bf16.mxu0 %v866_v28 }
  0x21   : > { %801 = vmatpush3.bf16.msra.mxu1 %v865_v27 }
  0x22   : > { %802 = vmatprep.subr.bf16.mxu1 %v868_v30 }
  0x23   : > { %781 = vmatpush3.bf16.msra.mxu0 %v867_v29 }
  0x24   : > { %815 = vmatprep.subr.bf16.mxu0 %v891_v33 }
  0x25   : > { %803 = vmatpush3.bf16.msra.mxu1 %v872_v34 }
  0x26   : > { %535 = vmatmul.mubr.bf16.vlgmr.msra.gmra.mrb[0].mxu0 %v869_v31 }
  0x27   : > { %823 = vmatprep.mubr.msk.bf16.mxu0 %vm892_vm0, %v891_v33  ;;  %816 = vmatpush3.bf16.msra.mxu0 %v876_v37 }
  0x28   : > { %576 = vmatmul.mubr.bf16.vlgmr.msra.gmra.mrb[0].mxu1 %v873_v35  ;;  %817 = vmatprep.subr.bf16.mxu0 %v891_v33 }
  0x2b   : > { %818 = vmatpush3.bf16.msra.mxu0 %v877_v38 }
  0x2c   : > { %819 = vmatprep.subr.bf16.mxu0 %v891_v33 }
  0x2f   : > { %820 = vmatpush3.bf16.msra.mxu0 %v878_v39 }
  0x30   : > { %821 = vmatprep.subr.bf16.mxu0 %v891_v33 }
  0x33   : > { %822 = vmatpush3.bf16.msra.mxu0 %v879_v40 }
  0x36   : > { %824 = vmatmul.mubr.msk.bf16.vlgmr.msra.gmra.mrb[4].mxu0 %vm498_vm1, %v880_v41 }
  0xf9   : > { %v782_v42 = vpop.f32.mrb[0].mxu0 }
  0xfa   : > { %v783_v44 = vpop.f32.mrb[1].mxu0 }
  0xfb   : > { %v784_v45 = vadd.f32 %v783_v44, %v782_v42  ;;  %v785_v46 = vpop.f32.mrb[2].mxu0  ;;  %v804_v47 = vpop.f32.mrb[0].mxu1 }
  0xfc   : > { %v786_v48 = vpop.f32.mrb[3].mxu0  ;;  %v805_v51 = vpop.f32.mrb[1].mxu1 }
  0xfd   : > { %v537_v49 = vadd.f32 %v784_v45, %v720_v43  ;;  %v787_v50 = vadd.f32 %v786_v48, %v785_v46  ;;  %v806_v52 = vadd.f32 %v805_v51, %v804_v47  ;;  %v807_v53 = vpop.f32.mrb[2].mxu1 }
  0xfe   : > { %v808_v55 = vpop.f32.mrb[3].mxu1 }
  0xff   : > { %v540_v54 = vadd.f32 %v787_v50, %v720_v43  ;;  %v809_v56 = vadd.f32 %v808_v55, %v807_v53  ;;  %v578_v57 = vadd.f32 %v806_v52, %v537_v49 }
 0x101   : > { %v581_v58 = vadd.f32 %v809_v56, %v540_v54 }
 0x109   : > { %v618_v59 = vpop.f32.mrb[4].mxu0 }
 0x10a   : > { %v619_v60 = vadd.f32 %v618_v59, %v578_v57  ;;  %v825_v61 = vpop.f32.mrb[5].mxu0 }
 0x10b   : > { %v621_v62 = vpop.f32.mrb[6].mxu0 }
 0x10c   : > { %v622_v63 = vadd.f32 %v621_v62, %v581_v58  ;;  %v826_v0 = vpop.f32.mrb[7].mxu0 }
 0x10e   : > { %v625_v1 = vadd.f32 %v622_v63, %v619_v60 }
 0x110   : > { %v626_v2 = vrot.slane %v625_v1, 4 }
 0x112   : > { %v627_v3 = vadd.f32 %v626_v2, %v625_v1 }
 0x114   : > { %v628_v4 = vrot.slane %v627_v3, 2 }
 0x116   : > { %v629_v5 = vadd.f32 %v628_v4, %v627_v3 }
 0x118   : > { %v630_v6 = vrot.slane %v629_v5, 1 }
 0x11a   : > { %v631_v7 = vadd.f32 %v630_v6, %v629_v5 }
 0x11c   : > { %v632_v8 = vmul.f32 0.0625, %v631_v7 }
 0x11e   : > { %v633_v9 = vsub.f32 %v619_v60, %v632_v8  ;;  %v634_v10 = vsub.f32 %v622_v63, %v632_v8 }
 0x120   : > { %v635_v11 = vmul.f32 %v633_v9, %v633_v9  ;;  %v636_v12 = vmul.f32 %v634_v10, %v634_v10 }
 0x122   : > { %v637_v13 = vadd.f32 %v636_v12, %v635_v11 }
 0x124   : > { %v638_v14 = vrot.slane %v637_v13, 4 }
 0x126   : > { %v639_v15 = vadd.f32 %v638_v14, %v637_v13 }
 0x128   : > { %v640_v16 = vrot.slane %v639_v15, 2 }
 0x12a   : > { %v641_v17 = vadd.f32 %v640_v16, %v639_v15 }
 0x12c   : > { %v642_v18 = vrot.slane %v641_v17, 1 }
 0x12e   : > { %v643_v19 = vadd.f32 %v642_v18, %v641_v17 }
 0x130   : > { %v644_v20 = vmul.f32 0.0625, %v643_v19 }
 0x132   : > { %v645_v21 = vadd.f32 1e-05, %v644_v20 }
 0x134   : > { %881 = vrsqrt.f32 %v645_v21 }
 0x13e   : > { %v882_v22 = vpop.eup %881 }
 0x13f   : > { %v647_v23 = vmul.f32 %v882_v22, %v633_v9  ;;  %v648_v24 = vmul.f32 %v882_v22, %v634_v10 }
 0x141   : > { %vm649_vm2 = vcmp.ge.f32.partialorder %v647_v23, 0.0  ;;  %vm650_vm3 = vcmp.ge.f32.partialorder %v648_v24, 0.0  ;;  %v651_v25 = vmul.f32 0.2, %v647_v23  ;;  %v652_v26 = vmul.f32 0.2, %v648_v24 }
 0x143   : > { %v653_v27 = vsel %vm649_vm2, %v647_v23, %v651_v25  ;;  %v654_v28 = vsel %vm650_vm3, %v648_v24, %v652_v26 }
 0x144   : > { %655 = vst [vmem:[%s170_s20] sm:$0xff] %v653_v27  ;;  %656 = vst [vmem:[%s170_s20 + $0x8] sm:$0xff] %v654_v28 }
 0x145 PF: > { %s13_s12 = sadd.s32 1, %s889_s12  }
 0x146   : > { %p10_p4 = scmp.ge.s32.totalorder %s13_s12, 4  }
 0x148   :  { %12 = sbr.rel (!%p10_p4) target bundleno = 1 (0x1), region = 62 }

// kernel: ce_discriminator.7
= control target key start
LH: loop header
LB: loop body
LE: loop exit
PB: predicated region body
PF: predicated region fallthrough
CT: control target
= control target key end

     0   :  { %s1853_s12 = smov 0   ;;  %s2337_s0 = inlined_call_operand.vmem [shape: bf16[2,4,1152], index: 0, kind: input, shape index: {}]   ;;  %s2338_s1 = inlined_call_operand.vmem [shape: bf16[1152,256], index: 1, kind: input, shape index: {}]   ;;  %s2339_s2 = inlined_call_operand.vmem [shape: f32[1,256], index: 2, kind: input, shape index: {}]   ;;  %s2340_s3 = inlined_call_operand.vmem [shape: f32[2,4,256], index: 3, kind: output, shape index: {}]  }
   0x1 LB: > { %s1418_s13 = sadd.s32 4294967295, %s1829_s12   ;;  %p1422_p0 = scmp.ge.s32.totalorder %s1829_s12, 1  ;;  %s1829_s12 = sphi %s1853_s12, %s13_s12  }
   0x2   : > { %p137_p1 = scmp.lt.s32.totalorder %s1829_s12, 3 }
   0x4   : > { %p138_p2 = pnand %p1422_p0, %p137_p1 }
   0x5   : > { %v1601_v0 = vld [vmem:[%s2338_s1 + $0x4] ss:$8 sps:$4 sm:$0xff] (!%p138_p2)   ;;  %v1605_v2 = vld [vmem:[%s2338_s1] ss:$8 sps:$4 sm:$0xff] (!%p138_p2)   ;;  %v1607_v4 = vld [vmem:[%s2338_s1 + $0x14] ss:$8 sps:$4 sm:$0xff] (!%p138_p2)   ;;  %v321_v36 = vlaneseq (!%p138_p2) }
   0x6   : > { %141 = sbr.rel (%p138_p2) target bundleno = 437 (0x1b5), region = 32  ;;  %v1603_v1 = vld [vmem:[%s2338_s1 + $0x204] ss:$8 sps:$4 sm:$0xff] (!%p138_p2)   ;;  %1104 = vmatprep.subr.bf16.mxu1 (!%p138_p2), %v1601_v0  ;;  %v1606_v3 = vld [vmem:[%s2338_s1 + $0x200] ss:$8 sps:$4 sm:$0xff] (!%p138_p2)   ;;  %p161_p3 = scmp.lt.s32.totalorder (!%p138_p2), %s1418_s13, 1 }
   0x7   : > { %1186 = vmatprep.subr.bf16.mxu0 (!%p138_p2), %v1603_v1  ;;  %1105 = vmatpush1.bf16.msra.mxu1 (!%p138_p2), %v1605_v2  ;;  %v1609_v5 = vld [vmem:[%s2338_s1 + $0x214] ss:$8 sps:$4 sm:$0xff] (!%p138_p2)   ;;  %v1611_v6 = vld [vmem:[%s2338_s1 + $0x10] ss:$8 sps:$4 sm:$0xff] (!%p138_p2)   ;;  %v1613_v8 = vld [vmem:[%s2338_s1 + $0x24] ss:$8 sps:$4 sm:$0xff] (!%p138_p2)  }
   0x8   : > { %1187 = vmatpush1.bf16.msra.mxu0 (!%p138_p2), %v1606_v3  ;;  %1106 = vmatprep.subr.bf16.mxu1 (!%p138_p2), %v1607_v4  ;;  %v1612_v7 = vld [vmem:[%s2338_s1 + $0x210] ss:$8 sps:$4 sm:$0xff] (!%p138_p2)   ;;  %v1615_v9 = vld [vmem:[%s2338_s1 + $0x224] ss:$8 sps:$4 sm:$0xff] (!%p138_p2)   ;;  %v1617_v10 = vld [vmem:[%s2338_s1 + $0x20] ss:$8 sps:$4 sm:$0xff] (!%p138_p2)  }
   0x9   : > { %1188 = vmatprep.subr.bf16.mxu0 (!%p138_p2), %v1609_v5  ;;  %v1618_v11 = vld [vmem:[%s2338_s1 + $0x220] ss:$8 sps:$4 sm:$0xff] (!%p138_p2)   ;;  %v1619_v12 = vld [vmem:[%s2338_s1 + $0x34] ss:$8 sps:$4 sm:$0xff] (!%p138_p2)   ;;  %v1623_v14 = vld [vmem:[%s2338_s1 + $0x30] ss:$8 sps:$4 sm:$0xff] (!%p138_p2)  }
   0xa   : > { %v1621_v13 = vld [vmem:[%s2338_s1 + $0x234] ss:$8 sps:$4 sm:$0xff] (!%p138_p2)   ;;  %v1624_v15 = vld [vmem:[%s2338_s1 + $0x230] ss:$8 sps:$4 sm:$0xff] (!%p138_p2)   ;;  %v1625_v16 = vld [vmem:[%s2338_s1 + $0x44] ss:$8 sps:$4 sm:$0xff] (!%p138_p2)  }
   0xb   : > { %1107 = vmatpush1.bf16.msra.mxu1 (!%p138_p2), %v1611_v6  ;;  %v1627_v17 = vld [vmem:[%s2338_s1 + $0x244] ss:$8 sps:$4 sm:$0xff] (!%p138_p2)   ;;  %v1629_v18 = vld [vmem:[%s2338_s1 + $0x40] ss:$8 sps:$4 sm:$0xff] (!%p138_p2)   ;;  %v1631_v20 = vld [vmem:[%s2338_s1 + $0x54] ss:$8 sps:$4 sm:$0xff] (!%p138_p2)  }
   0xc   : > { %1189 = vmatpush1.bf16.msra.mxu0 (!%p138_p2), %v1612_v7  ;;  %1108 = vmatprep.subr.bf16.mxu1 (!%p138_p2), %v1613_v8  ;;  %v1630_v19 = vld [vmem:[%s2338_s1 + $0x240] ss:$8 sps:$4 sm:$0xff] (!%p138_p2)   ;;  %v1633_v21 = vld [vmem:[%s2338_s1 + $0x254] ss:$8 sps:$4 sm:$0xff] (!%p138_p2)   ;;  %v1635_v22 = vld [vmem:[%s2338_s1 + $0x50] ss:$8 sps:$4 sm:$0xff] (!%p138_p2)  }
   0xd   : > { %1190 = vmatprep.subr.bf16.mxu0 %v1615_v9  ;;  %v1636_v23 = vld [vmem:[%s2338_s1 + $0x250] ss:$8 sps:$4 sm:$0xff]   ;;  %v1637_v24 = vld [vmem:[%s2338_s1 + $0x64] ss:$8 sps:$4 sm:$0xff]   ;;  %v1641_v26 = vld [vmem:[%s2338_s1 + $0x60] ss:$8 sps:$4 sm:$0xff]  }
   0xe   : > { %v1639_v25 = vld [vmem:[%s2338_s1 + $0x264] ss:$8 sps:$4 sm:$0xff]   ;;  %v1642_v27 = vld [vmem:[%s2338_s1 + $0x260] ss:$8 sps:$4 sm:$0xff]   ;;  %v1643_v28 = vld [vmem:[%s2338_s1 + $0x74] ss:$8 sps:$4 sm:$0xff]  }
   0xf   : > { %1109 = vmatpush1.bf16.msra.mxu1 %v1617_v10  ;;  %v1645_v29 = vld [vmem:[%s2338_s1 + $0x274] ss:$8 sps:$4 sm:$0xff]   ;;  %v1647_v30 = vld [vmem:[%s2338_s1 + $0x70] ss:$8 sps:$4 sm:$0xff]   ;;  %v1649_v32 = vld [vmem:[%s2338_s1 + $0x84] ss:$8 sps:$4 sm:$0xff]  }
  0x10   : > { %1191 = vmatpush1.bf16.msra.mxu0 %v1618_v11  ;;  %1110 = vmatprep.subr.bf16.mxu1 %v1619_v12  ;;  %v1648_v31 = vld [vmem:[%s2338_s1 + $0x270] ss:$8 sps:$4 sm:$0xff]   ;;  %v1651_v33 = vld [vmem:[%s2338_s1 + $0x284] ss:$8 sps:$4 sm:$0xff]   ;;  %v1653_v34 = vld [vmem:[%s2338_s1 + $0x80] ss:$8 sps:$4 sm:$0xff]  }
  0x11   : > { %1192 = vmatprep.subr.bf16.mxu0 %v1621_v13  ;;  %v1654_v35 = vld [vmem:[%s2338_s1 + $0x280] ss:$8 sps:$4 sm:$0xff]   ;;  %s2342_s13 = smov (!%p161_p3, %s1418_s13), 1  ;;  %v1831_v37 = vmov 1983009808   ;;  %v1985_v42 = vshrl.u32 %v321_v36, 7 }
  0x12   : > { %v336_v38 = vunpack.c.l.s4 %v1831_v37  ;;  %v1655_v39 = vld [vmem:[%s2338_s1 + $0x94] ss:$8 sps:$4 sm:$0xff]   ;;  %v1659_v41 = vld [vmem:[%s2338_s1 + $0x90] ss:$8 sps:$4 sm:$0xff]   ;;  %s1590_s17 = smul.u32 18, %s2342_s13  ;;  %vm1309_vm0 = vcmask 1043456  }
  0x13   : > { %1111 = vmatpush1.bf16.msra.mxu1 %v1623_v14  ;;  %v1657_v40 = vld [vmem:[%s2338_s1 + $0x294] ss:$8 sps:$4 sm:$0xff]   ;;  %v1660_v44 = vld [vmem:[%s2338_s1 + $0x290] ss:$8 sps:$4 sm:$0xff]   ;;  %v1661_v45 = vld [vmem:[%s2338_s1 + $0xa4] ss:$8 sps:$4 sm:$0xff]  }
  0x14   : > { %1193 = vmatpush1.bf16.msra.mxu0 %v1624_v15  ;;  %1112 = vmatprep.subr.bf16.mxu1 %v1625_v16  ;;  %v337_v43 = vunpack.c.0.s8 %v336_v38  ;;  %v1663_v46 = vld [vmem:[%s2338_s1 + $0x2a4] ss:$8 sps:$4 sm:$0xff]   ;;  %v1665_v47 = vld [vmem:[%s2338_s1 + $0xa0] ss:$8 sps:$4 sm:$0xff]   ;;  %s2005_s30 = scalar_lea.vmem %s2337_s0, %s1590_s17  ;;  %v1667_v50 = vld [vmem:[%s2338_s1 + $0xb4] ss:$8 sps:$4 sm:$0xff]  }
  0x15   : > { %1194 = vmatprep.subr.bf16.mxu0 %v1627_v17  ;;  %v1666_v48 = vld [vmem:[%s2338_s1 + $0x2a0] ss:$8 sps:$4 sm:$0xff]   ;;  %v1669_v51 = vld [vmem:[%s2338_s1 + $0x2b4] ss:$8 sps:$4 sm:$0xff]   ;;  %v1671_v53 = vld [vmem:[%s2338_s1 + $0xb0] ss:$8 sps:$4 sm:$0xff]  }
  0x16   : > { %v340_v49 = vsub.s32 %v337_v43, %v1985_v42  ;;  %v172_v52 = vld [vmem:[%s2005_s30] sm:$0xff]  ;;  %v1672_v55 = vld [vmem:[%s2338_s1 + $0x2b0] ss:$8 sps:$4 sm:$0xff]   ;;  %v173_v56 = vld [vmem:[%s2005_s30 + $0x8] sm:$0xff] }
  0x17   : > { %1113 = vmatpush1.bf16.msra.mxu1 %v1629_v18  ;;  %v1673_v57 = vld [vmem:[%s2338_s1 + $0xc4] ss:$8 sps:$4 sm:$0xff]   ;;  %v1677_v62 = vld [vmem:[%s2338_s1 + $0xc0] ss:$8 sps:$4 sm:$0xff]   ;;  %v1679_v0 = vld [vmem:[%s2338_s1 + $0xd4] ss:$8 sps:$4 sm:$0xff]   ;;  %v334_v10 = vcombine.high %v172_v52, %v172_v52  ;;  %v351_v11 = vcombine.high %v173_v56, %v173_v56 }
  0x18   : > { %1195 = vmatpush1.bf16.msra.mxu0 %v1630_v19  ;;  %1114 = vmatprep.subr.bf16.mxu1 %v1631_v20  ;;  %v341_v54 = vrot.slane %v172_v52, %v340_v49  ;;  %v1675_v58 = vld [vmem:[%s2338_s1 + $0x2c4] ss:$8 sps:$4 sm:$0xff]   ;;  %v358_v60 = vrot.slane %v173_v56, %v340_v49  ;;  %v1678_v63 = vld [vmem:[%s2338_s1 + $0x2c0] ss:$8 sps:$4 sm:$0xff]   ;;  %v1681_v1 = vld [vmem:[%s2338_s1 + $0x2d4] ss:$8 sps:$4 sm:$0xff]  }
  0x19   : > { %1196 = vmatprep.subr.bf16.mxu0 %v1633_v21  ;;  %v1683_v2 = vld [vmem:[%s2338_s1 + $0xd0] ss:$8 sps:$4 sm:$0xff]   ;;  %v1685_v4 = vld [vmem:[%s2338_s1 + $0xe4] ss:$8 sps:$4 sm:$0xff]   ;;  %v1689_v6 = vld [vmem:[%s2338_s1 + $0xe0] ss:$8 sps:$4 sm:$0xff]   ;;  %v2076_v16 = vrot.slane %v334_v10, %v340_v49  ;;  %v2078_v17 = vrot.slane %v351_v11, %v340_v49 }
  0x1a   : > { %v349_v59 = vcombine.high %v341_v54, %v341_v54  ;;  %v366_v61 = vcombine.high %v358_v60, %v358_v60  ;;  %v1684_v3 = vld [vmem:[%s2338_s1 + $0x2d0] ss:$8 sps:$4 sm:$0xff]   ;;  %v1687_v5 = vld [vmem:[%s2338_s1 + $0x2e4] ss:$8 sps:$4 sm:$0xff]   ;;  %v1690_v7 = vld [vmem:[%s2338_s1 + $0x2e0] ss:$8 sps:$4 sm:$0xff]  }
  0x1b   : > { %1115 = vmatpush1.bf16.msra.mxu1 %v1635_v22  ;;  %v1691_v8 = vld [vmem:[%s2338_s1 + $0xf4] ss:$8 sps:$4 sm:$0xff]   ;;  %v1695_v12 = vld [vmem:[%s2338_s1 + $0xf0] ss:$8 sps:$4 sm:$0xff]   ;;  %v1700_v14 = vld [vmem:[%s2338_s1 + $0x104] ss:$8 sps:$4 sm:$0xff]   ;;  %v350_v22 = vcombine.high %v2076_v16, %v2076_v16 }
  0x1c   : > { %1197 = vmatpush1.bf16.msra.mxu0 %v1636_v23  ;;  %1116 = vmatprep.subr.bf16.mxu1 %v1637_v24  ;;  %v1693_v9 = vld [vmem:[%s2338_s1 + $0x2f4] ss:$8 sps:$4 sm:$0xff]   ;;  %v1696_v13 = vld [vmem:[%s2338_s1 + $0x2f0] ss:$8 sps:$4 sm:$0xff]   ;;  %v1704_v15 = vld [vmem:[%s2338_s1 + $0x304] ss:$8 sps:$4 sm:$0xff]   ;;  %v367_v23 = vcombine.high %v2078_v17, %v2078_v17 }
  0x1d   : > { %1198 = vmatprep.subr.bf16.mxu0 %v1639_v25  ;;  %1136 = vmatprep.mubr.bf16.mxu1 %v349_v59  ;;  %v1698_v18 = vld [vmem:[%s2338_s1 + $0x100] ss:$8 sps:$4 sm:$0xff]   ;;  %v1707_v20 = vld [vmem:[%s2338_s1 + $0x114] ss:$8 sps:$4 sm:$0xff]   ;;  %v1705_v24 = vld [vmem:[%s2338_s1 + $0x110] ss:$8 sps:$4 sm:$0xff]  }
  0x1e   : > { %1218 = vmatprep.mubr.bf16.mxu0 %v366_v61  ;;  %v1702_v19 = vld [vmem:[%s2338_s1 + $0x300] ss:$8 sps:$4 sm:$0xff]   ;;  %v1710_v21 = vld [vmem:[%s2338_s1 + $0x314] ss:$8 sps:$4 sm:$0xff]   ;;  %v1708_v25 = vld [vmem:[%s2338_s1 + $0x310] ss:$8 sps:$4 sm:$0xff]  }
  0x1f   : > { %1117 = vmatpush1.bf16.msra.mxu1 %v1641_v26  ;;  %v1713_v26 = vld [vmem:[%s2338_s1 + $0x124] ss:$8 sps:$4 sm:$0xff]   ;;  %v1723_v36 = vld [vmem:[%s2338_s1 + $0x140] ss:$8 sps:$4 sm:$0xff]   ;;  %v1731_v38 = vld [vmem:[%s2338_s1 + $0x154] ss:$8 sps:$4 sm:$0xff]  }
  0x20   : > { %1199 = vmatpush1.bf16.msra.mxu0 %v1642_v27  ;;  %1118 = vmatprep.subr.bf16.mxu1 %v1643_v28  ;;  %v1716_v27 = vld [vmem:[%s2338_s1 + $0x324] ss:$8 sps:$4 sm:$0xff]   ;;  %v1711_v28 = vld [vmem:[%s2338_s1 + $0x120] ss:$8 sps:$4 sm:$0xff]   ;;  %v1741_v49 = vld [vmem:[%s2338_s1 + $0x170] ss:$8 sps:$4 sm:$0xff]  }
  0x21   : > { %1200 = vmatprep.subr.bf16.mxu0 %v1645_v29  ;;  %v1714_v29 = vld [vmem:[%s2338_s1 + $0x320] ss:$8 sps:$4 sm:$0xff]   ;;  %v1737_v43 = vld [vmem:[%s2338_s1 + $0x164] ss:$8 sps:$4 sm:$0xff]   ;;  %v1758_v56 = vld [vmem:[%s2338_s1 + $0x394] ss:$8 sps:$4 sm:$0xff]  }
  0x22   : > { %v1726_v37 = vld [vmem:[%s2338_s1 + $0x340] ss:$8 sps:$4 sm:$0xff]   ;;  %v1752_v52 = vld [vmem:[%s2338_s1 + $0x384] ss:$8 sps:$4 sm:$0xff]   ;;  %v1780_v10 = vld [vmem:[%s2338_s1 + $0x3d0] ss:$8 sps:$4 sm:$0xff]  }
  0x23   : > { %1119 = vmatpush1.bf16.msra.mxu1 %v1647_v30  ;;  %v1719_v30 = vld [vmem:[%s2338_s1 + $0x134] ss:$8 sps:$4 sm:$0xff]   ;;  %v1761_v59 = vld [vmem:[%s2338_s1 + $0x1a4] ss:$8 sps:$4 sm:$0xff]   ;;  %v1759_v61 = vld [vmem:[%s2338_s1 + $0x1a0] ss:$8 sps:$4 sm:$0xff]  }
  0x24   : > { %1201 = vmatpush1.bf16.msra.mxu0 %v1648_v31  ;;  %1120 = vmatprep.subr.bf16.mxu1 %v1649_v32  ;;  %v1722_v31 = vld [vmem:[%s2338_s1 + $0x334] ss:$8 sps:$4 sm:$0xff]   ;;  %v1717_v32 = vld [vmem:[%s2338_s1 + $0x130] ss:$8 sps:$4 sm:$0xff]   ;;  %v1785_v11 = vld [vmem:[%s2338_s1 + $0x1e4] ss:$8 sps:$4 sm:$0xff]  }
  0x25   : > { %1202 = vmatprep.subr.bf16.mxu0 %v1651_v33  ;;  %v1720_v33 = vld [vmem:[%s2338_s1 + $0x330] ss:$8 sps:$4 sm:$0xff]  }
  0x27   : > { %1121 = vmatpush1.bf16.msra.mxu1 %v1653_v34  ;;  %v1725_v34 = vld [vmem:[%s2338_s1 + $0x144] ss:$8 sps:$4 sm:$0xff]  }
  0x28   : > { %1203 = vmatpush1.bf16.msra.mxu0 %v1654_v35  ;;  %1122 = vmatprep.subr.bf16.mxu1 %v1655_v39  ;;  %v1728_v35 = vld [vmem:[%s2338_s1 + $0x344] ss:$8 sps:$4 sm:$0xff]   ;;  %v1734_v39 = vld [vmem:[%s2338_s1 + $0x354] ss:$8 sps:$4 sm:$0xff]  }
  0x29   : > { %1204 = vmatprep.subr.bf16.mxu0 %v1657_v40  ;;  %v1729_v40 = vld [vmem:[%s2338_s1 + $0x150] ss:$8 sps:$4 sm:$0xff]  }
  0x2b   : > { %1123 = vmatpush1.bf16.msra.mxu1 %v1659_v41  ;;  %v1732_v41 = vld [vmem:[%s2338_s1 + $0x350] ss:$8 sps:$4 sm:$0xff]  }
  0x2c   : > { %1205 = vmatpush1.bf16.msra.mxu0 %v1660_v44  ;;  %1124 = vmatprep.subr.bf16.mxu1 %v1661_v45  ;;  %v1740_v44 = vld [vmem:[%s2338_s1 + $0x364] ss:$8 sps:$4 sm:$0xff]   ;;  %v1735_v45 = vld [vmem:[%s2338_s1 + $0x160] ss:$8 sps:$4 sm:$0xff]  }
  0x2d   : > { %1206 = vmatprep.subr.bf16.mxu0 %v1663_v46  ;;  %v1738_v46 = vld [vmem:[%s2338_s1 + $0x360] ss:$8 sps:$4 sm:$0xff]  }
  0x2f   : > { %1125 = vmatpush1.bf16.msra.mxu1 %v1665_v47  ;;  %v1743_v47 = vld [vmem:[%s2338_s1 + $0x174] ss:$8 sps:$4 sm:$0xff]  }
  0x30   : > { %1207 = vmatpush1.bf16.msra.mxu0 %v1666_v48  ;;  %1126 = vmatprep.subr.bf16.mxu1 %v1667_v50  ;;  %v1746_v48 = vld [vmem:[%s2338_s1 + $0x374] ss:$8 sps:$4 sm:$0xff]   ;;  %v1744_v50 = vld [vmem:[%s2338_s1 + $0x370] ss:$8 sps:$4 sm:$0xff]  }
  0x31   : > { %1208 = vmatprep.subr.bf16.mxu0 %v1669_v51  ;;  %v1749_v51 = vld [vmem:[%s2338_s1 + $0x184] ss:$8 sps:$4 sm:$0xff]  }
  0x33   : > { %1127 = vmatpush1.bf16.msra.mxu1 %v1671_v53  ;;  %v1747_v53 = vld [vmem:[%s2338_s1 + $0x180] ss:$8 sps:$4 sm:$0xff]  }
  0x34   : > { %1209 = vmatpush1.bf16.msra.mxu0 %v1672_v55  ;;  %1128 = vmatprep.subr.bf16.mxu1 %v1673_v57  ;;  %v1755_v55 = vld [vmem:[%s2338_s1 + $0x194] ss:$8 sps:$4 sm:$0xff]   ;;  %v1753_v57 = vld [vmem:[%s2338_s1 + $0x190] ss:$8 sps:$4 sm:$0xff]  }
  0x35   : > { %1210 = vmatprep.subr.bf16.mxu0 %v1675_v58  ;;  %v1756_v58 = vld [vmem:[%s2338_s1 + $0x390] ss:$8 sps:$4 sm:$0xff]  }
  0x37   : > { %1129 = vmatpush1.bf16.msra.mxu1 %v1677_v62  ;;  %v1762_v62 = vld [vmem:[%s2338_s1 + $0x3a0] ss:$8 sps:$4 sm:$0xff]  }
  0x38   : > { %1211 = vmatpush1.bf16.msra.mxu0 %v1678_v63  ;;  %1130 = vmatprep.subr.bf16.mxu1 %v1679_v0  ;;  %v1767_v63 = vld [vmem:[%s2338_s1 + $0x1b4] ss:$8 sps:$4 sm:$0xff]  }
  0x39   : > { %1212 = vmatprep.subr.bf16.mxu0 %v1681_v1  ;;  %v1770_v0 = vld [vmem:[%s2338_s1 + $0x3b4] ss:$8 sps:$4 sm:$0xff]   ;;  %v1765_v1 = vld [vmem:[%s2338_s1 + $0x1b0] ss:$8 sps:$4 sm:$0xff]  }
  0x3b   : > { %1131 = vmatpush1.bf16.msra.mxu1 %v1683_v2  ;;  %v1768_v2 = vld [vmem:[%s2338_s1 + $0x3b0] ss:$8 sps:$4 sm:$0xff]  }
  0x3c   : > { %1213 = vmatpush1.bf16.msra.mxu0 %v1684_v3  ;;  %1132 = vmatprep.subr.bf16.mxu1 %v1685_v4  ;;  %v1773_v3 = vld [vmem:[%s2338_s1 + $0x1c4] ss:$8 sps:$4 sm:$0xff]  }
  0x3d   : > { %1214 = vmatprep.subr.bf16.mxu0 %v1687_v5  ;;  %v1776_v4 = vld [vmem:[%s2338_s1 + $0x3c4] ss:$8 sps:$4 sm:$0xff]   ;;  %v1771_v5 = vld [vmem:[%s2338_s1 + $0x1c0] ss:$8 sps:$4 sm:$0xff]  }
  0x3f   : > { %1133 = vmatpush1.bf16.msra.mxu1 %v1689_v6  ;;  %v1774_v6 = vld [vmem:[%s2338_s1 + $0x3c0] ss:$8 sps:$4 sm:$0xff]  }
  0x40   : > { %1215 = vmatpush1.bf16.msra.mxu0 %v1690_v7  ;;  %1134 = vmatprep.subr.bf16.mxu1 %v1691_v8  ;;  %v1779_v7 = vld [vmem:[%s2338_s1 + $0x1d4] ss:$8 sps:$4 sm:$0xff]  }
  0x41   : > { %1216 = vmatprep.subr.bf16.mxu0 %v1693_v9  ;;  %v1782_v8 = vld [vmem:[%s2338_s1 + $0x3d4] ss:$8 sps:$4 sm:$0xff]   ;;  %v1777_v9 = vld [vmem:[%s2338_s1 + $0x1d0] ss:$8 sps:$4 sm:$0xff]  }
  0x43   : > { %1135 = vmatpush1.bf16.msra.mxu1 %v1695_v12  ;;  %v1788_v12 = vld [vmem:[%s2338_s1 + $0x3e4] ss:$8 sps:$4 sm:$0xff]  }
  0x44   : > { %1217 = vmatpush1.bf16.msra.mxu0 %v1696_v13  ;;  %1145 = vmatprep.subr.bf16.mxu1 %v1700_v14  ;;  %v1783_v13 = vld [vmem:[%s2338_s1 + $0x1e0] ss:$8 sps:$4 sm:$0xff]  }
  0x45   : > { %1227 = vmatprep.subr.bf16.mxu0 %v1704_v15  ;;  %v1786_v14 = vld [vmem:[%s2338_s1 + $0x3e0] ss:$8 sps:$4 sm:$0xff]   ;;  %v1791_v15 = vld [vmem:[%s2338_s1 + $0x1f4] ss:$8 sps:$4 sm:$0xff]  }
  0x46   : > { %1137 = vmatmul.mubr.bf16.vlgmr.msra.gmra.mrb[0].mxu1 %v341_v54  ;;  %v1750_v54 = vld [vmem:[%s2338_s1 + $0x380] ss:$8 sps:$4 sm:$0xff]  }
  0x47   : > { %1219 = vmatmul.mubr.bf16.vlgmr.msra.gmra.mrb[0].mxu0 %v358_v60  ;;  %1146 = vmatpush1.bf16.msra.mxu1 %v1698_v18  ;;  %v1764_v60 = vld [vmem:[%s2338_s1 + $0x3a4] ss:$8 sps:$4 sm:$0xff]   ;;  %v1794_v18 = vld [vmem:[%s2338_s1 + $0x3f4] ss:$8 sps:$4 sm:$0xff]  }
  0x48   : > { %1228 = vmatpush1.bf16.msra.mxu0 %v1702_v19  ;;  %1147 = vmatprep.subr.bf16.mxu1 %v1707_v20  ;;  %v1789_v19 = vld [vmem:[%s2338_s1 + $0x1f0] ss:$8 sps:$4 sm:$0xff]  }
  0x49   : > { %1229 = vmatprep.subr.bf16.mxu0 %v1710_v21  ;;  %1177 = vmatprep.mubr.bf16.mxu1 %v350_v22  ;;  %v1792_v20 = vld [vmem:[%s2338_s1 + $0x3f0] ss:$8 sps:$4 sm:$0xff]   ;;  %v1797_v21 = vld [vmem:[%s2338_s1 + $0x404] ss:$8 sps:$4 sm:$0xff]   ;;  %v1795_v22 = vld [vmem:[%s2338_s1 + $0x400] ss:$8 sps:$4 sm:$0xff]  }
  0x4a   : > { %1259 = vmatprep.mubr.bf16.mxu0 %v367_v23  ;;  %v1800_v23 = vld [vmem:[%s2338_s1 + $0x414] ss:$8 sps:$4 sm:$0xff]  }
  0x4b   : > { %1148 = vmatpush1.bf16.msra.mxu1 %v1705_v24  ;;  %v1798_v24 = vld [vmem:[%s2338_s1 + $0x410] ss:$8 sps:$4 sm:$0xff]  }
  0x4c   : > { %1230 = vmatpush1.bf16.msra.mxu0 %v1708_v25  ;;  %1149 = vmatprep.subr.bf16.mxu1 %v1713_v26  ;;  %v1832_v25 = vmov 0   ;;  %v1803_v26 = vld [vmem:[%s2338_s1 + $0x424] ss:$8 sps:$4 sm:$0xff]  }
  0x4d   : > { %1231 = vmatprep.subr.bf16.mxu0 %v1716_v27  ;;  %v1801_v27 = vld [vmem:[%s2338_s1 + $0x420] ss:$8 sps:$4 sm:$0xff]  }
  0x4f   : > { %1150 = vmatpush1.bf16.msra.mxu1 %v1711_v28  ;;  %v1809_v28 = vld [vmem:[%s2338_s1 + $0x444] ss:$8 sps:$4 sm:$0xff]  }
  0x50   : > { %1232 = vmatpush1.bf16.msra.mxu0 %v1714_v29  ;;  %1151 = vmatprep.subr.bf16.mxu1 %v1719_v30  ;;  %v1807_v29 = vld [vmem:[%s2338_s1 + $0x440] ss:$8 sps:$4 sm:$0xff]   ;;  %v1812_v30 = vld [vmem:[%s2338_s1 + $0x454] ss:$8 sps:$4 sm:$0xff]  }
  0x51   : > { %1233 = vmatprep.subr.bf16.mxu0 %v1722_v31  ;;  %v1810_v31 = vld [vmem:[%s2338_s1 + $0x450] ss:$8 sps:$4 sm:$0xff]  }
  0x53   : > { %1152 = vmatpush1.bf16.msra.mxu1 %v1717_v32  ;;  %v1815_v32 = vld [vmem:[%s2338_s1 + $0x464] ss:$8 sps:$4 sm:$0xff]  }
  0x54   : > { %1234 = vmatpush1.bf16.msra.mxu0 %v1720_v33  ;;  %1153 = vmatprep.subr.bf16.mxu1 %v1725_v34  ;;  %v1813_v33 = vld [vmem:[%s2338_s1 + $0x460] ss:$8 sps:$4 sm:$0xff]   ;;  %v1818_v34 = vld [vmem:[%s2338_s1 + $0x474] ss:$8 sps:$4 sm:$0xff]  }
  0x55   : > { %1235 = vmatprep.subr.bf16.mxu0 %v1728_v35  ;;  %v1816_v35 = vld [vmem:[%s2338_s1 + $0x470] ss:$8 sps:$4 sm:$0xff]  }
  0x57   : > { %1154 = vmatpush1.bf16.msra.mxu1 %v1723_v36  ;;  %v1426_v36 = vld.sshfl [vmem:[%s2005_s30 + $0x10] sm:$0x3 pattern:$0x76325410]  ;;  %s1573_s30 = sshll.u32 %s2342_s13, 3 }
  0x58   : > { %1236 = vmatpush1.bf16.msra.mxu0 %v1726_v37  ;;  %1155 = vmatprep.subr.bf16.mxu1 %v1731_v38  ;;  %s170_s18 = scalar_lea.vmem %s2340_s3, %s1573_s30 }
  0x59   : > { %1237 = vmatprep.subr.bf16.mxu0 %v1734_v39 }
  0x5b   : > { %1156 = vmatpush1.bf16.msra.mxu1 %v1729_v40 }
  0x5c   : > { %1238 = vmatpush1.bf16.msra.mxu0 %v1732_v41  ;;  %1157 = vmatprep.subr.bf16.mxu1 %v1737_v43  ;;  %v323_v41 = vsub.s32 0, %v1985_v42  ;;  %v319_v43 = vld [vmem:[%s2339_s2] sm:$0x3] }
  0x5d   : > { %1239 = vmatprep.subr.bf16.mxu0 %v1740_v44  ;;  %v327_v44 = vsub.s32 1, %v1985_v42 }
  0x5f   : > { %1158 = vmatpush1.bf16.msra.mxu1 %v1735_v45  ;;  %v324_v45 = vrot.slane %v319_v43, %v323_v41 }
  0x60   : > { %1240 = vmatpush1.bf16.msra.mxu0 %v1738_v46  ;;  %1159 = vmatprep.subr.bf16.mxu1 %v1743_v47  ;;  %v328_v46 = vrot.slane %v319_v43, %v327_v44 }
  0x61   : > { %1241 = vmatprep.subr.bf16.mxu0 %v1746_v48 }
  0x63   : > { %1160 = vmatpush1.bf16.msra.mxu1 %v1741_v49 }
  0x64   : > { %1242 = vmatpush1.bf16.msra.mxu0 %v1744_v50  ;;  %1161 = vmatprep.subr.bf16.mxu1 %v1749_v51 }
  0x65   : > { %1243 = vmatprep.subr.bf16.mxu0 %v1752_v52 }
  0x67   : > { %1162 = vmatpush1.bf16.msra.mxu1 %v1747_v53 }
  0x68   : > { %1244 = vmatpush1.bf16.msra.mxu0 %v1750_v54  ;;  %1163 = vmatprep.subr.bf16.mxu1 %v1755_v55 }
  0x69   : > { %1245 = vmatprep.subr.bf16.mxu0 %v1758_v56 }
  0x6b   : > { %1164 = vmatpush1.bf16.msra.mxu1 %v1753_v57 }
  0x6c   : > { %1246 = vmatpush1.bf16.msra.mxu0 %v1756_v58  ;;  %1165 = vmatprep.subr.bf16.mxu1 %v1761_v59 }
  0x6d   : > { %1247 = vmatprep.subr.bf16.mxu0 %v1764_v60 }
  0x6f   : > { %1166 = vmatpush1.bf16.msra.mxu1 %v1759_v61 }
  0x70   : > { %1248 = vmatpush1.bf16.msra.mxu0 %v1762_v62  ;;  %1167 = vmatprep.subr.bf16.mxu1 %v1767_v63 }
  0x71   : > { %1249 = vmatprep.subr.bf16.mxu0 %v1770_v0 }
  0x73   : > { %1168 = vmatpush1.bf16.msra.mxu1 %v1765_v1 }
  0x74   : > { %1250 = vmatpush1.bf16.msra.mxu0 %v1768_v2  ;;  %1169 = vmatprep.subr.bf16.mxu1 %v1773_v3 }
  0x75   : > { %1251 = vmatprep.subr.bf16.mxu0 %v1776_v4 }
  0x77   : > { %1170 = vmatpush1.bf16.msra.mxu1 %v1771_v5 }
  0x78   : > { %1252 = vmatpush1.bf16.msra.mxu0 %v1774_v6  ;;  %1171 = vmatprep.subr.bf16.mxu1 %v1779_v7 }
  0x79   : > { %1253 = vmatprep.subr.bf16.mxu0 %v1782_v8 }
  0x7b   : > { %1172 = vmatpush1.bf16.msra.mxu1 %v1777_v9 }
  0x7c   : > { %1254 = vmatpush1.bf16.msra.mxu0 %v1780_v10  ;;  %1173 = vmatprep.subr.bf16.mxu1 %v1785_v11 }
  0x7d   : > { %1255 = vmatprep.subr.bf16.mxu0 %v1788_v12 }
  0x7f   : > { %1174 = vmatpush1.bf16.msra.mxu1 %v1783_v13 }
  0x80   : > { %1256 = vmatpush1.bf16.msra.mxu0 %v1786_v14  ;;  %1175 = vmatprep.subr.bf16.mxu1 %v1791_v15 }
  0x81   : > { %1257 = vmatprep.subr.bf16.mxu0 %v1794_v18 }
  0x83   : > { %1176 = vmatpush1.bf16.msra.mxu1 %v1789_v19 }
  0x84   : > { %1258 = vmatpush1.bf16.msra.mxu0 %v1792_v20 }
  0x85   : > { %1268 = vmatprep.subr.bf16.mxu0 %v1797_v21 }
  0x86   : > { %1178 = vmatmul.mubr.bf16.vlgmr.msra.gmra.mrb[0].mxu1 %v2076_v16  ;;  %v1806_v16 = vld [vmem:[%s2338_s1 + $0x434] ss:$8 sps:$4 sm:$0xff]  }
  0x87   : > { %1260 = vmatmul.mubr.bf16.vlgmr.msra.gmra.mrb[0].mxu0 %v2078_v17  ;;  %v1804_v17 = vld [vmem:[%s2338_s1 + $0x430] ss:$8 sps:$4 sm:$0xff]  }
  0x88   : > { %1269 = vmatpush1.bf16.msra.mxu0 %v1795_v22  ;;  %1300 = vmatprep.mubr.bf16.mxu0 %v1832_v25 }
  0x89   : > { %1270 = vmatprep.subr.bf16.mxu0 %v1800_v23 }
  0x8c   : > { %1271 = vmatpush1.bf16.msra.mxu0 %v1798_v24 }
  0x8d   : > { %1272 = vmatprep.subr.bf16.mxu0 %v1803_v26 }
  0x90   : > { %1273 = vmatpush1.bf16.msra.mxu0 %v1801_v27 }
  0x91   : > { %1274 = vmatprep.subr.bf16.mxu0 %v1806_v16 }
  0x94   : > { %1275 = vmatpush1.bf16.msra.mxu0 %v1804_v17 }
  0x95   : > { %1276 = vmatprep.subr.bf16.mxu0 %v1809_v28 }
  0x98   : > { %1277 = vmatpush1.bf16.msra.mxu0 %v1807_v29 }
  0x99   : > { %1278 = vmatprep.subr.bf16.mxu0 %v1812_v30 }
  0x9c   : > { %1279 = vmatpush1.bf16.msra.mxu0 %v1810_v31 }
  0x9d   : > { %1280 = vmatprep.subr.bf16.mxu0 %v1815_v32 }
  0xa0   : > { %1281 = vmatpush1.bf16.msra.mxu0 %v1813_v33 }
  0xa1   : > { %1282 = vmatprep.subr.bf16.mxu0 %v1818_v34 }
  0xa4   : > { %1283 = vmatpush1.bf16.msra.mxu0 %v1816_v35 }
  0xa7   : > { %1301 = vmatmul.mubr.bf16.vlgmr.msra.gmra.mrb[0].mxu0 %v1426_v36 }
 0x159   : > { %v1179_v37 = vpop.f32.mrb[0].mxu1 }
 0x15a   : > { %v1181_v38 = vpop.f32.mrb[1].mxu1  ;;  %v1574_v47 = vadd.f32 %v1179_v37, %v324_v45 }
 0x15b   : > { %v1183_v39 = vpop.f32.mrb[2].mxu1  ;;  %v1576_v48 = vadd.f32 %v1181_v38, %v328_v46 }
 0x15c   : > { %v1184_v40 = vpop.f32.mrb[3].mxu1 }
 0x17a   : > { %v1302_v49 = vpop.f32.mrb[0].mxu0 }
 0x17b   : > { %v1575_v50 = vadd.f32 %v1574_v47, %v1302_v49  ;;  %v1304_v51 = vpop.f32.mrb[1].mxu0 }
 0x17c   : > { %v1577_v52 = vadd.f32 %v1576_v48, %v1304_v51  ;;  %v1306_v53 = vpop.f32.mrb[2].mxu0 }
 0x17d   : > { %v1310_v54 = vsel %vm1309_vm0, %v1575_v50, 0.0  ;;  %v1307_v55 = vpop.f32.mrb[3].mxu0 }
 0x17e   : > { %v1311_v56 = vrot.slane %v1310_v54, 4  ;;  %v1317_v57 = vsel %vm1309_vm0, %v1577_v52, 0.0 }
 0x17f   : > { %v1318_v58 = vrot.slane %v1317_v57, 4 }
 0x180   : > { %v1312_v59 = vadd.f32 %v1311_v56, %v1310_v54 }
 0x181   : > { %v1319_v60 = vadd.f32 %v1318_v58, %v1317_v57 }
 0x182   : > { %v1313_v42 = vrot.slane %v1312_v59, 2 }
 0x183   : > { %v1320_v61 = vrot.slane %v1319_v60, 2 }
 0x184   : > { %v1314_v62 = vadd.f32 %v1313_v42, %v1312_v59 }
 0x185   : > { %v1321_v63 = vadd.f32 %v1320_v61, %v1319_v60 }
 0x186   : > { %v1315_v0 = vrot.slane %v1314_v62, 1 }
 0x187   : > { %v1322_v1 = vrot.slane %v1321_v63, 1 }
 0x188   : > { %v1316_v2 = vadd.f32 %v1315_v0, %v1314_v62 }
 0x189   : > { %v1323_v3 = vadd.f32 %v1322_v1, %v1321_v63 }
 0x18a   : > { %v1324_v4 = vmul.f32 0.25, %v1316_v2 }
 0x18b   : > { %v1325_v5 = vmul.f32 0.25, %v1323_v3 }
 0x18c   : > { %v1326_v6 = vsub.f32 %v1575_v50, %v1324_v4 }
 0x18d   : > { %v1327_v7 = vsub.f32 %v1577_v52, %v1325_v5 }
 0x18e   : > { %v1328_v8 = vmul.f32 %v1326_v6, %v1326_v6 }
 0x18f   : > { %v1329_v9 = vmul.f32 %v1327_v7, %v1327_v7 }
 0x190   : > { %v1330_v10 = vsel %vm1309_vm0, %v1328_v8, 0.0 }
 0x191   : > { %v1331_v11 = vrot.slane %v1330_v10, 4  ;;  %v1337_v12 = vsel %vm1309_vm0, %v1329_v9, 0.0 }
 0x192   : > { %v1338_v13 = vrot.slane %v1337_v12, 4 }
 0x193   : > { %v1332_v14 = vadd.f32 %v1331_v11, %v1330_v10 }
 0x194   : > { %v1339_v15 = vadd.f32 %v1338_v13, %v1337_v12 }
 0x195   : > { %v1333_v18 = vrot.slane %v1332_v14, 2 }
 0x196   : > { %v1340_v19 = vrot.slane %v1339_v15, 2 }
 0x197   : > { %v1334_v20 = vadd.f32 %v1333_v18, %v1332_v14 }
 0x198   : > { %v1341_v21 = vadd.f32 %v1340_v19, %v1339_v15 }
 0x199   : > { %v1335_v22 = vrot.slane %v1334_v20, 1 }
 0x19a   : > { %v1342_v23 = vrot.slane %v1341_v21, 1 }
 0x19b   : > { %v1336_v24 = vadd.f32 %v1335_v22, %v1334_v20 }
 0x19c   : > { %v1343_v25 = vadd.f32 %v1342_v23, %v1341_v21 }
 0x19d   : > { %v1344_v26 = vmul.f32 0.25, %v1336_v24 }
 0x19e   : > { %v1345_v27 = vmul.f32 0.25, %v1343_v25 }
 0x19f   : > { %v1346_v16 = vadd.f32 1e-05, %v1344_v26 }
 0x1a0   : > { %v1347_v17 = vadd.f32 1e-05, %v1345_v27 }
 0x1a1   : > { %1819 = vrsqrt.f32 %v1346_v16 }
 0x1a2   : > { %1821 = vrsqrt.f32 %v1347_v17 }
 0x1ab   : > { %v1820_v28 = vpop.eup %1819 }
 0x1ac   : > { %v1822_v29 = vpop.eup %1821  ;;  %v1350_v30 = vmul.f32 %v1820_v28, %v1326_v6 }
 0x1ad   : > { %v1351_v31 = vmul.f32 %v1822_v29, %v1327_v7 }
 0x1ae   : > { %vm1352_vm1 = vcmp.ge.f32.partialorder %v1350_v30, 0.0  ;;  %v1354_v32 = vmul.f32 0.2, %v1350_v30 }
 0x1af   : > { %vm1353_vm2 = vcmp.ge.f32.partialorder %v1351_v31, 0.0  ;;  %v1355_v33 = vmul.f32 0.2, %v1351_v31 }
 0x1b0   : > { %v1356_v34 = vsel %vm1352_vm1, %v1350_v30, %v1354_v32 }
 0x1b1   : > { %v1357_v35 = vsel %vm1353_vm2, %v1351_v31, %v1355_v33 }
 0x1b2   : > { %v1360_v36 = vcombine.low %v1356_v34, %v1357_v35 }
 0x1b4   : > { %1362 = vst [vmem:[%s170_s18] sm:$0xff] %v1360_v36 }
 0x1b5 PF: > { %s13_s12 = sadd.s32 1, %s1829_s12  }
 0x1b6   : > { %p10_p4 = scmp.ge.s32.totalorder %s13_s12, 4  }
 0x1b8   :  { %12 = sbr.rel (!%p10_p4) target bundleno = 1 (0x1), region = 62 }

// kernel: ce_discriminator.8
= control target key start
LH: loop header
LB: loop body
LE: loop exit
PB: predicated region body
PF: predicated region fallthrough
CT: control target
= control target key end

     0   :  { %s6224_s12 = smov 0   ;;  %s8075_s0 = inlined_call_operand.vmem [shape: bf16[2,4,2304], index: 0, kind: input, shape index: {}]   ;;  %s8076_s1 = inlined_call_operand.vmem [shape: bf16[2304,512], index: 1, kind: input, shape index: {}]   ;;  %s8077_s2 = inlined_call_operand.vmem [shape: f32[1,512], index: 2, kind: input, shape index: {}]   ;;  %s8078_s3 = inlined_call_operand.vmem [shape: f32[2,4,512], index: 3, kind: output, shape index: {}]  }
   0x1 LB: > { %s4653_s13 = sadd.s32 4294967295, %s6201_s12   ;;  %p4657_p0 = scmp.ge.s32.totalorder %s6201_s12, 1  ;;  %s6201_s12 = sphi %s6224_s12, %s13_s12  }
   0x2   : > { %p137_p1 = scmp.lt.s32.totalorder %s6201_s12, 3 }
   0x4   : > { %p138_p2 = pnand %p4657_p0, %p137_p1 }
   0x5   : > { %v5319_v0 = vld [vmem:[%s8076_s1 + $0x4] ss:$16 sps:$4 sm:$0xff] (!%p138_p2)   ;;  %v5321_v1 = vld [vmem:[%s8076_s1 + $0xc] ss:$16 sps:$4 sm:$0xff] (!%p138_p2)   ;;  %v5323_v2 = vld [vmem:[%s8076_s1] ss:$16 sps:$4 sm:$0xff] (!%p138_p2)   ;;  %v754_v36 = vlaneseq (!%p138_p2) }
   0x6   : > { %141 = sbr.rel (%p138_p2) target bundleno = 854 (0x356), region = 32  ;;  %3753 = vmatprep.subr.bf16.mxu0 (!%p138_p2), %v5319_v0  ;;  %v5324_v3 = vld [vmem:[%s8076_s1 + $0x8] ss:$16 sps:$4 sm:$0xff] (!%p138_p2)   ;;  %4122 = vmatprep.subr.bf16.mxu1 (!%p138_p2), %v5321_v1  ;;  %v5325_v4 = vld [vmem:[%s8076_s1 + $0x24] ss:$16 sps:$4 sm:$0xff] (!%p138_p2)   ;;  %p161_p3 = scmp.lt.s32.totalorder (!%p138_p2), %s4653_s13, 1 }
   0x7   : > { %3754 = vmatpush1.bf16.msra.mxu0 (!%p138_p2), %v5323_v2  ;;  %4123 = vmatpush1.bf16.msra.mxu1 (!%p138_p2), %v5324_v3  ;;  %v5327_v5 = vld [vmem:[%s8076_s1 + $0x2c] ss:$16 sps:$4 sm:$0xff] (!%p138_p2)   ;;  %v5329_v6 = vld [vmem:[%s8076_s1 + $0x20] ss:$16 sps:$4 sm:$0xff] (!%p138_p2)   ;;  %v5330_v7 = vld [vmem:[%s8076_s1 + $0x28] ss:$16 sps:$4 sm:$0xff] (!%p138_p2)  }
   0x8   : > { %3755 = vmatprep.subr.bf16.mxu0 (!%p138_p2), %v5325_v4  ;;  %4124 = vmatprep.subr.bf16.mxu1 (!%p138_p2), %v5327_v5  ;;  %v5331_v8 = vld [vmem:[%s8076_s1 + $0x44] ss:$16 sps:$4 sm:$0xff] (!%p138_p2)   ;;  %v5333_v9 = vld [vmem:[%s8076_s1 + $0x4c] ss:$16 sps:$4 sm:$0xff] (!%p138_p2)   ;;  %v5335_v10 = vld [vmem:[%s8076_s1 + $0x40] ss:$16 sps:$4 sm:$0xff] (!%p138_p2)  }
   0x9   : > { %v5336_v11 = vld [vmem:[%s8076_s1 + $0x48] ss:$16 sps:$4 sm:$0xff] (!%p138_p2)   ;;  %v5337_v12 = vld [vmem:[%s8076_s1 + $0x64] ss:$16 sps:$4 sm:$0xff] (!%p138_p2)   ;;  %v5339_v13 = vld [vmem:[%s8076_s1 + $0x6c] ss:$16 sps:$4 sm:$0xff] (!%p138_p2)  }
   0xa   : > { %v5341_v14 = vld [vmem:[%s8076_s1 + $0x60] ss:$16 sps:$4 sm:$0xff] (!%p138_p2)   ;;  %v5342_v15 = vld [vmem:[%s8076_s1 + $0x68] ss:$16 sps:$4 sm:$0xff] (!%p138_p2)   ;;  %v5343_v16 = vld [vmem:[%s8076_s1 + $0x84] ss:$16 sps:$4 sm:$0xff] (!%p138_p2)  }
   0xb   : > { %3756 = vmatpush1.bf16.msra.mxu0 (!%p138_p2), %v5329_v6  ;;  %4125 = vmatpush1.bf16.msra.mxu1 (!%p138_p2), %v5330_v7  ;;  %v5345_v17 = vld [vmem:[%s8076_s1 + $0x8c] ss:$16 sps:$4 sm:$0xff] (!%p138_p2)   ;;  %v5347_v18 = vld [vmem:[%s8076_s1 + $0x80] ss:$16 sps:$4 sm:$0xff] (!%p138_p2)   ;;  %v5348_v19 = vld [vmem:[%s8076_s1 + $0x88] ss:$16 sps:$4 sm:$0xff] (!%p138_p2)  }
   0xc   : > { %3757 = vmatprep.subr.bf16.mxu0 (!%p138_p2), %v5331_v8  ;;  %4126 = vmatprep.subr.bf16.mxu1 (!%p138_p2), %v5333_v9  ;;  %v5349_v20 = vld [vmem:[%s8076_s1 + $0xa4] ss:$16 sps:$4 sm:$0xff] (!%p138_p2)   ;;  %v5351_v21 = vld [vmem:[%s8076_s1 + $0xac] ss:$16 sps:$4 sm:$0xff] (!%p138_p2)   ;;  %v5353_v22 = vld [vmem:[%s8076_s1 + $0xa0] ss:$16 sps:$4 sm:$0xff] (!%p138_p2)  }
   0xd   : > { %v5354_v23 = vld [vmem:[%s8076_s1 + $0xa8] ss:$16 sps:$4 sm:$0xff]   ;;  %v5355_v24 = vld [vmem:[%s8076_s1 + $0xc4] ss:$16 sps:$4 sm:$0xff]   ;;  %v5357_v25 = vld [vmem:[%s8076_s1 + $0xcc] ss:$16 sps:$4 sm:$0xff]  }
   0xe   : > { %v5359_v26 = vld [vmem:[%s8076_s1 + $0xc0] ss:$16 sps:$4 sm:$0xff]   ;;  %v5360_v27 = vld [vmem:[%s8076_s1 + $0xc8] ss:$16 sps:$4 sm:$0xff]   ;;  %v5361_v28 = vld [vmem:[%s8076_s1 + $0xe4] ss:$16 sps:$4 sm:$0xff]  }
   0xf   : > { %3758 = vmatpush1.bf16.msra.mxu0 %v5335_v10  ;;  %4127 = vmatpush1.bf16.msra.mxu1 %v5336_v11  ;;  %v5363_v29 = vld [vmem:[%s8076_s1 + $0xec] ss:$16 sps:$4 sm:$0xff]   ;;  %v5365_v30 = vld [vmem:[%s8076_s1 + $0xe0] ss:$16 sps:$4 sm:$0xff]   ;;  %v5366_v31 = vld [vmem:[%s8076_s1 + $0xe8] ss:$16 sps:$4 sm:$0xff]  }
  0x10   : > { %3759 = vmatprep.subr.bf16.mxu0 %v5337_v12  ;;  %4128 = vmatprep.subr.bf16.mxu1 %v5339_v13  ;;  %v5367_v32 = vld [vmem:[%s8076_s1 + $0x104] ss:$16 sps:$4 sm:$0xff]   ;;  %v5369_v33 = vld [vmem:[%s8076_s1 + $0x10c] ss:$16 sps:$4 sm:$0xff]   ;;  %v5371_v34 = vld [vmem:[%s8076_s1 + $0x100] ss:$16 sps:$4 sm:$0xff]  }
  0x11   : > { %v5372_v35 = vld [vmem:[%s8076_s1 + $0x108] ss:$16 sps:$4 sm:$0xff]   ;;  %s8080_s13 = smov (!%p161_p3, %s4653_s13), 1  ;;  %v6203_v37 = vmov 1983009808   ;;  %v6356_v42 = vshrl.u32 %v754_v36, 7 }
  0x12   : > { %v781_v38 = vunpack.c.l.s4 %v6203_v37  ;;  %v5373_v39 = vld [vmem:[%s8076_s1 + $0x124] ss:$16 sps:$4 sm:$0xff]   ;;  %v5375_v40 = vld [vmem:[%s8076_s1 + $0x12c] ss:$16 sps:$4 sm:$0xff]   ;;  %v5377_v41 = vld [vmem:[%s8076_s1 + $0x120] ss:$16 sps:$4 sm:$0xff]  }
  0x13   : > { %3760 = vmatpush1.bf16.msra.mxu0 %v5341_v14  ;;  %4129 = vmatpush1.bf16.msra.mxu1 %v5342_v15  ;;  %s5309_s17 = smul.u32 36, %s8080_s13  ;;  %v5378_v44 = vld [vmem:[%s8076_s1 + $0x128] ss:$16 sps:$4 sm:$0xff]   ;;  %v5379_v45 = vld [vmem:[%s8076_s1 + $0x144] ss:$16 sps:$4 sm:$0xff]   ;;  %vm4491_vm0 = vcmask 1043456  }
  0x14   : > { %3761 = vmatprep.subr.bf16.mxu0 %v5343_v16  ;;  %4130 = vmatprep.subr.bf16.mxu1 %v5345_v17  ;;  %v782_v43 = vunpack.c.0.s8 %v781_v38  ;;  %v5381_v46 = vld [vmem:[%s8076_s1 + $0x14c] ss:$16 sps:$4 sm:$0xff]   ;;  %v5383_v47 = vld [vmem:[%s8076_s1 + $0x140] ss:$16 sps:$4 sm:$0xff]   ;;  %v5384_v48 = vld [vmem:[%s8076_s1 + $0x148] ss:$16 sps:$4 sm:$0xff]  }
  0x15   : > { %s6376_s30 = scalar_lea.vmem %s8075_s0, %s5309_s17  ;;  %v5385_v50 = vld [vmem:[%s8076_s1 + $0x164] ss:$16 sps:$4 sm:$0xff]   ;;  %v5387_v51 = vld [vmem:[%s8076_s1 + $0x16c] ss:$16 sps:$4 sm:$0xff]   ;;  %v5389_v53 = vld [vmem:[%s8076_s1 + $0x160] ss:$16 sps:$4 sm:$0xff]  }
  0x16   : > { %v6379_v49 = vsub.s32 %v782_v43, %v6356_v42  ;;  %v171_v52 = vld [vmem:[%s6376_s30] sm:$0xff]  ;;  %v5390_v55 = vld [vmem:[%s8076_s1 + $0x168] ss:$16 sps:$4 sm:$0xff]   ;;  %v5393_v57 = vld [vmem:[%s8076_s1 + $0x18c] ss:$16 sps:$4 sm:$0xff]   ;;  %s5240_s9 = sshll.u32 %s8080_s13, 4 }
  0x17   : > { %3762 = vmatpush1.bf16.msra.mxu0 %v5347_v18  ;;  %4131 = vmatpush1.bf16.msra.mxu1 %v5348_v19  ;;  %v5391_v56 = vld [vmem:[%s8076_s1 + $0x184] ss:$16 sps:$4 sm:$0xff]   ;;  %v5395_v59 = vld [vmem:[%s8076_s1 + $0x180] ss:$16 sps:$4 sm:$0xff]   ;;  %v5396_v60 = vld [vmem:[%s8076_s1 + $0x188] ss:$16 sps:$4 sm:$0xff]   ;;  %v779_v7 = vcombine.high %v171_v52, %v171_v52  ;;  %s170_s14 = scalar_lea.vmem %s8078_s3, %s5240_s9 }
  0x18   : > { %3763 = vmatprep.subr.bf16.mxu0 %v5349_v20  ;;  %4132 = vmatprep.subr.bf16.mxu1 %v5351_v21  ;;  %v786_v54 = vrot.slane %v171_v52, %v6379_v49  ;;  %v5397_v61 = vld [vmem:[%s8076_s1 + $0x1a4] ss:$16 sps:$4 sm:$0xff]   ;;  %v5399_v62 = vld [vmem:[%s8076_s1 + $0x1ac] ss:$16 sps:$4 sm:$0xff]   ;;  %v5401_v63 = vld [vmem:[%s8076_s1 + $0x1a0] ss:$16 sps:$4 sm:$0xff]  }
  0x19   : > { %v5402_v0 = vld [vmem:[%s8076_s1 + $0x1a8] ss:$16 sps:$4 sm:$0xff]   ;;  %v5403_v1 = vld [vmem:[%s8076_s1 + $0x1c4] ss:$16 sps:$4 sm:$0xff]   ;;  %v5405_v2 = vld [vmem:[%s8076_s1 + $0x1cc] ss:$16 sps:$4 sm:$0xff]   ;;  %v6450_v12 = vrot.slane %v779_v7, %v6379_v49 }
  0x1a   : > { %v794_v58 = vcombine.high %v786_v54, %v786_v54  ;;  %v5407_v3 = vld [vmem:[%s8076_s1 + $0x1c0] ss:$16 sps:$4 sm:$0xff]   ;;  %v5408_v4 = vld [vmem:[%s8076_s1 + $0x1c8] ss:$16 sps:$4 sm:$0xff]   ;;  %v5409_v5 = vld [vmem:[%s8076_s1 + $0x1e4] ss:$16 sps:$4 sm:$0xff]  }
  0x1b   : > { %3764 = vmatpush1.bf16.msra.mxu0 %v5353_v22  ;;  %4133 = vmatpush1.bf16.msra.mxu1 %v5354_v23  ;;  %v5411_v6 = vld [vmem:[%s8076_s1 + $0x1ec] ss:$16 sps:$4 sm:$0xff]   ;;  %v5413_v8 = vld [vmem:[%s8076_s1 + $0x1e0] ss:$16 sps:$4 sm:$0xff]   ;;  %v5414_v9 = vld [vmem:[%s8076_s1 + $0x1e8] ss:$16 sps:$4 sm:$0xff]   ;;  %v795_v17 = vcombine.high %v6450_v12, %v6450_v12 }
  0x1c   : > { %3765 = vmatprep.subr.bf16.mxu0 %v5355_v24  ;;  %4134 = vmatprep.subr.bf16.mxu1 %v5357_v25  ;;  %v5418_v10 = vld [vmem:[%s8076_s1 + $0x204] ss:$16 sps:$4 sm:$0xff]   ;;  %v5421_v11 = vld [vmem:[%s8076_s1 + $0x20c] ss:$16 sps:$4 sm:$0xff]   ;;  %v5416_v13 = vld [vmem:[%s8076_s1 + $0x200] ss:$16 sps:$4 sm:$0xff]  }
  0x1d   : > { %3785 = vmatprep.mubr.bf16.mxu0 %v794_v58  ;;  %4154 = vmatprep.mubr.bf16.mxu1 %v794_v58  ;;  %v5419_v14 = vld [vmem:[%s8076_s1 + $0x208] ss:$16 sps:$4 sm:$0xff]   ;;  %v5424_v15 = vld [vmem:[%s8076_s1 + $0x224] ss:$16 sps:$4 sm:$0xff]   ;;  %v5427_v16 = vld [vmem:[%s8076_s1 + $0x22c] ss:$16 sps:$4 sm:$0xff]  }
  0x1e   : > { %v5422_v18 = vld [vmem:[%s8076_s1 + $0x220] ss:$16 sps:$4 sm:$0xff]   ;;  %v5425_v19 = vld [vmem:[%s8076_s1 + $0x228] ss:$16 sps:$4 sm:$0xff]   ;;  %v5430_v20 = vld [vmem:[%s8076_s1 + $0x244] ss:$16 sps:$4 sm:$0xff]  }
  0x1f   : > { %3766 = vmatpush1.bf16.msra.mxu0 %v5359_v26  ;;  %4135 = vmatpush1.bf16.msra.mxu1 %v5360_v27  ;;  %v5433_v21 = vld [vmem:[%s8076_s1 + $0x24c] ss:$16 sps:$4 sm:$0xff]   ;;  %v5428_v22 = vld [vmem:[%s8076_s1 + $0x240] ss:$16 sps:$4 sm:$0xff]   ;;  %v5431_v23 = vld [vmem:[%s8076_s1 + $0x248] ss:$16 sps:$4 sm:$0xff]  }
  0x20   : > { %3767 = vmatprep.subr.bf16.mxu0 %v5361_v28  ;;  %4136 = vmatprep.subr.bf16.mxu1 %v5363_v29  ;;  %v5436_v24 = vld [vmem:[%s8076_s1 + $0x264] ss:$16 sps:$4 sm:$0xff]   ;;  %v5439_v25 = vld [vmem:[%s8076_s1 + $0x26c] ss:$16 sps:$4 sm:$0xff]   ;;  %v5434_v26 = vld [vmem:[%s8076_s1 + $0x260] ss:$16 sps:$4 sm:$0xff]  }
  0x21   : > { %v5437_v27 = vld [vmem:[%s8076_s1 + $0x268] ss:$16 sps:$4 sm:$0xff]   ;;  %v5442_v28 = vld [vmem:[%s8076_s1 + $0x284] ss:$16 sps:$4 sm:$0xff]   ;;  %v5445_v29 = vld [vmem:[%s8076_s1 + $0x28c] ss:$16 sps:$4 sm:$0xff]  }
  0x22   : > { %v5454_v36 = vld [vmem:[%s8076_s1 + $0x2c4] ss:$16 sps:$4 sm:$0xff]   ;;  %v5457_v37 = vld [vmem:[%s8076_s1 + $0x2cc] ss:$16 sps:$4 sm:$0xff]   ;;  %v5452_v38 = vld [vmem:[%s8076_s1 + $0x2c0] ss:$16 sps:$4 sm:$0xff]  }
  0x23   : > { %3768 = vmatpush1.bf16.msra.mxu0 %v5365_v30  ;;  %4137 = vmatpush1.bf16.msra.mxu1 %v5366_v31  ;;  %v5440_v30 = vld [vmem:[%s8076_s1 + $0x280] ss:$16 sps:$4 sm:$0xff]   ;;  %v5443_v31 = vld [vmem:[%s8076_s1 + $0x288] ss:$16 sps:$4 sm:$0xff]   ;;  %v5484_v58 = vld [vmem:[%s8076_s1 + $0x364] ss:$16 sps:$4 sm:$0xff]  }
  0x24   : > { %3769 = vmatprep.subr.bf16.mxu0 %v5367_v32  ;;  %4138 = vmatprep.subr.bf16.mxu1 %v5369_v33  ;;  %v5448_v32 = vld [vmem:[%s8076_s1 + $0x2a4] ss:$16 sps:$4 sm:$0xff]   ;;  %v5451_v33 = vld [vmem:[%s8076_s1 + $0x2ac] ss:$16 sps:$4 sm:$0xff]   ;;  %v5458_v43 = vld [vmem:[%s8076_s1 + $0x2e0] ss:$16 sps:$4 sm:$0xff]  }
  0x25   : > { %v5470_v52 = vld [vmem:[%s8076_s1 + $0x320] ss:$16 sps:$4 sm:$0xff]   ;;  %v5505_v7 = vld [vmem:[%s8076_s1 + $0x3cc] ss:$16 sps:$4 sm:$0xff]  }
  0x27   : > { %3770 = vmatpush1.bf16.msra.mxu0 %v5371_v34  ;;  %4139 = vmatpush1.bf16.msra.mxu1 %v5372_v35  ;;  %v5446_v34 = vld [vmem:[%s8076_s1 + $0x2a0] ss:$16 sps:$4 sm:$0xff]   ;;  %v5449_v35 = vld [vmem:[%s8076_s1 + $0x2a8] ss:$16 sps:$4 sm:$0xff]  }
  0x28   : > { %3771 = vmatprep.subr.bf16.mxu0 %v5373_v39  ;;  %4140 = vmatprep.subr.bf16.mxu1 %v5375_v40  ;;  %v5455_v39 = vld [vmem:[%s8076_s1 + $0x2c8] ss:$16 sps:$4 sm:$0xff]   ;;  %v5460_v40 = vld [vmem:[%s8076_s1 + $0x2e4] ss:$16 sps:$4 sm:$0xff]  }
  0x2b   : > { %3772 = vmatpush1.bf16.msra.mxu0 %v5377_v41  ;;  %4141 = vmatpush1.bf16.msra.mxu1 %v5378_v44  ;;  %v5463_v41 = vld [vmem:[%s8076_s1 + $0x2ec] ss:$16 sps:$4 sm:$0xff]   ;;  %v5461_v44 = vld [vmem:[%s8076_s1 + $0x2e8] ss:$16 sps:$4 sm:$0xff]  }
  0x2c   : > { %3773 = vmatprep.subr.bf16.mxu0 %v5379_v45  ;;  %4142 = vmatprep.subr.bf16.mxu1 %v5381_v46  ;;  %v5466_v45 = vld [vmem:[%s8076_s1 + $0x304] ss:$16 sps:$4 sm:$0xff]   ;;  %v5469_v46 = vld [vmem:[%s8076_s1 + $0x30c] ss:$16 sps:$4 sm:$0xff]  }
  0x2f   : > { %3774 = vmatpush1.bf16.msra.mxu0 %v5383_v47  ;;  %4143 = vmatpush1.bf16.msra.mxu1 %v5384_v48  ;;  %v5464_v47 = vld [vmem:[%s8076_s1 + $0x300] ss:$16 sps:$4 sm:$0xff]   ;;  %v5467_v48 = vld [vmem:[%s8076_s1 + $0x308] ss:$16 sps:$4 sm:$0xff]  }
  0x30   : > { %3775 = vmatprep.subr.bf16.mxu0 %v5385_v50  ;;  %4144 = vmatprep.subr.bf16.mxu1 %v5387_v51  ;;  %v5472_v50 = vld [vmem:[%s8076_s1 + $0x324] ss:$16 sps:$4 sm:$0xff]   ;;  %v5475_v51 = vld [vmem:[%s8076_s1 + $0x32c] ss:$16 sps:$4 sm:$0xff]  }
  0x33   : > { %3776 = vmatpush1.bf16.msra.mxu0 %v5389_v53  ;;  %4145 = vmatpush1.bf16.msra.mxu1 %v5390_v55  ;;  %v5473_v53 = vld [vmem:[%s8076_s1 + $0x328] ss:$16 sps:$4 sm:$0xff]   ;;  %v5481_v55 = vld [vmem:[%s8076_s1 + $0x34c] ss:$16 sps:$4 sm:$0xff]  }
  0x34   : > { %3777 = vmatprep.subr.bf16.mxu0 %v5391_v56  ;;  %4146 = vmatprep.subr.bf16.mxu1 %v5393_v57  ;;  %v5476_v56 = vld [vmem:[%s8076_s1 + $0x340] ss:$16 sps:$4 sm:$0xff]   ;;  %v5479_v57 = vld [vmem:[%s8076_s1 + $0x348] ss:$16 sps:$4 sm:$0xff]  }
  0x37   : > { %3778 = vmatpush1.bf16.msra.mxu0 %v5395_v59  ;;  %4147 = vmatpush1.bf16.msra.mxu1 %v5396_v60  ;;  %v5487_v59 = vld [vmem:[%s8076_s1 + $0x36c] ss:$16 sps:$4 sm:$0xff]   ;;  %v5482_v60 = vld [vmem:[%s8076_s1 + $0x360] ss:$16 sps:$4 sm:$0xff]  }
  0x38   : > { %3779 = vmatprep.subr.bf16.mxu0 %v5397_v61  ;;  %4148 = vmatprep.subr.bf16.mxu1 %v5399_v62  ;;  %v5485_v61 = vld [vmem:[%s8076_s1 + $0x368] ss:$16 sps:$4 sm:$0xff]   ;;  %v5490_v62 = vld [vmem:[%s8076_s1 + $0x384] ss:$16 sps:$4 sm:$0xff]  }
  0x3b   : > { %3780 = vmatpush1.bf16.msra.mxu0 %v5401_v63  ;;  %4149 = vmatpush1.bf16.msra.mxu1 %v5402_v0  ;;  %v5493_v63 = vld [vmem:[%s8076_s1 + $0x38c] ss:$16 sps:$4 sm:$0xff]   ;;  %v5488_v0 = vld [vmem:[%s8076_s1 + $0x380] ss:$16 sps:$4 sm:$0xff]  }
  0x3c   : > { %3781 = vmatprep.subr.bf16.mxu0 %v5403_v1  ;;  %4150 = vmatprep.subr.bf16.mxu1 %v5405_v2  ;;  %v5491_v1 = vld [vmem:[%s8076_s1 + $0x388] ss:$16 sps:$4 sm:$0xff]   ;;  %v5496_v2 = vld [vmem:[%s8076_s1 + $0x3a4] ss:$16 sps:$4 sm:$0xff]  }
  0x3f   : > { %3782 = vmatpush1.bf16.msra.mxu0 %v5407_v3  ;;  %4151 = vmatpush1.bf16.msra.mxu1 %v5408_v4  ;;  %v5499_v3 = vld [vmem:[%s8076_s1 + $0x3ac] ss:$16 sps:$4 sm:$0xff]   ;;  %v5494_v4 = vld [vmem:[%s8076_s1 + $0x3a0] ss:$16 sps:$4 sm:$0xff]  }
  0x40   : > { %3783 = vmatprep.subr.bf16.mxu0 %v5409_v5  ;;  %4152 = vmatprep.subr.bf16.mxu1 %v5411_v6  ;;  %v5497_v5 = vld [vmem:[%s8076_s1 + $0x3a8] ss:$16 sps:$4 sm:$0xff]   ;;  %v5502_v6 = vld [vmem:[%s8076_s1 + $0x3c4] ss:$16 sps:$4 sm:$0xff]  }
  0x43   : > { %3784 = vmatpush1.bf16.msra.mxu0 %v5413_v8  ;;  %4153 = vmatpush1.bf16.msra.mxu1 %v5414_v9  ;;  %v5500_v8 = vld [vmem:[%s8076_s1 + $0x3c0] ss:$16 sps:$4 sm:$0xff]   ;;  %v5503_v9 = vld [vmem:[%s8076_s1 + $0x3c8] ss:$16 sps:$4 sm:$0xff]  }
  0x44   : > { %3794 = vmatprep.subr.bf16.mxu0 %v5418_v10  ;;  %4163 = vmatprep.subr.bf16.mxu1 %v5421_v11  ;;  %v5508_v10 = vld [vmem:[%s8076_s1 + $0x3e4] ss:$16 sps:$4 sm:$0xff]   ;;  %v5511_v11 = vld [vmem:[%s8076_s1 + $0x3ec] ss:$16 sps:$4 sm:$0xff]  }
  0x46   : > { %3786 = vmatmul.mubr.bf16.vlgmr.msra.gmra.mrb[0].mxu0 %v786_v54  ;;  %4155 = vmatmul.mubr.bf16.vlgmr.msra.gmra.mrb[0].mxu1 %v786_v54  ;;  %v5478_v54 = vld [vmem:[%s8076_s1 + $0x344] ss:$16 sps:$4 sm:$0xff]  }
  0x47   : > { %3795 = vmatpush1.bf16.msra.mxu0 %v5416_v13  ;;  %4164 = vmatpush1.bf16.msra.mxu1 %v5419_v14  ;;  %v5506_v13 = vld [vmem:[%s8076_s1 + $0x3e0] ss:$16 sps:$4 sm:$0xff]   ;;  %v5509_v14 = vld [vmem:[%s8076_s1 + $0x3e8] ss:$16 sps:$4 sm:$0xff]  }
  0x48   : > { %3796 = vmatprep.subr.bf16.mxu0 %v5424_v15  ;;  %4165 = vmatprep.subr.bf16.mxu1 %v5427_v16  ;;  %v5514_v15 = vld [vmem:[%s8076_s1 + $0x404] ss:$16 sps:$4 sm:$0xff]   ;;  %v5517_v16 = vld [vmem:[%s8076_s1 + $0x40c] ss:$16 sps:$4 sm:$0xff]  }
  0x49   : > { %3826 = vmatprep.mubr.bf16.mxu0 %v795_v17  ;;  %4195 = vmatprep.mubr.bf16.mxu1 %v795_v17  ;;  %v5512_v17 = vld [vmem:[%s8076_s1 + $0x400] ss:$16 sps:$4 sm:$0xff]  }
  0x4b   : > { %3797 = vmatpush1.bf16.msra.mxu0 %v5422_v18  ;;  %4166 = vmatpush1.bf16.msra.mxu1 %v5425_v19  ;;  %v5515_v18 = vld [vmem:[%s8076_s1 + $0x408] ss:$16 sps:$4 sm:$0xff]  }
  0x4c   : > { %3798 = vmatprep.subr.bf16.mxu0 %v5430_v20  ;;  %4167 = vmatprep.subr.bf16.mxu1 %v5433_v21  ;;  %v6653_v19 = vld [vmem:[%s6376_s30 + $0x8] sm:$0xff]  ;;  %v5520_v20 = vld [vmem:[%s8076_s1 + $0x424] ss:$16 sps:$4 sm:$0xff]  }
  0x4d   : > { %v5523_v21 = vld [vmem:[%s8076_s1 + $0x42c] ss:$16 sps:$4 sm:$0xff]  }
  0x4f   : > { %3799 = vmatpush1.bf16.msra.mxu0 %v5428_v22  ;;  %4168 = vmatpush1.bf16.msra.mxu1 %v5431_v23  ;;  %v6663_v22 = vrot.slane %v6653_v19, %v6379_v49 }
  0x50   : > { %3800 = vmatprep.subr.bf16.mxu0 %v5436_v24  ;;  %4169 = vmatprep.subr.bf16.mxu1 %v5439_v25  ;;  %v5518_v24 = vld [vmem:[%s8076_s1 + $0x420] ss:$16 sps:$4 sm:$0xff]   ;;  %v5521_v25 = vld [vmem:[%s8076_s1 + $0x428] ss:$16 sps:$4 sm:$0xff]  }
  0x51   : > { %v811_v23 = vcombine.high %v6663_v22, %v6663_v22 }
  0x53   : > { %3801 = vmatpush1.bf16.msra.mxu0 %v5434_v26  ;;  %4170 = vmatpush1.bf16.msra.mxu1 %v5437_v27  ;;  %v5526_v26 = vld [vmem:[%s8076_s1 + $0x444] ss:$16 sps:$4 sm:$0xff]   ;;  %v5524_v27 = vld [vmem:[%s8076_s1 + $0x440] ss:$16 sps:$4 sm:$0xff]  }
  0x54   : > { %3802 = vmatprep.subr.bf16.mxu0 %v5442_v28  ;;  %4171 = vmatprep.subr.bf16.mxu1 %v5445_v29  ;;  %v5527_v28 = vld [vmem:[%s8076_s1 + $0x448] ss:$16 sps:$4 sm:$0xff]   ;;  %v5532_v29 = vld [vmem:[%s8076_s1 + $0x464] ss:$16 sps:$4 sm:$0xff]  }
  0x57   : > { %3803 = vmatpush1.bf16.msra.mxu0 %v5440_v30  ;;  %4172 = vmatpush1.bf16.msra.mxu1 %v5443_v31  ;;  %v5535_v30 = vld [vmem:[%s8076_s1 + $0x46c] ss:$16 sps:$4 sm:$0xff]   ;;  %v5530_v31 = vld [vmem:[%s8076_s1 + $0x460] ss:$16 sps:$4 sm:$0xff]  }
  0x58   : > { %3804 = vmatprep.subr.bf16.mxu0 %v5448_v32  ;;  %4173 = vmatprep.subr.bf16.mxu1 %v5451_v33  ;;  %v5533_v32 = vld [vmem:[%s8076_s1 + $0x468] ss:$16 sps:$4 sm:$0xff]   ;;  %v5538_v33 = vld [vmem:[%s8076_s1 + $0x484] ss:$16 sps:$4 sm:$0xff]  }
  0x5b   : > { %3805 = vmatpush1.bf16.msra.mxu0 %v5446_v34  ;;  %4174 = vmatpush1.bf16.msra.mxu1 %v5449_v35  ;;  %v5541_v34 = vld [vmem:[%s8076_s1 + $0x48c] ss:$16 sps:$4 sm:$0xff]   ;;  %v5536_v35 = vld [vmem:[%s8076_s1 + $0x480] ss:$16 sps:$4 sm:$0xff]  }
  0x5c   : > { %3806 = vmatprep.subr.bf16.mxu0 %v5454_v36  ;;  %4175 = vmatprep.subr.bf16.mxu1 %v5457_v37  ;;  %v5539_v36 = vld [vmem:[%s8076_s1 + $0x488] ss:$16 sps:$4 sm:$0xff]   ;;  %v5544_v37 = vld [vmem:[%s8076_s1 + $0x4a4] ss:$16 sps:$4 sm:$0xff]  }
  0x5f   : > { %3807 = vmatpush1.bf16.msra.mxu0 %v5452_v38  ;;  %4176 = vmatpush1.bf16.msra.mxu1 %v5455_v39  ;;  %v5547_v38 = vld [vmem:[%s8076_s1 + $0x4ac] ss:$16 sps:$4 sm:$0xff]   ;;  %v5542_v39 = vld [vmem:[%s8076_s1 + $0x4a0] ss:$16 sps:$4 sm:$0xff]  }
  0x60   : > { %3808 = vmatprep.subr.bf16.mxu0 %v5460_v40  ;;  %4177 = vmatprep.subr.bf16.mxu1 %v5463_v41  ;;  %v5545_v40 = vld [vmem:[%s8076_s1 + $0x4a8] ss:$16 sps:$4 sm:$0xff]   ;;  %v5550_v41 = vld [vmem:[%s8076_s1 + $0x4c4] ss:$16 sps:$4 sm:$0xff]  }
  0x63   : > { %3809 = vmatpush1.bf16.msra.mxu0 %v5458_v43  ;;  %4178 = vmatpush1.bf16.msra.mxu1 %v5461_v44  ;;  %v5553_v43 = vld [vmem:[%s8076_s1 + $0x4cc] ss:$16 sps:$4 sm:$0xff]   ;;  %v5548_v44 = vld [vmem:[%s8076_s1 + $0x4c0] ss:$16 sps:$4 sm:$0xff]  }
  0x64   : > { %3810 = vmatprep.subr.bf16.mxu0 %v5466_v45  ;;  %4179 = vmatprep.subr.bf16.mxu1 %v5469_v46  ;;  %v5551_v45 = vld [vmem:[%s8076_s1 + $0x4c8] ss:$16 sps:$4 sm:$0xff]   ;;  %v5556_v46 = vld [vmem:[%s8076_s1 + $0x4e4] ss:$16 sps:$4 sm:$0xff]  }
  0x67   : > { %3811 = vmatpush1.bf16.msra.mxu0 %v5464_v47  ;;  %4180 = vmatpush1.bf16.msra.mxu1 %v5467_v48  ;;  %v5559_v47 = vld [vmem:[%s8076_s1 + $0x4ec] ss:$16 sps:$4 sm:$0xff]   ;;  %v5554_v48 = vld [vmem:[%s8076_s1 + $0x4e0] ss:$16 sps:$4 sm:$0xff]  }
  0x68   : > { %3812 = vmatprep.subr.bf16.mxu0 %v5472_v50  ;;  %4181 = vmatprep.subr.bf16.mxu1 %v5475_v51  ;;  %v5557_v50 = vld [vmem:[%s8076_s1 + $0x4e8] ss:$16 sps:$4 sm:$0xff]   ;;  %v5562_v51 = vld [vmem:[%s8076_s1 + $0x504] ss:$16 sps:$4 sm:$0xff]  }
  0x6b   : > { %3813 = vmatpush1.bf16.msra.mxu0 %v5470_v52  ;;  %4182 = vmatpush1.bf16.msra.mxu1 %v5473_v53  ;;  %v5565_v52 = vld [vmem:[%s8076_s1 + $0x50c] ss:$16 sps:$4 sm:$0xff]   ;;  %v5560_v53 = vld [vmem:[%s8076_s1 + $0x500] ss:$16 sps:$4 sm:$0xff]  }
  0x6c   : > { %3814 = vmatprep.subr.bf16.mxu0 %v5478_v54  ;;  %4183 = vmatprep.subr.bf16.mxu1 %v5481_v55  ;;  %v5563_v54 = vld [vmem:[%s8076_s1 + $0x508] ss:$16 sps:$4 sm:$0xff]   ;;  %v5568_v55 = vld [vmem:[%s8076_s1 + $0x524] ss:$16 sps:$4 sm:$0xff]  }
  0x6f   : > { %3815 = vmatpush1.bf16.msra.mxu0 %v5476_v56  ;;  %4184 = vmatpush1.bf16.msra.mxu1 %v5479_v57  ;;  %v5571_v56 = vld [vmem:[%s8076_s1 + $0x52c] ss:$16 sps:$4 sm:$0xff]   ;;  %v5566_v57 = vld [vmem:[%s8076_s1 + $0x520] ss:$16 sps:$4 sm:$0xff]  }
  0x70   : > { %3816 = vmatprep.subr.bf16.mxu0 %v5484_v58  ;;  %4185 = vmatprep.subr.bf16.mxu1 %v5487_v59  ;;  %v5569_v58 = vld [vmem:[%s8076_s1 + $0x528] ss:$16 sps:$4 sm:$0xff]   ;;  %v5574_v59 = vld [vmem:[%s8076_s1 + $0x544] ss:$16 sps:$4 sm:$0xff]  }
  0x73   : > { %3817 = vmatpush1.bf16.msra.mxu0 %v5482_v60  ;;  %4186 = vmatpush1.bf16.msra.mxu1 %v5485_v61  ;;  %v5577_v60 = vld [vmem:[%s8076_s1 + $0x54c] ss:$16 sps:$4 sm:$0xff]   ;;  %v5572_v61 = vld [vmem:[%s8076_s1 + $0x540] ss:$16 sps:$4 sm:$0xff]  }
  0x74   : > { %3818 = vmatprep.subr.bf16.mxu0 %v5490_v62  ;;  %4187 = vmatprep.subr.bf16.mxu1 %v5493_v63  ;;  %v5575_v62 = vld [vmem:[%s8076_s1 + $0x548] ss:$16 sps:$4 sm:$0xff]   ;;  %v5580_v63 = vld [vmem:[%s8076_s1 + $0x564] ss:$16 sps:$4 sm:$0xff]  }
  0x77   : > { %3819 = vmatpush1.bf16.msra.mxu0 %v5488_v0  ;;  %4188 = vmatpush1.bf16.msra.mxu1 %v5491_v1  ;;  %v5583_v0 = vld [vmem:[%s8076_s1 + $0x56c] ss:$16 sps:$4 sm:$0xff]   ;;  %v5578_v1 = vld [vmem:[%s8076_s1 + $0x560] ss:$16 sps:$4 sm:$0xff]  }
  0x78   : > { %3820 = vmatprep.subr.bf16.mxu0 %v5496_v2  ;;  %4189 = vmatprep.subr.bf16.mxu1 %v5499_v3  ;;  %v5581_v2 = vld [vmem:[%s8076_s1 + $0x568] ss:$16 sps:$4 sm:$0xff]   ;;  %v5586_v3 = vld [vmem:[%s8076_s1 + $0x584] ss:$16 sps:$4 sm:$0xff]  }
  0x7b   : > { %3821 = vmatpush1.bf16.msra.mxu0 %v5494_v4  ;;  %4190 = vmatpush1.bf16.msra.mxu1 %v5497_v5  ;;  %v5589_v4 = vld [vmem:[%s8076_s1 + $0x58c] ss:$16 sps:$4 sm:$0xff]   ;;  %v5584_v5 = vld [vmem:[%s8076_s1 + $0x580] ss:$16 sps:$4 sm:$0xff]  }
  0x7c   : > { %3822 = vmatprep.subr.bf16.mxu0 %v5502_v6  ;;  %4191 = vmatprep.subr.bf16.mxu1 %v5505_v7  ;;  %v5587_v6 = vld [vmem:[%s8076_s1 + $0x588] ss:$16 sps:$4 sm:$0xff]   ;;  %v5592_v7 = vld [vmem:[%s8076_s1 + $0x5a4] ss:$16 sps:$4 sm:$0xff]  }
  0x7f   : > { %3823 = vmatpush1.bf16.msra.mxu0 %v5500_v8  ;;  %4192 = vmatpush1.bf16.msra.mxu1 %v5503_v9  ;;  %v5595_v8 = vld [vmem:[%s8076_s1 + $0x5ac] ss:$16 sps:$4 sm:$0xff]   ;;  %v5590_v9 = vld [vmem:[%s8076_s1 + $0x5a0] ss:$16 sps:$4 sm:$0xff]  }
  0x80   : > { %3824 = vmatprep.subr.bf16.mxu0 %v5508_v10  ;;  %4193 = vmatprep.subr.bf16.mxu1 %v5511_v11  ;;  %v5593_v10 = vld [vmem:[%s8076_s1 + $0x5a8] ss:$16 sps:$4 sm:$0xff]   ;;  %v5598_v11 = vld [vmem:[%s8076_s1 + $0x5c4] ss:$16 sps:$4 sm:$0xff]  }
  0x83   : > { %3825 = vmatpush1.bf16.msra.mxu0 %v5506_v13  ;;  %4194 = vmatpush1.bf16.msra.mxu1 %v5509_v14  ;;  %v5601_v13 = vld [vmem:[%s8076_s1 + $0x5cc] ss:$16 sps:$4 sm:$0xff]   ;;  %v5596_v14 = vld [vmem:[%s8076_s1 + $0x5c0] ss:$16 sps:$4 sm:$0xff]  }
  0x84   : > { %3835 = vmatprep.subr.bf16.mxu0 %v5514_v15  ;;  %4204 = vmatprep.subr.bf16.mxu1 %v5517_v16  ;;  %v5599_v15 = vld [vmem:[%s8076_s1 + $0x5c8] ss:$16 sps:$4 sm:$0xff]   ;;  %v5604_v16 = vld [vmem:[%s8076_s1 + $0x5e4] ss:$16 sps:$4 sm:$0xff]  }
  0x86   : > { %3827 = vmatmul.mubr.bf16.vlgmr.msra.gmra.mrb[0].mxu0 %v6450_v12  ;;  %4196 = vmatmul.mubr.bf16.vlgmr.msra.gmra.mrb[0].mxu1 %v6450_v12  ;;  %v5529_v12 = vld [vmem:[%s8076_s1 + $0x44c] ss:$16 sps:$4 sm:$0xff]  }
  0x87   : > { %3836 = vmatpush1.bf16.msra.mxu0 %v5512_v17  ;;  %4205 = vmatpush1.bf16.msra.mxu1 %v5515_v18  ;;  %v5607_v17 = vld [vmem:[%s8076_s1 + $0x5ec] ss:$16 sps:$4 sm:$0xff]   ;;  %v796_v18 = vcombine.high %v6653_v19, %v6653_v19 }
  0x88   : > { %3837 = vmatprep.subr.bf16.mxu0 %v5520_v20  ;;  %4206 = vmatprep.subr.bf16.mxu1 %v5523_v21  ;;  %v5602_v20 = vld [vmem:[%s8076_s1 + $0x5e0] ss:$16 sps:$4 sm:$0xff]   ;;  %v5605_v21 = vld [vmem:[%s8076_s1 + $0x5e8] ss:$16 sps:$4 sm:$0xff]   ;;  %v5613_v19 = vld [vmem:[%s8076_s1 + $0x60c] ss:$16 sps:$4 sm:$0xff]  }
  0x89   : > { %3867 = vmatprep.mubr.bf16.mxu0 %v811_v23  ;;  %4236 = vmatprep.mubr.bf16.mxu1 %v811_v23  ;;  %v5610_v23 = vld [vmem:[%s8076_s1 + $0x604] ss:$16 sps:$4 sm:$0xff]  }
  0x8b   : > { %3838 = vmatpush1.bf16.msra.mxu0 %v5518_v24  ;;  %4207 = vmatpush1.bf16.msra.mxu1 %v5521_v25  ;;  %v6852_v24 = vrot.slane %v796_v18, %v6379_v49  ;;  %v5608_v25 = vld [vmem:[%s8076_s1 + $0x600] ss:$16 sps:$4 sm:$0xff]   ;;  %v5697_v18 = vld [vmem:[%s8076_s1 + $0x7cc] ss:$16 sps:$4 sm:$0xff]  }
  0x8c   : > { %3839 = vmatprep.subr.bf16.mxu0 %v5526_v26  ;;  %4208 = vmatprep.subr.bf16.mxu1 %v5529_v12  ;;  %v5611_v26 = vld [vmem:[%s8076_s1 + $0x608] ss:$16 sps:$4 sm:$0xff]   ;;  %v5616_v12 = vld [vmem:[%s8076_s1 + $0x624] ss:$16 sps:$4 sm:$0xff]  }
  0x8f   : > { %3840 = vmatpush1.bf16.msra.mxu0 %v5524_v27  ;;  %4209 = vmatpush1.bf16.msra.mxu1 %v5527_v28  ;;  %v5619_v27 = vld [vmem:[%s8076_s1 + $0x62c] ss:$16 sps:$4 sm:$0xff]   ;;  %v812_v28 = vcombine.high %v6852_v24, %v6852_v24 }
  0x90   : > { %3841 = vmatprep.subr.bf16.mxu0 %v5532_v29  ;;  %4210 = vmatprep.subr.bf16.mxu1 %v5535_v30  ;;  %v5614_v29 = vld [vmem:[%s8076_s1 + $0x620] ss:$16 sps:$4 sm:$0xff]   ;;  %v5617_v30 = vld [vmem:[%s8076_s1 + $0x628] ss:$16 sps:$4 sm:$0xff]  }
  0x93   : > { %3842 = vmatpush1.bf16.msra.mxu0 %v5530_v31  ;;  %4211 = vmatpush1.bf16.msra.mxu1 %v5533_v32  ;;  %v5622_v31 = vld [vmem:[%s8076_s1 + $0x644] ss:$16 sps:$4 sm:$0xff]   ;;  %v5620_v32 = vld [vmem:[%s8076_s1 + $0x640] ss:$16 sps:$4 sm:$0xff]  }
  0x94   : > { %3843 = vmatprep.subr.bf16.mxu0 %v5538_v33  ;;  %4212 = vmatprep.subr.bf16.mxu1 %v5541_v34  ;;  %v5623_v33 = vld [vmem:[%s8076_s1 + $0x648] ss:$16 sps:$4 sm:$0xff]   ;;  %v5628_v34 = vld [vmem:[%s8076_s1 + $0x664] ss:$16 sps:$4 sm:$0xff]  }
  0x97   : > { %3844 = vmatpush1.bf16.msra.mxu0 %v5536_v35  ;;  %4213 = vmatpush1.bf16.msra.mxu1 %v5539_v36  ;;  %v5631_v35 = vld [vmem:[%s8076_s1 + $0x66c] ss:$16 sps:$4 sm:$0xff]   ;;  %v5626_v36 = vld [vmem:[%s8076_s1 + $0x660] ss:$16 sps:$4 sm:$0xff]  }
  0x98   : > { %3845 = vmatprep.subr.bf16.mxu0 %v5544_v37  ;;  %4214 = vmatprep.subr.bf16.mxu1 %v5547_v38  ;;  %v5629_v37 = vld [vmem:[%s8076_s1 + $0x668] ss:$16 sps:$4 sm:$0xff]   ;;  %v5634_v38 = vld [vmem:[%s8076_s1 + $0x684] ss:$16 sps:$4 sm:$0xff]  }
  0x9b   : > { %3846 = vmatpush1.bf16.msra.mxu0 %v5542_v39  ;;  %4215 = vmatpush1.bf16.msra.mxu1 %v5545_v40  ;;  %v5637_v39 = vld [vmem:[%s8076_s1 + $0x68c] ss:$16 sps:$4 sm:$0xff]   ;;  %v5632_v40 = vld [vmem:[%s8076_s1 + $0x680] ss:$16 sps:$4 sm:$0xff]  }
  0x9c   : > { %3847 = vmatprep.subr.bf16.mxu0 %v5550_v41  ;;  %4216 = vmatprep.subr.bf16.mxu1 %v5553_v43  ;;  %v5635_v41 = vld [vmem:[%s8076_s1 + $0x688] ss:$16 sps:$4 sm:$0xff]   ;;  %v5640_v43 = vld [vmem:[%s8076_s1 + $0x6a4] ss:$16 sps:$4 sm:$0xff]  }
  0x9f   : > { %3848 = vmatpush1.bf16.msra.mxu0 %v5548_v44  ;;  %4217 = vmatpush1.bf16.msra.mxu1 %v5551_v45  ;;  %v5643_v44 = vld [vmem:[%s8076_s1 + $0x6ac] ss:$16 sps:$4 sm:$0xff]   ;;  %v5638_v45 = vld [vmem:[%s8076_s1 + $0x6a0] ss:$16 sps:$4 sm:$0xff]  }
  0xa0   : > { %3849 = vmatprep.subr.bf16.mxu0 %v5556_v46  ;;  %4218 = vmatprep.subr.bf16.mxu1 %v5559_v47  ;;  %v5641_v46 = vld [vmem:[%s8076_s1 + $0x6a8] ss:$16 sps:$4 sm:$0xff]   ;;  %v5646_v47 = vld [vmem:[%s8076_s1 + $0x6c4] ss:$16 sps:$4 sm:$0xff]  }
  0xa3   : > { %3850 = vmatpush1.bf16.msra.mxu0 %v5554_v48  ;;  %4219 = vmatpush1.bf16.msra.mxu1 %v5557_v50  ;;  %v5649_v48 = vld [vmem:[%s8076_s1 + $0x6cc] ss:$16 sps:$4 sm:$0xff]   ;;  %v5644_v50 = vld [vmem:[%s8076_s1 + $0x6c0] ss:$16 sps:$4 sm:$0xff]  }
  0xa4   : > { %3851 = vmatprep.subr.bf16.mxu0 %v5562_v51  ;;  %4220 = vmatprep.subr.bf16.mxu1 %v5565_v52  ;;  %v5647_v51 = vld [vmem:[%s8076_s1 + $0x6c8] ss:$16 sps:$4 sm:$0xff]   ;;  %v5652_v52 = vld [vmem:[%s8076_s1 + $0x6e4] ss:$16 sps:$4 sm:$0xff]  }
  0xa7   : > { %3852 = vmatpush1.bf16.msra.mxu0 %v5560_v53  ;;  %4221 = vmatpush1.bf16.msra.mxu1 %v5563_v54  ;;  %v5655_v53 = vld [vmem:[%s8076_s1 + $0x6ec] ss:$16 sps:$4 sm:$0xff]   ;;  %v5650_v54 = vld [vmem:[%s8076_s1 + $0x6e0] ss:$16 sps:$4 sm:$0xff]  }
  0xa8   : > { %3853 = vmatprep.subr.bf16.mxu0 %v5568_v55  ;;  %4222 = vmatprep.subr.bf16.mxu1 %v5571_v56  ;;  %v5653_v55 = vld [vmem:[%s8076_s1 + $0x6e8] ss:$16 sps:$4 sm:$0xff]   ;;  %v5658_v56 = vld [vmem:[%s8076_s1 + $0x704] ss:$16 sps:$4 sm:$0xff]  }
  0xab   : > { %3854 = vmatpush1.bf16.msra.mxu0 %v5566_v57  ;;  %4223 = vmatpush1.bf16.msra.mxu1 %v5569_v58  ;;  %v5661_v57 = vld [vmem:[%s8076_s1 + $0x70c] ss:$16 sps:$4 sm:$0xff]   ;;  %v5656_v58 = vld [vmem:[%s8076_s1 + $0x700] ss:$16 sps:$4 sm:$0xff]  }
  0xac   : > { %3855 = vmatprep.subr.bf16.mxu0 %v5574_v59  ;;  %4224 = vmatprep.subr.bf16.mxu1 %v5577_v60  ;;  %v5659_v59 = vld [vmem:[%s8076_s1 + $0x708] ss:$16 sps:$4 sm:$0xff]   ;;  %v5664_v60 = vld [vmem:[%s8076_s1 + $0x724] ss:$16 sps:$4 sm:$0xff]  }
  0xaf   : > { %3856 = vmatpush1.bf16.msra.mxu0 %v5572_v61  ;;  %4225 = vmatpush1.bf16.msra.mxu1 %v5575_v62  ;;  %v5667_v61 = vld [vmem:[%s8076_s1 + $0x72c] ss:$16 sps:$4 sm:$0xff]   ;;  %v5662_v62 = vld [vmem:[%s8076_s1 + $0x720] ss:$16 sps:$4 sm:$0xff]  }
  0xb0   : > { %3857 = vmatprep.subr.bf16.mxu0 %v5580_v63  ;;  %4226 = vmatprep.subr.bf16.mxu1 %v5583_v0  ;;  %v5665_v63 = vld [vmem:[%s8076_s1 + $0x728] ss:$16 sps:$4 sm:$0xff]   ;;  %v5670_v0 = vld [vmem:[%s8076_s1 + $0x744] ss:$16 sps:$4 sm:$0xff]  }
  0xb3   : > { %3858 = vmatpush1.bf16.msra.mxu0 %v5578_v1  ;;  %4227 = vmatpush1.bf16.msra.mxu1 %v5581_v2  ;;  %v5673_v1 = vld [vmem:[%s8076_s1 + $0x74c] ss:$16 sps:$4 sm:$0xff]   ;;  %v5668_v2 = vld [vmem:[%s8076_s1 + $0x740] ss:$16 sps:$4 sm:$0xff]  }
  0xb4   : > { %3859 = vmatprep.subr.bf16.mxu0 %v5586_v3  ;;  %4228 = vmatprep.subr.bf16.mxu1 %v5589_v4  ;;  %v5671_v3 = vld [vmem:[%s8076_s1 + $0x748] ss:$16 sps:$4 sm:$0xff]   ;;  %v5676_v4 = vld [vmem:[%s8076_s1 + $0x764] ss:$16 sps:$4 sm:$0xff]  }
  0xb7   : > { %3860 = vmatpush1.bf16.msra.mxu0 %v5584_v5  ;;  %4229 = vmatpush1.bf16.msra.mxu1 %v5587_v6  ;;  %v5679_v5 = vld [vmem:[%s8076_s1 + $0x76c] ss:$16 sps:$4 sm:$0xff]   ;;  %v5674_v6 = vld [vmem:[%s8076_s1 + $0x760] ss:$16 sps:$4 sm:$0xff]  }
  0xb8   : > { %3861 = vmatprep.subr.bf16.mxu0 %v5592_v7  ;;  %4230 = vmatprep.subr.bf16.mxu1 %v5595_v8  ;;  %v5677_v7 = vld [vmem:[%s8076_s1 + $0x768] ss:$16 sps:$4 sm:$0xff]   ;;  %v5682_v8 = vld [vmem:[%s8076_s1 + $0x784] ss:$16 sps:$4 sm:$0xff]  }
  0xbb   : > { %3862 = vmatpush1.bf16.msra.mxu0 %v5590_v9  ;;  %4231 = vmatpush1.bf16.msra.mxu1 %v5593_v10  ;;  %v5685_v9 = vld [vmem:[%s8076_s1 + $0x78c] ss:$16 sps:$4 sm:$0xff]   ;;  %v5680_v10 = vld [vmem:[%s8076_s1 + $0x780] ss:$16 sps:$4 sm:$0xff]  }
  0xbc   : > { %3863 = vmatprep.subr.bf16.mxu0 %v5598_v11  ;;  %4232 = vmatprep.subr.bf16.mxu1 %v5601_v13  ;;  %v5683_v11 = vld [vmem:[%s8076_s1 + $0x788] ss:$16 sps:$4 sm:$0xff]   ;;  %v5688_v13 = vld [vmem:[%s8076_s1 + $0x7a4] ss:$16 sps:$4 sm:$0xff]  }
  0xbf   : > { %3864 = vmatpush1.bf16.msra.mxu0 %v5596_v14  ;;  %4233 = vmatpush1.bf16.msra.mxu1 %v5599_v15  ;;  %v5691_v14 = vld [vmem:[%s8076_s1 + $0x7ac] ss:$16 sps:$4 sm:$0xff]   ;;  %v5686_v15 = vld [vmem:[%s8076_s1 + $0x7a0] ss:$16 sps:$4 sm:$0xff]  }
  0xc0   : > { %3865 = vmatprep.subr.bf16.mxu0 %v5604_v16  ;;  %4234 = vmatprep.subr.bf16.mxu1 %v5607_v17  ;;  %v5689_v16 = vld [vmem:[%s8076_s1 + $0x7a8] ss:$16 sps:$4 sm:$0xff]   ;;  %v5694_v17 = vld [vmem:[%s8076_s1 + $0x7c4] ss:$16 sps:$4 sm:$0xff]  }
  0xc3   : > { %3866 = vmatpush1.bf16.msra.mxu0 %v5602_v20  ;;  %4235 = vmatpush1.bf16.msra.mxu1 %v5605_v21  ;;  %v5692_v20 = vld [vmem:[%s8076_s1 + $0x7c0] ss:$16 sps:$4 sm:$0xff]   ;;  %v5695_v21 = vld [vmem:[%s8076_s1 + $0x7c8] ss:$16 sps:$4 sm:$0xff]  }
  0xc4   : > { %3876 = vmatprep.subr.bf16.mxu0 %v5610_v23  ;;  %4245 = vmatprep.subr.bf16.mxu1 %v5613_v19  ;;  %v5700_v23 = vld [vmem:[%s8076_s1 + $0x7e4] ss:$16 sps:$4 sm:$0xff]   ;;  %v5703_v19 = vld [vmem:[%s8076_s1 + $0x7ec] ss:$16 sps:$4 sm:$0xff]  }
  0xc6   : > { %3868 = vmatmul.mubr.bf16.vlgmr.msra.gmra.mrb[0].mxu0 %v6663_v22  ;;  %4237 = vmatmul.mubr.bf16.vlgmr.msra.gmra.mrb[0].mxu1 %v6663_v22  ;;  %v5625_v22 = vld [vmem:[%s8076_s1 + $0x64c] ss:$16 sps:$4 sm:$0xff]  }
  0xc7   : > { %3877 = vmatpush1.bf16.msra.mxu0 %v5608_v25  ;;  %4246 = vmatpush1.bf16.msra.mxu1 %v5611_v26  ;;  %v5698_v25 = vld [vmem:[%s8076_s1 + $0x7e0] ss:$16 sps:$4 sm:$0xff]  }
  0xc8   : > { %3878 = vmatprep.subr.bf16.mxu0 %v5616_v12  ;;  %4247 = vmatprep.subr.bf16.mxu1 %v5619_v27  ;;  %v7042_v26 = vld [vmem:[%s6376_s30 + $0x10] sm:$0xff]  ;;  %v5701_v12 = vld [vmem:[%s8076_s1 + $0x7e8] ss:$16 sps:$4 sm:$0xff]  }
  0xc9   : > { %3908 = vmatprep.mubr.bf16.mxu0 %v812_v28  ;;  %4277 = vmatprep.mubr.bf16.mxu1 %v812_v28  ;;  %v5707_v27 = vld [vmem:[%s8076_s1 + $0x804] ss:$16 sps:$4 sm:$0xff]   ;;  %v5710_v28 = vld [vmem:[%s8076_s1 + $0x80c] ss:$16 sps:$4 sm:$0xff]  }
  0xcb   : > { %3879 = vmatpush1.bf16.msra.mxu0 %v5614_v29  ;;  %4248 = vmatpush1.bf16.msra.mxu1 %v5617_v30  ;;  %v7055_v29 = vrot.slane %v7042_v26, %v6379_v49  ;;  %v5705_v30 = vld [vmem:[%s8076_s1 + $0x800] ss:$16 sps:$4 sm:$0xff]  }
  0xcc   : > { %3880 = vmatprep.subr.bf16.mxu0 %v5622_v31  ;;  %4249 = vmatprep.subr.bf16.mxu1 %v5625_v22  ;;  %v5708_v31 = vld [vmem:[%s8076_s1 + $0x808] ss:$16 sps:$4 sm:$0xff]   ;;  %v5713_v22 = vld [vmem:[%s8076_s1 + $0x824] ss:$16 sps:$4 sm:$0xff]  }
  0xcf   : > { %3881 = vmatpush1.bf16.msra.mxu0 %v5620_v32  ;;  %4250 = vmatpush1.bf16.msra.mxu1 %v5623_v33  ;;  %v5716_v32 = vld [vmem:[%s8076_s1 + $0x82c] ss:$16 sps:$4 sm:$0xff]   ;;  %v828_v33 = vcombine.high %v7055_v29, %v7055_v29 }
  0xd0   : > { %3882 = vmatprep.subr.bf16.mxu0 %v5628_v34  ;;  %4251 = vmatprep.subr.bf16.mxu1 %v5631_v35  ;;  %v5711_v34 = vld [vmem:[%s8076_s1 + $0x820] ss:$16 sps:$4 sm:$0xff]   ;;  %v5714_v35 = vld [vmem:[%s8076_s1 + $0x828] ss:$16 sps:$4 sm:$0xff]  }
  0xd3   : > { %3883 = vmatpush1.bf16.msra.mxu0 %v5626_v36  ;;  %4252 = vmatpush1.bf16.msra.mxu1 %v5629_v37  ;;  %v5719_v36 = vld [vmem:[%s8076_s1 + $0x844] ss:$16 sps:$4 sm:$0xff]   ;;  %v5717_v37 = vld [vmem:[%s8076_s1 + $0x840] ss:$16 sps:$4 sm:$0xff]  }
  0xd4   : > { %3884 = vmatprep.subr.bf16.mxu0 %v5634_v38  ;;  %4253 = vmatprep.subr.bf16.mxu1 %v5637_v39  ;;  %v5720_v38 = vld [vmem:[%s8076_s1 + $0x848] ss:$16 sps:$4 sm:$0xff]   ;;  %v5725_v39 = vld [vmem:[%s8076_s1 + $0x864] ss:$16 sps:$4 sm:$0xff]  }
  0xd7   : > { %3885 = vmatpush1.bf16.msra.mxu0 %v5632_v40  ;;  %4254 = vmatpush1.bf16.msra.mxu1 %v5635_v41  ;;  %v5728_v40 = vld [vmem:[%s8076_s1 + $0x86c] ss:$16 sps:$4 sm:$0xff]   ;;  %v5723_v41 = vld [vmem:[%s8076_s1 + $0x860] ss:$16 sps:$4 sm:$0xff]  }
  0xd8   : > { %3886 = vmatprep.subr.bf16.mxu0 %v5640_v43  ;;  %4255 = vmatprep.subr.bf16.mxu1 %v5643_v44  ;;  %v5726_v43 = vld [vmem:[%s8076_s1 + $0x868] ss:$16 sps:$4 sm:$0xff]   ;;  %v5731_v44 = vld [vmem:[%s8076_s1 + $0x884] ss:$16 sps:$4 sm:$0xff]  }
  0xdb   : > { %3887 = vmatpush1.bf16.msra.mxu0 %v5638_v45  ;;  %4256 = vmatpush1.bf16.msra.mxu1 %v5641_v46  ;;  %v5734_v45 = vld [vmem:[%s8076_s1 + $0x88c] ss:$16 sps:$4 sm:$0xff]   ;;  %v5729_v46 = vld [vmem:[%s8076_s1 + $0x880] ss:$16 sps:$4 sm:$0xff]  }
  0xdc   : > { %3888 = vmatprep.subr.bf16.mxu0 %v5646_v47  ;;  %4257 = vmatprep.subr.bf16.mxu1 %v5649_v48  ;;  %v5732_v47 = vld [vmem:[%s8076_s1 + $0x888] ss:$16 sps:$4 sm:$0xff]   ;;  %v5737_v48 = vld [vmem:[%s8076_s1 + $0x8a4] ss:$16 sps:$4 sm:$0xff]  }
  0xdf   : > { %3889 = vmatpush1.bf16.msra.mxu0 %v5644_v50  ;;  %4258 = vmatpush1.bf16.msra.mxu1 %v5647_v51  ;;  %v5740_v50 = vld [vmem:[%s8076_s1 + $0x8ac] ss:$16 sps:$4 sm:$0xff]   ;;  %v5735_v51 = vld [vmem:[%s8076_s1 + $0x8a0] ss:$16 sps:$4 sm:$0xff]  }
  0xe0   : > { %3890 = vmatprep.subr.bf16.mxu0 %v5652_v52  ;;  %4259 = vmatprep.subr.bf16.mxu1 %v5655_v53  ;;  %v5738_v52 = vld [vmem:[%s8076_s1 + $0x8a8] ss:$16 sps:$4 sm:$0xff]   ;;  %v5743_v53 = vld [vmem:[%s8076_s1 + $0x8c4] ss:$16 sps:$4 sm:$0xff]  }
  0xe3   : > { %3891 = vmatpush1.bf16.msra.mxu0 %v5650_v54  ;;  %4260 = vmatpush1.bf16.msra.mxu1 %v5653_v55  ;;  %v5746_v54 = vld [vmem:[%s8076_s1 + $0x8cc] ss:$16 sps:$4 sm:$0xff]   ;;  %v5741_v55 = vld [vmem:[%s8076_s1 + $0x8c0] ss:$16 sps:$4 sm:$0xff]  }
  0xe4   : > { %3892 = vmatprep.subr.bf16.mxu0 %v5658_v56  ;;  %4261 = vmatprep.subr.bf16.mxu1 %v5661_v57  ;;  %v5744_v56 = vld [vmem:[%s8076_s1 + $0x8c8] ss:$16 sps:$4 sm:$0xff]   ;;  %v5749_v57 = vld [vmem:[%s8076_s1 + $0x8e4] ss:$16 sps:$4 sm:$0xff]  }
  0xe7   : > { %3893 = vmatpush1.bf16.msra.mxu0 %v5656_v58  ;;  %4262 = vmatpush1.bf16.msra.mxu1 %v5659_v59  ;;  %v5752_v58 = vld [vmem:[%s8076_s1 + $0x8ec] ss:$16 sps:$4 sm:$0xff]   ;;  %v5747_v59 = vld [vmem:[%s8076_s1 + $0x8e0] ss:$16 sps:$4 sm:$0xff]  }
  0xe8   : > { %3894 = vmatprep.subr.bf16.mxu0 %v5664_v60  ;;  %4263 = vmatprep.subr.bf16.mxu1 %v5667_v61  ;;  %v5750_v60 = vld [vmem:[%s8076_s1 + $0x8e8] ss:$16 sps:$4 sm:$0xff]   ;;  %v5755_v61 = vld [vmem:[%s8076_s1 + $0x904] ss:$16 sps:$4 sm:$0xff]  }
  0xeb   : > { %3895 = vmatpush1.bf16.msra.mxu0 %v5662_v62  ;;  %4264 = vmatpush1.bf16.msra.mxu1 %v5665_v63  ;;  %v5758_v62 = vld [vmem:[%s8076_s1 + $0x90c] ss:$16 sps:$4 sm:$0xff]   ;;  %v5753_v63 = vld [vmem:[%s8076_s1 + $0x900] ss:$16 sps:$4 sm:$0xff]  }
  0xec   : > { %3896 = vmatprep.subr.bf16.mxu0 %v5670_v0  ;;  %4265 = vmatprep.subr.bf16.mxu1 %v5673_v1  ;;  %v5756_v0 = vld [vmem:[%s8076_s1 + $0x908] ss:$16 sps:$4 sm:$0xff]   ;;  %v5761_v1 = vld [vmem:[%s8076_s1 + $0x924] ss:$16 sps:$4 sm:$0xff]  }
  0xef   : > { %3897 = vmatpush1.bf16.msra.mxu0 %v5668_v2  ;;  %4266 = vmatpush1.bf16.msra.mxu1 %v5671_v3  ;;  %v5764_v2 = vld [vmem:[%s8076_s1 + $0x92c] ss:$16 sps:$4 sm:$0xff]   ;;  %v5759_v3 = vld [vmem:[%s8076_s1 + $0x920] ss:$16 sps:$4 sm:$0xff]  }
  0xf0   : > { %3898 = vmatprep.subr.bf16.mxu0 %v5676_v4  ;;  %4267 = vmatprep.subr.bf16.mxu1 %v5679_v5  ;;  %v5762_v4 = vld [vmem:[%s8076_s1 + $0x928] ss:$16 sps:$4 sm:$0xff]   ;;  %v5767_v5 = vld [vmem:[%s8076_s1 + $0x944] ss:$16 sps:$4 sm:$0xff]  }
  0xf3   : > { %3899 = vmatpush1.bf16.msra.mxu0 %v5674_v6  ;;  %4268 = vmatpush1.bf16.msra.mxu1 %v5677_v7  ;;  %v5770_v6 = vld [vmem:[%s8076_s1 + $0x94c] ss:$16 sps:$4 sm:$0xff]   ;;  %v5765_v7 = vld [vmem:[%s8076_s1 + $0x940] ss:$16 sps:$4 sm:$0xff]  }
  0xf4   : > { %3900 = vmatprep.subr.bf16.mxu0 %v5682_v8  ;;  %4269 = vmatprep.subr.bf16.mxu1 %v5685_v9  ;;  %v5768_v8 = vld [vmem:[%s8076_s1 + $0x948] ss:$16 sps:$4 sm:$0xff]   ;;  %v5773_v9 = vld [vmem:[%s8076_s1 + $0x964] ss:$16 sps:$4 sm:$0xff]  }
  0xf7   : > { %3901 = vmatpush1.bf16.msra.mxu0 %v5680_v10  ;;  %4270 = vmatpush1.bf16.msra.mxu1 %v5683_v11  ;;  %v5776_v10 = vld [vmem:[%s8076_s1 + $0x96c] ss:$16 sps:$4 sm:$0xff]   ;;  %v5771_v11 = vld [vmem:[%s8076_s1 + $0x960] ss:$16 sps:$4 sm:$0xff]  }
  0xf8   : > { %3902 = vmatprep.subr.bf16.mxu0 %v5688_v13  ;;  %4271 = vmatprep.subr.bf16.mxu1 %v5691_v14  ;;  %v5774_v13 = vld [vmem:[%s8076_s1 + $0x968] ss:$16 sps:$4 sm:$0xff]   ;;  %v5779_v14 = vld [vmem:[%s8076_s1 + $0x984] ss:$16 sps:$4 sm:$0xff]  }
  0xfb   : > { %3903 = vmatpush1.bf16.msra.mxu0 %v5686_v15  ;;  %4272 = vmatpush1.bf16.msra.mxu1 %v5689_v16  ;;  %v5782_v15 = vld [vmem:[%s8076_s1 + $0x98c] ss:$16 sps:$4 sm:$0xff]   ;;  %v5777_v16 = vld [vmem:[%s8076_s1 + $0x980] ss:$16 sps:$4 sm:$0xff]  }
  0xfc   : > { %3904 = vmatprep.subr.bf16.mxu0 %v5694_v17  ;;  %4273 = vmatprep.subr.bf16.mxu1 %v5697_v18  ;;  %v5780_v17 = vld [vmem:[%s8076_s1 + $0x988] ss:$16 sps:$4 sm:$0xff]   ;;  %v5785_v18 = vld [vmem:[%s8076_s1 + $0x9a4] ss:$16 sps:$4 sm:$0xff]  }
  0xff   : > { %3905 = vmatpush1.bf16.msra.mxu0 %v5692_v20  ;;  %4274 = vmatpush1.bf16.msra.mxu1 %v5695_v21  ;;  %v5788_v20 = vld [vmem:[%s8076_s1 + $0x9ac] ss:$16 sps:$4 sm:$0xff]   ;;  %v5783_v21 = vld [vmem:[%s8076_s1 + $0x9a0] ss:$16 sps:$4 sm:$0xff]  }
 0x100   : > { %3906 = vmatprep.subr.bf16.mxu0 %v5700_v23  ;;  %4275 = vmatprep.subr.bf16.mxu1 %v5703_v19  ;;  %v5786_v23 = vld [vmem:[%s8076_s1 + $0x9a8] ss:$16 sps:$4 sm:$0xff]   ;;  %v5791_v19 = vld [vmem:[%s8076_s1 + $0x9c4] ss:$16 sps:$4 sm:$0xff]  }
 0x103   : > { %3907 = vmatpush1.bf16.msra.mxu0 %v5698_v25  ;;  %4276 = vmatpush1.bf16.msra.mxu1 %v5701_v12  ;;  %v5794_v25 = vld [vmem:[%s8076_s1 + $0x9cc] ss:$16 sps:$4 sm:$0xff]   ;;  %v5789_v12 = vld [vmem:[%s8076_s1 + $0x9c0] ss:$16 sps:$4 sm:$0xff]  }
 0x104   : > { %3917 = vmatprep.subr.bf16.mxu0 %v5707_v27  ;;  %4286 = vmatprep.subr.bf16.mxu1 %v5710_v28  ;;  %v5792_v27 = vld [vmem:[%s8076_s1 + $0x9c8] ss:$16 sps:$4 sm:$0xff]   ;;  %v5797_v28 = vld [vmem:[%s8076_s1 + $0x9e4] ss:$16 sps:$4 sm:$0xff]  }
 0x106   : > { %3909 = vmatmul.mubr.bf16.vlgmr.msra.gmra.mrb[0].mxu0 %v6852_v24  ;;  %4278 = vmatmul.mubr.bf16.vlgmr.msra.gmra.mrb[0].mxu1 %v6852_v24  ;;  %v5722_v24 = vld [vmem:[%s8076_s1 + $0x84c] ss:$16 sps:$4 sm:$0xff]  }
 0x107   : > { %3918 = vmatpush1.bf16.msra.mxu0 %v5705_v30  ;;  %4287 = vmatpush1.bf16.msra.mxu1 %v5708_v31  ;;  %v5800_v30 = vld [vmem:[%s8076_s1 + $0x9ec] ss:$16 sps:$4 sm:$0xff]   ;;  %v813_v31 = vcombine.high %v7042_v26, %v7042_v26 }
 0x108   : > { %3919 = vmatprep.subr.bf16.mxu0 %v5713_v22  ;;  %4288 = vmatprep.subr.bf16.mxu1 %v5716_v32  ;;  %v5795_v22 = vld [vmem:[%s8076_s1 + $0x9e0] ss:$16 sps:$4 sm:$0xff]   ;;  %v5798_v32 = vld [vmem:[%s8076_s1 + $0x9e8] ss:$16 sps:$4 sm:$0xff]   ;;  %v5806_v26 = vld [vmem:[%s8076_s1 + $0xa0c] ss:$16 sps:$4 sm:$0xff]  }
 0x109   : > { %3949 = vmatprep.mubr.bf16.mxu0 %v828_v33  ;;  %4318 = vmatprep.mubr.bf16.mxu1 %v828_v33  ;;  %v5803_v33 = vld [vmem:[%s8076_s1 + $0xa04] ss:$16 sps:$4 sm:$0xff]  }
 0x10b   : > { %3920 = vmatpush1.bf16.msra.mxu0 %v5711_v34  ;;  %4289 = vmatpush1.bf16.msra.mxu1 %v5714_v35  ;;  %v7256_v34 = vrot.slane %v813_v31, %v6379_v49  ;;  %v5801_v35 = vld [vmem:[%s8076_s1 + $0xa00] ss:$16 sps:$4 sm:$0xff]   ;;  %v5890_v31 = vld [vmem:[%s8076_s1 + $0xbcc] ss:$16 sps:$4 sm:$0xff]  }
 0x10c   : > { %3921 = vmatprep.subr.bf16.mxu0 %v5719_v36  ;;  %4290 = vmatprep.subr.bf16.mxu1 %v5722_v24  ;;  %v5804_v36 = vld [vmem:[%s8076_s1 + $0xa08] ss:$16 sps:$4 sm:$0xff]   ;;  %v5809_v24 = vld [vmem:[%s8076_s1 + $0xa24] ss:$16 sps:$4 sm:$0xff]  }
 0x10f   : > { %3922 = vmatpush1.bf16.msra.mxu0 %v5717_v37  ;;  %4291 = vmatpush1.bf16.msra.mxu1 %v5720_v38  ;;  %v5812_v37 = vld [vmem:[%s8076_s1 + $0xa2c] ss:$16 sps:$4 sm:$0xff]   ;;  %v829_v38 = vcombine.high %v7256_v34, %v7256_v34 }
 0x110   : > { %3923 = vmatprep.subr.bf16.mxu0 %v5725_v39  ;;  %4292 = vmatprep.subr.bf16.mxu1 %v5728_v40  ;;  %v5807_v39 = vld [vmem:[%s8076_s1 + $0xa20] ss:$16 sps:$4 sm:$0xff]   ;;  %v5810_v40 = vld [vmem:[%s8076_s1 + $0xa28] ss:$16 sps:$4 sm:$0xff]  }
 0x113   : > { %3924 = vmatpush1.bf16.msra.mxu0 %v5723_v41  ;;  %4293 = vmatpush1.bf16.msra.mxu1 %v5726_v43  ;;  %v5815_v41 = vld [vmem:[%s8076_s1 + $0xa44] ss:$16 sps:$4 sm:$0xff]   ;;  %v5813_v43 = vld [vmem:[%s8076_s1 + $0xa40] ss:$16 sps:$4 sm:$0xff]  }
 0x114   : > { %3925 = vmatprep.subr.bf16.mxu0 %v5731_v44  ;;  %4294 = vmatprep.subr.bf16.mxu1 %v5734_v45  ;;  %v5816_v44 = vld [vmem:[%s8076_s1 + $0xa48] ss:$16 sps:$4 sm:$0xff]   ;;  %v5821_v45 = vld [vmem:[%s8076_s1 + $0xa64] ss:$16 sps:$4 sm:$0xff]  }
 0x117   : > { %3926 = vmatpush1.bf16.msra.mxu0 %v5729_v46  ;;  %4295 = vmatpush1.bf16.msra.mxu1 %v5732_v47  ;;  %v5824_v46 = vld [vmem:[%s8076_s1 + $0xa6c] ss:$16 sps:$4 sm:$0xff]   ;;  %v5819_v47 = vld [vmem:[%s8076_s1 + $0xa60] ss:$16 sps:$4 sm:$0xff]  }
 0x118   : > { %3927 = vmatprep.subr.bf16.mxu0 %v5737_v48  ;;  %4296 = vmatprep.subr.bf16.mxu1 %v5740_v50  ;;  %v5822_v48 = vld [vmem:[%s8076_s1 + $0xa68] ss:$16 sps:$4 sm:$0xff]   ;;  %v5827_v50 = vld [vmem:[%s8076_s1 + $0xa84] ss:$16 sps:$4 sm:$0xff]  }
 0x11b   : > { %3928 = vmatpush1.bf16.msra.mxu0 %v5735_v51  ;;  %4297 = vmatpush1.bf16.msra.mxu1 %v5738_v52  ;;  %v5830_v51 = vld [vmem:[%s8076_s1 + $0xa8c] ss:$16 sps:$4 sm:$0xff]   ;;  %v5825_v52 = vld [vmem:[%s8076_s1 + $0xa80] ss:$16 sps:$4 sm:$0xff]  }
 0x11c   : > { %3929 = vmatprep.subr.bf16.mxu0 %v5743_v53  ;;  %4298 = vmatprep.subr.bf16.mxu1 %v5746_v54  ;;  %v5828_v53 = vld [vmem:[%s8076_s1 + $0xa88] ss:$16 sps:$4 sm:$0xff]   ;;  %v5833_v54 = vld [vmem:[%s8076_s1 + $0xaa4] ss:$16 sps:$4 sm:$0xff]  }
 0x11f   : > { %3930 = vmatpush1.bf16.msra.mxu0 %v5741_v55  ;;  %4299 = vmatpush1.bf16.msra.mxu1 %v5744_v56  ;;  %v5836_v55 = vld [vmem:[%s8076_s1 + $0xaac] ss:$16 sps:$4 sm:$0xff]   ;;  %v5831_v56 = vld [vmem:[%s8076_s1 + $0xaa0] ss:$16 sps:$4 sm:$0xff]  }
 0x120   : > { %3931 = vmatprep.subr.bf16.mxu0 %v5749_v57  ;;  %4300 = vmatprep.subr.bf16.mxu1 %v5752_v58  ;;  %v5834_v57 = vld [vmem:[%s8076_s1 + $0xaa8] ss:$16 sps:$4 sm:$0xff]   ;;  %v5839_v58 = vld [vmem:[%s8076_s1 + $0xac4] ss:$16 sps:$4 sm:$0xff]  }
 0x123   : > { %3932 = vmatpush1.bf16.msra.mxu0 %v5747_v59  ;;  %4301 = vmatpush1.bf16.msra.mxu1 %v5750_v60  ;;  %v5842_v59 = vld [vmem:[%s8076_s1 + $0xacc] ss:$16 sps:$4 sm:$0xff]   ;;  %v5837_v60 = vld [vmem:[%s8076_s1 + $0xac0] ss:$16 sps:$4 sm:$0xff]  }
 0x124   : > { %3933 = vmatprep.subr.bf16.mxu0 %v5755_v61  ;;  %4302 = vmatprep.subr.bf16.mxu1 %v5758_v62  ;;  %v5840_v61 = vld [vmem:[%s8076_s1 + $0xac8] ss:$16 sps:$4 sm:$0xff]   ;;  %v5845_v62 = vld [vmem:[%s8076_s1 + $0xae4] ss:$16 sps:$4 sm:$0xff]  }
 0x127   : > { %3934 = vmatpush1.bf16.msra.mxu0 %v5753_v63  ;;  %4303 = vmatpush1.bf16.msra.mxu1 %v5756_v0  ;;  %v5848_v63 = vld [vmem:[%s8076_s1 + $0xaec] ss:$16 sps:$4 sm:$0xff]   ;;  %v5843_v0 = vld [vmem:[%s8076_s1 + $0xae0] ss:$16 sps:$4 sm:$0xff]  }
 0x128   : > { %3935 = vmatprep.subr.bf16.mxu0 %v5761_v1  ;;  %4304 = vmatprep.subr.bf16.mxu1 %v5764_v2  ;;  %v5846_v1 = vld [vmem:[%s8076_s1 + $0xae8] ss:$16 sps:$4 sm:$0xff]   ;;  %v5851_v2 = vld [vmem:[%s8076_s1 + $0xb04] ss:$16 sps:$4 sm:$0xff]  }
 0x12b   : > { %3936 = vmatpush1.bf16.msra.mxu0 %v5759_v3  ;;  %4305 = vmatpush1.bf16.msra.mxu1 %v5762_v4  ;;  %v5854_v3 = vld [vmem:[%s8076_s1 + $0xb0c] ss:$16 sps:$4 sm:$0xff]   ;;  %v5849_v4 = vld [vmem:[%s8076_s1 + $0xb00] ss:$16 sps:$4 sm:$0xff]  }
 0x12c   : > { %3937 = vmatprep.subr.bf16.mxu0 %v5767_v5  ;;  %4306 = vmatprep.subr.bf16.mxu1 %v5770_v6  ;;  %v5852_v5 = vld [vmem:[%s8076_s1 + $0xb08] ss:$16 sps:$4 sm:$0xff]   ;;  %v5857_v6 = vld [vmem:[%s8076_s1 + $0xb24] ss:$16 sps:$4 sm:$0xff]  }
 0x12f   : > { %3938 = vmatpush1.bf16.msra.mxu0 %v5765_v7  ;;  %4307 = vmatpush1.bf16.msra.mxu1 %v5768_v8  ;;  %v5860_v7 = vld [vmem:[%s8076_s1 + $0xb2c] ss:$16 sps:$4 sm:$0xff]   ;;  %v5855_v8 = vld [vmem:[%s8076_s1 + $0xb20] ss:$16 sps:$4 sm:$0xff]  }
 0x130   : > { %3939 = vmatprep.subr.bf16.mxu0 %v5773_v9  ;;  %4308 = vmatprep.subr.bf16.mxu1 %v5776_v10  ;;  %v5858_v9 = vld [vmem:[%s8076_s1 + $0xb28] ss:$16 sps:$4 sm:$0xff]   ;;  %v5863_v10 = vld [vmem:[%s8076_s1 + $0xb44] ss:$16 sps:$4 sm:$0xff]  }
 0x133   : > { %3940 = vmatpush1.bf16.msra.mxu0 %v5771_v11  ;;  %4309 = vmatpush1.bf16.msra.mxu1 %v5774_v13  ;;  %v5866_v11 = vld [vmem:[%s8076_s1 + $0xb4c] ss:$16 sps:$4 sm:$0xff]   ;;  %v5861_v13 = vld [vmem:[%s8076_s1 + $0xb40] ss:$16 sps:$4 sm:$0xff]  }
 0x134   : > { %3941 = vmatprep.subr.bf16.mxu0 %v5779_v14  ;;  %4310 = vmatprep.subr.bf16.mxu1 %v5782_v15  ;;  %v5864_v14 = vld [vmem:[%s8076_s1 + $0xb48] ss:$16 sps:$4 sm:$0xff]   ;;  %v5869_v15 = vld [vmem:[%s8076_s1 + $0xb64] ss:$16 sps:$4 sm:$0xff]  }
 0x137   : > { %3942 = vmatpush1.bf16.msra.mxu0 %v5777_v16  ;;  %4311 = vmatpush1.bf16.msra.mxu1 %v5780_v17  ;;  %v5872_v16 = vld [vmem:[%s8076_s1 + $0xb6c] ss:$16 sps:$4 sm:$0xff]   ;;  %v5867_v17 = vld [vmem:[%s8076_s1 + $0xb60] ss:$16 sps:$4 sm:$0xff]  }
 0x138   : > { %3943 = vmatprep.subr.bf16.mxu0 %v5785_v18  ;;  %4312 = vmatprep.subr.bf16.mxu1 %v5788_v20  ;;  %v5870_v18 = vld [vmem:[%s8076_s1 + $0xb68] ss:$16 sps:$4 sm:$0xff]   ;;  %v5875_v20 = vld [vmem:[%s8076_s1 + $0xb84] ss:$16 sps:$4 sm:$0xff]  }
 0x13b   : > { %3944 = vmatpush1.bf16.msra.mxu0 %v5783_v21  ;;  %4313 = vmatpush1.bf16.msra.mxu1 %v5786_v23  ;;  %v5878_v21 = vld [vmem:[%s8076_s1 + $0xb8c] ss:$16 sps:$4 sm:$0xff]   ;;  %v5873_v23 = vld [vmem:[%s8076_s1 + $0xb80] ss:$16 sps:$4 sm:$0xff]  }
 0x13c   : > { %3945 = vmatprep.subr.bf16.mxu0 %v5791_v19  ;;  %4314 = vmatprep.subr.bf16.mxu1 %v5794_v25  ;;  %v5876_v19 = vld [vmem:[%s8076_s1 + $0xb88] ss:$16 sps:$4 sm:$0xff]   ;;  %v5881_v25 = vld [vmem:[%s8076_s1 + $0xba4] ss:$16 sps:$4 sm:$0xff]  }
 0x13f   : > { %3946 = vmatpush1.bf16.msra.mxu0 %v5789_v12  ;;  %4315 = vmatpush1.bf16.msra.mxu1 %v5792_v27  ;;  %v5884_v12 = vld [vmem:[%s8076_s1 + $0xbac] ss:$16 sps:$4 sm:$0xff]   ;;  %v5879_v27 = vld [vmem:[%s8076_s1 + $0xba0] ss:$16 sps:$4 sm:$0xff]  }
 0x140   : > { %3947 = vmatprep.subr.bf16.mxu0 %v5797_v28  ;;  %4316 = vmatprep.subr.bf16.mxu1 %v5800_v30  ;;  %v5882_v28 = vld [vmem:[%s8076_s1 + $0xba8] ss:$16 sps:$4 sm:$0xff]   ;;  %v5887_v30 = vld [vmem:[%s8076_s1 + $0xbc4] ss:$16 sps:$4 sm:$0xff]  }
 0x143   : > { %3948 = vmatpush1.bf16.msra.mxu0 %v5795_v22  ;;  %4317 = vmatpush1.bf16.msra.mxu1 %v5798_v32  ;;  %v5885_v22 = vld [vmem:[%s8076_s1 + $0xbc0] ss:$16 sps:$4 sm:$0xff]   ;;  %v5888_v32 = vld [vmem:[%s8076_s1 + $0xbc8] ss:$16 sps:$4 sm:$0xff]  }
 0x144   : > { %3958 = vmatprep.subr.bf16.mxu0 %v5803_v33  ;;  %4327 = vmatprep.subr.bf16.mxu1 %v5806_v26  ;;  %v5893_v33 = vld [vmem:[%s8076_s1 + $0xbe4] ss:$16 sps:$4 sm:$0xff]   ;;  %v5896_v26 = vld [vmem:[%s8076_s1 + $0xbec] ss:$16 sps:$4 sm:$0xff]  }
 0x146   : > { %3950 = vmatmul.mubr.bf16.vlgmr.msra.gmra.mrb[0].mxu0 %v7055_v29  ;;  %4319 = vmatmul.mubr.bf16.vlgmr.msra.gmra.mrb[0].mxu1 %v7055_v29  ;;  %v5818_v29 = vld [vmem:[%s8076_s1 + $0xa4c] ss:$16 sps:$4 sm:$0xff]  }
 0x147   : > { %3959 = vmatpush1.bf16.msra.mxu0 %v5801_v35  ;;  %4328 = vmatpush1.bf16.msra.mxu1 %v5804_v36  ;;  %v7443_v35 = vld [vmem:[%s6376_s30 + $0x18] sm:$0xff]  ;;  %v5891_v36 = vld [vmem:[%s8076_s1 + $0xbe0] ss:$16 sps:$4 sm:$0xff]  }
 0x148   : > { %3960 = vmatprep.subr.bf16.mxu0 %v5809_v24  ;;  %4329 = vmatprep.subr.bf16.mxu1 %v5812_v37  ;;  %v5894_v24 = vld [vmem:[%s8076_s1 + $0xbe8] ss:$16 sps:$4 sm:$0xff]   ;;  %v5900_v37 = vld [vmem:[%s8076_s1 + $0xc04] ss:$16 sps:$4 sm:$0xff]  }
 0x149   : > { %3990 = vmatprep.mubr.bf16.mxu0 %v829_v38  ;;  %4359 = vmatprep.mubr.bf16.mxu1 %v829_v38  ;;  %v5903_v38 = vld [vmem:[%s8076_s1 + $0xc0c] ss:$16 sps:$4 sm:$0xff]  }
 0x14b   : > { %3961 = vmatpush1.bf16.msra.mxu0 %v5807_v39  ;;  %4330 = vmatpush1.bf16.msra.mxu1 %v5810_v40  ;;  %v7459_v39 = vrot.slane %v7443_v35, %v6379_v49  ;;  %v5898_v40 = vld [vmem:[%s8076_s1 + $0xc00] ss:$16 sps:$4 sm:$0xff]  }
 0x14c   : > { %3962 = vmatprep.subr.bf16.mxu0 %v5815_v41  ;;  %4331 = vmatprep.subr.bf16.mxu1 %v5818_v29  ;;  %v5901_v41 = vld [vmem:[%s8076_s1 + $0xc08] ss:$16 sps:$4 sm:$0xff]   ;;  %v5906_v29 = vld [vmem:[%s8076_s1 + $0xc24] ss:$16 sps:$4 sm:$0xff]  }
 0x14f   : > { %3963 = vmatpush1.bf16.msra.mxu0 %v5813_v43  ;;  %4332 = vmatpush1.bf16.msra.mxu1 %v5816_v44  ;;  %v5909_v43 = vld [vmem:[%s8076_s1 + $0xc2c] ss:$16 sps:$4 sm:$0xff]   ;;  %v845_v44 = vcombine.high %v7459_v39, %v7459_v39 }
 0x150   : > { %3964 = vmatprep.subr.bf16.mxu0 %v5821_v45  ;;  %4333 = vmatprep.subr.bf16.mxu1 %v5824_v46  ;;  %v5904_v45 = vld [vmem:[%s8076_s1 + $0xc20] ss:$16 sps:$4 sm:$0xff]   ;;  %v5907_v46 = vld [vmem:[%s8076_s1 + $0xc28] ss:$16 sps:$4 sm:$0xff]  }
 0x153   : > { %3965 = vmatpush1.bf16.msra.mxu0 %v5819_v47  ;;  %4334 = vmatpush1.bf16.msra.mxu1 %v5822_v48  ;;  %v5912_v47 = vld [vmem:[%s8076_s1 + $0xc44] ss:$16 sps:$4 sm:$0xff]   ;;  %v5910_v48 = vld [vmem:[%s8076_s1 + $0xc40] ss:$16 sps:$4 sm:$0xff]  }
 0x154   : > { %3966 = vmatprep.subr.bf16.mxu0 %v5827_v50  ;;  %4335 = vmatprep.subr.bf16.mxu1 %v5830_v51  ;;  %v5913_v50 = vld [vmem:[%s8076_s1 + $0xc48] ss:$16 sps:$4 sm:$0xff]   ;;  %v5918_v51 = vld [vmem:[%s8076_s1 + $0xc64] ss:$16 sps:$4 sm:$0xff]  }
 0x157   : > { %3967 = vmatpush1.bf16.msra.mxu0 %v5825_v52  ;;  %4336 = vmatpush1.bf16.msra.mxu1 %v5828_v53  ;;  %v5921_v52 = vld [vmem:[%s8076_s1 + $0xc6c] ss:$16 sps:$4 sm:$0xff]   ;;  %v5916_v53 = vld [vmem:[%s8076_s1 + $0xc60] ss:$16 sps:$4 sm:$0xff]  }
 0x158   : > { %3968 = vmatprep.subr.bf16.mxu0 %v5833_v54  ;;  %4337 = vmatprep.subr.bf16.mxu1 %v5836_v55  ;;  %v5919_v54 = vld [vmem:[%s8076_s1 + $0xc68] ss:$16 sps:$4 sm:$0xff]   ;;  %v5924_v55 = vld [vmem:[%s8076_s1 + $0xc84] ss:$16 sps:$4 sm:$0xff]  }
 0x15b   : > { %3969 = vmatpush1.bf16.msra.mxu0 %v5831_v56  ;;  %4338 = vmatpush1.bf16.msra.mxu1 %v5834_v57  ;;  %v5927_v56 = vld [vmem:[%s8076_s1 + $0xc8c] ss:$16 sps:$4 sm:$0xff]   ;;  %v5922_v57 = vld [vmem:[%s8076_s1 + $0xc80] ss:$16 sps:$4 sm:$0xff]  }
 0x15c   : > { %3970 = vmatprep.subr.bf16.mxu0 %v5839_v58  ;;  %4339 = vmatprep.subr.bf16.mxu1 %v5842_v59  ;;  %v5925_v58 = vld [vmem:[%s8076_s1 + $0xc88] ss:$16 sps:$4 sm:$0xff]   ;;  %v5930_v59 = vld [vmem:[%s8076_s1 + $0xca4] ss:$16 sps:$4 sm:$0xff]  }
 0x15f   : > { %3971 = vmatpush1.bf16.msra.mxu0 %v5837_v60  ;;  %4340 = vmatpush1.bf16.msra.mxu1 %v5840_v61  ;;  %v5933_v60 = vld [vmem:[%s8076_s1 + $0xcac] ss:$16 sps:$4 sm:$0xff]   ;;  %v5928_v61 = vld [vmem:[%s8076_s1 + $0xca0] ss:$16 sps:$4 sm:$0xff]  }
 0x160   : > { %3972 = vmatprep.subr.bf16.mxu0 %v5845_v62  ;;  %4341 = vmatprep.subr.bf16.mxu1 %v5848_v63  ;;  %v5931_v62 = vld [vmem:[%s8076_s1 + $0xca8] ss:$16 sps:$4 sm:$0xff]   ;;  %v5936_v63 = vld [vmem:[%s8076_s1 + $0xcc4] ss:$16 sps:$4 sm:$0xff]  }
 0x163   : > { %3973 = vmatpush1.bf16.msra.mxu0 %v5843_v0  ;;  %4342 = vmatpush1.bf16.msra.mxu1 %v5846_v1  ;;  %v5939_v0 = vld [vmem:[%s8076_s1 + $0xccc] ss:$16 sps:$4 sm:$0xff]   ;;  %v5934_v1 = vld [vmem:[%s8076_s1 + $0xcc0] ss:$16 sps:$4 sm:$0xff]  }
 0x164   : > { %3974 = vmatprep.subr.bf16.mxu0 %v5851_v2  ;;  %4343 = vmatprep.subr.bf16.mxu1 %v5854_v3  ;;  %v5937_v2 = vld [vmem:[%s8076_s1 + $0xcc8] ss:$16 sps:$4 sm:$0xff]   ;;  %v5942_v3 = vld [vmem:[%s8076_s1 + $0xce4] ss:$16 sps:$4 sm:$0xff]  }
 0x167   : > { %3975 = vmatpush1.bf16.msra.mxu0 %v5849_v4  ;;  %4344 = vmatpush1.bf16.msra.mxu1 %v5852_v5  ;;  %v5945_v4 = vld [vmem:[%s8076_s1 + $0xcec] ss:$16 sps:$4 sm:$0xff]   ;;  %v5940_v5 = vld [vmem:[%s8076_s1 + $0xce0] ss:$16 sps:$4 sm:$0xff]  }
 0x168   : > { %3976 = vmatprep.subr.bf16.mxu0 %v5857_v6  ;;  %4345 = vmatprep.subr.bf16.mxu1 %v5860_v7  ;;  %v5943_v6 = vld [vmem:[%s8076_s1 + $0xce8] ss:$16 sps:$4 sm:$0xff]   ;;  %v5948_v7 = vld [vmem:[%s8076_s1 + $0xd04] ss:$16 sps:$4 sm:$0xff]  }
 0x16b   : > { %3977 = vmatpush1.bf16.msra.mxu0 %v5855_v8  ;;  %4346 = vmatpush1.bf16.msra.mxu1 %v5858_v9  ;;  %v5951_v8 = vld [vmem:[%s8076_s1 + $0xd0c] ss:$16 sps:$4 sm:$0xff]   ;;  %v5946_v9 = vld [vmem:[%s8076_s1 + $0xd00] ss:$16 sps:$4 sm:$0xff]  }
 0x16c   : > { %3978 = vmatprep.subr.bf16.mxu0 %v5863_v10  ;;  %4347 = vmatprep.subr.bf16.mxu1 %v5866_v11  ;;  %v5949_v10 = vld [vmem:[%s8076_s1 + $0xd08] ss:$16 sps:$4 sm:$0xff]   ;;  %v5954_v11 = vld [vmem:[%s8076_s1 + $0xd24] ss:$16 sps:$4 sm:$0xff]  }
 0x16f   : > { %3979 = vmatpush1.bf16.msra.mxu0 %v5861_v13  ;;  %4348 = vmatpush1.bf16.msra.mxu1 %v5864_v14  ;;  %v5957_v13 = vld [vmem:[%s8076_s1 + $0xd2c] ss:$16 sps:$4 sm:$0xff]   ;;  %v5952_v14 = vld [vmem:[%s8076_s1 + $0xd20] ss:$16 sps:$4 sm:$0xff]  }
 0x170   : > { %3980 = vmatprep.subr.bf16.mxu0 %v5869_v15  ;;  %4349 = vmatprep.subr.bf16.mxu1 %v5872_v16  ;;  %v5955_v15 = vld [vmem:[%s8076_s1 + $0xd28] ss:$16 sps:$4 sm:$0xff]   ;;  %v5960_v16 = vld [vmem:[%s8076_s1 + $0xd44] ss:$16 sps:$4 sm:$0xff]  }
 0x173   : > { %3981 = vmatpush1.bf16.msra.mxu0 %v5867_v17  ;;  %4350 = vmatpush1.bf16.msra.mxu1 %v5870_v18  ;;  %v5963_v17 = vld [vmem:[%s8076_s1 + $0xd4c] ss:$16 sps:$4 sm:$0xff]   ;;  %v5958_v18 = vld [vmem:[%s8076_s1 + $0xd40] ss:$16 sps:$4 sm:$0xff]  }
 0x174   : > { %3982 = vmatprep.subr.bf16.mxu0 %v5875_v20  ;;  %4351 = vmatprep.subr.bf16.mxu1 %v5878_v21  ;;  %v5961_v20 = vld [vmem:[%s8076_s1 + $0xd48] ss:$16 sps:$4 sm:$0xff]   ;;  %v5966_v21 = vld [vmem:[%s8076_s1 + $0xd64] ss:$16 sps:$4 sm:$0xff]  }
 0x177   : > { %3983 = vmatpush1.bf16.msra.mxu0 %v5873_v23  ;;  %4352 = vmatpush1.bf16.msra.mxu1 %v5876_v19  ;;  %v5969_v23 = vld [vmem:[%s8076_s1 + $0xd6c] ss:$16 sps:$4 sm:$0xff]   ;;  %v5964_v19 = vld [vmem:[%s8076_s1 + $0xd60] ss:$16 sps:$4 sm:$0xff]  }
 0x178   : > { %3984 = vmatprep.subr.bf16.mxu0 %v5881_v25  ;;  %4353 = vmatprep.subr.bf16.mxu1 %v5884_v12  ;;  %v5967_v25 = vld [vmem:[%s8076_s1 + $0xd68] ss:$16 sps:$4 sm:$0xff]   ;;  %v5972_v12 = vld [vmem:[%s8076_s1 + $0xd84] ss:$16 sps:$4 sm:$0xff]  }
 0x17b   : > { %3985 = vmatpush1.bf16.msra.mxu0 %v5879_v27  ;;  %4354 = vmatpush1.bf16.msra.mxu1 %v5882_v28  ;;  %v5975_v27 = vld [vmem:[%s8076_s1 + $0xd8c] ss:$16 sps:$4 sm:$0xff]   ;;  %v5970_v28 = vld [vmem:[%s8076_s1 + $0xd80] ss:$16 sps:$4 sm:$0xff]  }
 0x17c   : > { %3986 = vmatprep.subr.bf16.mxu0 %v5887_v30  ;;  %4355 = vmatprep.subr.bf16.mxu1 %v5890_v31  ;;  %v5973_v30 = vld [vmem:[%s8076_s1 + $0xd88] ss:$16 sps:$4 sm:$0xff]   ;;  %v5978_v31 = vld [vmem:[%s8076_s1 + $0xda4] ss:$16 sps:$4 sm:$0xff]  }
 0x17f   : > { %3987 = vmatpush1.bf16.msra.mxu0 %v5885_v22  ;;  %4356 = vmatpush1.bf16.msra.mxu1 %v5888_v32  ;;  %v5981_v22 = vld [vmem:[%s8076_s1 + $0xdac] ss:$16 sps:$4 sm:$0xff]   ;;  %v5976_v32 = vld [vmem:[%s8076_s1 + $0xda0] ss:$16 sps:$4 sm:$0xff]  }
 0x180   : > { %3988 = vmatprep.subr.bf16.mxu0 %v5893_v33  ;;  %4357 = vmatprep.subr.bf16.mxu1 %v5896_v26  ;;  %v5979_v33 = vld [vmem:[%s8076_s1 + $0xda8] ss:$16 sps:$4 sm:$0xff]   ;;  %v5984_v26 = vld [vmem:[%s8076_s1 + $0xdc4] ss:$16 sps:$4 sm:$0xff]  }
 0x183   : > { %3989 = vmatpush1.bf16.msra.mxu0 %v5891_v36  ;;  %4358 = vmatpush1.bf16.msra.mxu1 %v5894_v24  ;;  %v5987_v36 = vld [vmem:[%s8076_s1 + $0xdcc] ss:$16 sps:$4 sm:$0xff]   ;;  %v5982_v24 = vld [vmem:[%s8076_s1 + $0xdc0] ss:$16 sps:$4 sm:$0xff]  }
 0x184   : > { %3999 = vmatprep.subr.bf16.mxu0 %v5900_v37  ;;  %4368 = vmatprep.subr.bf16.mxu1 %v5903_v38  ;;  %v5985_v37 = vld [vmem:[%s8076_s1 + $0xdc8] ss:$16 sps:$4 sm:$0xff]   ;;  %v5990_v38 = vld [vmem:[%s8076_s1 + $0xde4] ss:$16 sps:$4 sm:$0xff]  }
 0x186   : > { %3991 = vmatmul.mubr.bf16.vlgmr.msra.gmra.mrb[0].mxu0 %v7256_v34  ;;  %4360 = vmatmul.mubr.bf16.vlgmr.msra.gmra.mrb[0].mxu1 %v7256_v34  ;;  %v5915_v34 = vld [vmem:[%s8076_s1 + $0xc4c] ss:$16 sps:$4 sm:$0xff]  }
 0x187   : > { %4000 = vmatpush1.bf16.msra.mxu0 %v5898_v40  ;;  %4369 = vmatpush1.bf16.msra.mxu1 %v5901_v41  ;;  %v5993_v40 = vld [vmem:[%s8076_s1 + $0xdec] ss:$16 sps:$4 sm:$0xff]   ;;  %v830_v41 = vcombine.high %v7443_v35, %v7443_v35 }
 0x188   : > { %4001 = vmatprep.subr.bf16.mxu0 %v5906_v29  ;;  %4370 = vmatprep.subr.bf16.mxu1 %v5909_v43  ;;  %v5988_v29 = vld [vmem:[%s8076_s1 + $0xde0] ss:$16 sps:$4 sm:$0xff]   ;;  %v5991_v43 = vld [vmem:[%s8076_s1 + $0xde8] ss:$16 sps:$4 sm:$0xff]   ;;  %v5999_v35 = vld [vmem:[%s8076_s1 + $0xe0c] ss:$16 sps:$4 sm:$0xff]  }
 0x189   : > { %4031 = vmatprep.mubr.bf16.mxu0 %v845_v44  ;;  %4400 = vmatprep.mubr.bf16.mxu1 %v845_v44  ;;  %v5996_v44 = vld [vmem:[%s8076_s1 + $0xe04] ss:$16 sps:$4 sm:$0xff]  }
 0x18b   : > { %4002 = vmatpush1.bf16.msra.mxu0 %v5904_v45  ;;  %4371 = vmatpush1.bf16.msra.mxu1 %v5907_v46  ;;  %v7660_v45 = vrot.slane %v830_v41, %v6379_v49  ;;  %v5994_v46 = vld [vmem:[%s8076_s1 + $0xe00] ss:$16 sps:$4 sm:$0xff]   ;;  %v6005_v49 = vld [vmem:[%s8076_s1 + $0xe2c] ss:$16 sps:$4 sm:$0xff]  }
 0x18c   : > { %4003 = vmatprep.subr.bf16.mxu0 %v5912_v47  ;;  %4372 = vmatprep.subr.bf16.mxu1 %v5915_v34  ;;  %v5997_v47 = vld [vmem:[%s8076_s1 + $0xe08] ss:$16 sps:$4 sm:$0xff]   ;;  %v6002_v34 = vld [vmem:[%s8076_s1 + $0xe24] ss:$16 sps:$4 sm:$0xff]   ;;  %v6078_v41 = vld [vmem:[%s8076_s1 + $0xfc0] ss:$16 sps:$4 sm:$0xff]  }
 0x18f   : > { %4004 = vmatpush1.bf16.msra.mxu0 %v5910_v48  ;;  %4373 = vmatpush1.bf16.msra.mxu1 %v5913_v50  ;;  %v846_v48 = vcombine.high %v7660_v45, %v7660_v45  ;;  %v6000_v50 = vld [vmem:[%s8076_s1 + $0xe20] ss:$16 sps:$4 sm:$0xff]  }
 0x190   : > { %4005 = vmatprep.subr.bf16.mxu0 %v5918_v51  ;;  %4374 = vmatprep.subr.bf16.mxu1 %v5921_v52  ;;  %v6003_v51 = vld [vmem:[%s8076_s1 + $0xe28] ss:$16 sps:$4 sm:$0xff]   ;;  %v6008_v52 = vld [vmem:[%s8076_s1 + $0xe44] ss:$16 sps:$4 sm:$0xff]  }
 0x193   : > { %4006 = vmatpush1.bf16.msra.mxu0 %v5916_v53  ;;  %4375 = vmatpush1.bf16.msra.mxu1 %v5919_v54  ;;  %v6006_v53 = vld [vmem:[%s8076_s1 + $0xe40] ss:$16 sps:$4 sm:$0xff]   ;;  %v6009_v54 = vld [vmem:[%s8076_s1 + $0xe48] ss:$16 sps:$4 sm:$0xff]  }
 0x194   : > { %4007 = vmatprep.subr.bf16.mxu0 %v5924_v55  ;;  %4376 = vmatprep.subr.bf16.mxu1 %v5927_v56  ;;  %v6014_v55 = vld [vmem:[%s8076_s1 + $0xe64] ss:$16 sps:$4 sm:$0xff]   ;;  %v6017_v56 = vld [vmem:[%s8076_s1 + $0xe6c] ss:$16 sps:$4 sm:$0xff]  }
 0x197   : > { %4008 = vmatpush1.bf16.msra.mxu0 %v5922_v57  ;;  %4377 = vmatpush1.bf16.msra.mxu1 %v5925_v58  ;;  %v6012_v57 = vld [vmem:[%s8076_s1 + $0xe60] ss:$16 sps:$4 sm:$0xff]   ;;  %v6015_v58 = vld [vmem:[%s8076_s1 + $0xe68] ss:$16 sps:$4 sm:$0xff]  }
 0x198   : > { %4009 = vmatprep.subr.bf16.mxu0 %v5930_v59  ;;  %4378 = vmatprep.subr.bf16.mxu1 %v5933_v60  ;;  %v6020_v59 = vld [vmem:[%s8076_s1 + $0xe84] ss:$16 sps:$4 sm:$0xff]   ;;  %v6023_v60 = vld [vmem:[%s8076_s1 + $0xe8c] ss:$16 sps:$4 sm:$0xff]  }
 0x19b   : > { %4010 = vmatpush1.bf16.msra.mxu0 %v5928_v61  ;;  %4379 = vmatpush1.bf16.msra.mxu1 %v5931_v62  ;;  %v6018_v61 = vld [vmem:[%s8076_s1 + $0xe80] ss:$16 sps:$4 sm:$0xff]   ;;  %v6021_v62 = vld [vmem:[%s8076_s1 + $0xe88] ss:$16 sps:$4 sm:$0xff]  }
 0x19c   : > { %4011 = vmatprep.subr.bf16.mxu0 %v5936_v63  ;;  %4380 = vmatprep.subr.bf16.mxu1 %v5939_v0  ;;  %v6026_v63 = vld [vmem:[%s8076_s1 + $0xea4] ss:$16 sps:$4 sm:$0xff]   ;;  %v6029_v0 = vld [vmem:[%s8076_s1 + $0xeac] ss:$16 sps:$4 sm:$0xff]  }
 0x19f   : > { %4012 = vmatpush1.bf16.msra.mxu0 %v5934_v1  ;;  %4381 = vmatpush1.bf16.msra.mxu1 %v5937_v2  ;;  %v6024_v1 = vld [vmem:[%s8076_s1 + $0xea0] ss:$16 sps:$4 sm:$0xff]   ;;  %v6027_v2 = vld [vmem:[%s8076_s1 + $0xea8] ss:$16 sps:$4 sm:$0xff]  }
 0x1a0   : > { %4013 = vmatprep.subr.bf16.mxu0 %v5942_v3  ;;  %4382 = vmatprep.subr.bf16.mxu1 %v5945_v4  ;;  %v6032_v3 = vld [vmem:[%s8076_s1 + $0xec4] ss:$16 sps:$4 sm:$0xff]   ;;  %v6035_v4 = vld [vmem:[%s8076_s1 + $0xecc] ss:$16 sps:$4 sm:$0xff]  }
 0x1a3   : > { %4014 = vmatpush1.bf16.msra.mxu0 %v5940_v5  ;;  %4383 = vmatpush1.bf16.msra.mxu1 %v5943_v6  ;;  %v6030_v5 = vld [vmem:[%s8076_s1 + $0xec0] ss:$16 sps:$4 sm:$0xff]   ;;  %v6033_v6 = vld [vmem:[%s8076_s1 + $0xec8] ss:$16 sps:$4 sm:$0xff]  }
 0x1a4   : > { %4015 = vmatprep.subr.bf16.mxu0 %v5948_v7  ;;  %4384 = vmatprep.subr.bf16.mxu1 %v5951_v8  ;;  %v6038_v7 = vld [vmem:[%s8076_s1 + $0xee4] ss:$16 sps:$4 sm:$0xff]   ;;  %v6041_v8 = vld [vmem:[%s8076_s1 + $0xeec] ss:$16 sps:$4 sm:$0xff]  }
 0x1a7   : > { %4016 = vmatpush1.bf16.msra.mxu0 %v5946_v9  ;;  %4385 = vmatpush1.bf16.msra.mxu1 %v5949_v10  ;;  %v6036_v9 = vld [vmem:[%s8076_s1 + $0xee0] ss:$16 sps:$4 sm:$0xff]   ;;  %v6039_v10 = vld [vmem:[%s8076_s1 + $0xee8] ss:$16 sps:$4 sm:$0xff]  }
 0x1a8   : > { %4017 = vmatprep.subr.bf16.mxu0 %v5954_v11  ;;  %4386 = vmatprep.subr.bf16.mxu1 %v5957_v13  ;;  %v6044_v11 = vld [vmem:[%s8076_s1 + $0xf04] ss:$16 sps:$4 sm:$0xff]   ;;  %v6047_v13 = vld [vmem:[%s8076_s1 + $0xf0c] ss:$16 sps:$4 sm:$0xff]  }
 0x1ab   : > { %4018 = vmatpush1.bf16.msra.mxu0 %v5952_v14  ;;  %4387 = vmatpush1.bf16.msra.mxu1 %v5955_v15  ;;  %v6042_v14 = vld [vmem:[%s8076_s1 + $0xf00] ss:$16 sps:$4 sm:$0xff]   ;;  %v6045_v15 = vld [vmem:[%s8076_s1 + $0xf08] ss:$16 sps:$4 sm:$0xff]  }
 0x1ac   : > { %4019 = vmatprep.subr.bf16.mxu0 %v5960_v16  ;;  %4388 = vmatprep.subr.bf16.mxu1 %v5963_v17  ;;  %v6050_v16 = vld [vmem:[%s8076_s1 + $0xf24] ss:$16 sps:$4 sm:$0xff]   ;;  %v6053_v17 = vld [vmem:[%s8076_s1 + $0xf2c] ss:$16 sps:$4 sm:$0xff]  }
 0x1af   : > { %4020 = vmatpush1.bf16.msra.mxu0 %v5958_v18  ;;  %4389 = vmatpush1.bf16.msra.mxu1 %v5961_v20  ;;  %v6048_v18 = vld [vmem:[%s8076_s1 + $0xf20] ss:$16 sps:$4 sm:$0xff]   ;;  %v6051_v20 = vld [vmem:[%s8076_s1 + $0xf28] ss:$16 sps:$4 sm:$0xff]  }
 0x1b0   : > { %4021 = vmatprep.subr.bf16.mxu0 %v5966_v21  ;;  %4390 = vmatprep.subr.bf16.mxu1 %v5969_v23  ;;  %v6056_v21 = vld [vmem:[%s8076_s1 + $0xf44] ss:$16 sps:$4 sm:$0xff]   ;;  %v6059_v23 = vld [vmem:[%s8076_s1 + $0xf4c] ss:$16 sps:$4 sm:$0xff]  }
 0x1b3   : > { %4022 = vmatpush1.bf16.msra.mxu0 %v5964_v19  ;;  %4391 = vmatpush1.bf16.msra.mxu1 %v5967_v25  ;;  %v6054_v19 = vld [vmem:[%s8076_s1 + $0xf40] ss:$16 sps:$4 sm:$0xff]   ;;  %v6057_v25 = vld [vmem:[%s8076_s1 + $0xf48] ss:$16 sps:$4 sm:$0xff]  }
 0x1b4   : > { %4023 = vmatprep.subr.bf16.mxu0 %v5972_v12  ;;  %4392 = vmatprep.subr.bf16.mxu1 %v5975_v27  ;;  %v6062_v12 = vld [vmem:[%s8076_s1 + $0xf64] ss:$16 sps:$4 sm:$0xff]   ;;  %v6065_v27 = vld [vmem:[%s8076_s1 + $0xf6c] ss:$16 sps:$4 sm:$0xff]  }
 0x1b7   : > { %4024 = vmatpush1.bf16.msra.mxu0 %v5970_v28  ;;  %4393 = vmatpush1.bf16.msra.mxu1 %v5973_v30  ;;  %v6060_v28 = vld [vmem:[%s8076_s1 + $0xf60] ss:$16 sps:$4 sm:$0xff]   ;;  %v6063_v30 = vld [vmem:[%s8076_s1 + $0xf68] ss:$16 sps:$4 sm:$0xff]  }
 0x1b8   : > { %4025 = vmatprep.subr.bf16.mxu0 %v5978_v31  ;;  %4394 = vmatprep.subr.bf16.mxu1 %v5981_v22  ;;  %v6068_v31 = vld [vmem:[%s8076_s1 + $0xf84] ss:$16 sps:$4 sm:$0xff]   ;;  %v6071_v22 = vld [vmem:[%s8076_s1 + $0xf8c] ss:$16 sps:$4 sm:$0xff]  }
 0x1bb   : > { %4026 = vmatpush1.bf16.msra.mxu0 %v5976_v32  ;;  %4395 = vmatpush1.bf16.msra.mxu1 %v5979_v33  ;;  %v6066_v32 = vld [vmem:[%s8076_s1 + $0xf80] ss:$16 sps:$4 sm:$0xff]   ;;  %v6069_v33 = vld [vmem:[%s8076_s1 + $0xf88] ss:$16 sps:$4 sm:$0xff]  }
 0x1bc   : > { %4027 = vmatprep.subr.bf16.mxu0 %v5984_v26  ;;  %4396 = vmatprep.subr.bf16.mxu1 %v5987_v36  ;;  %v6074_v26 = vld [vmem:[%s8076_s1 + $0xfa4] ss:$16 sps:$4 sm:$0xff]   ;;  %v6077_v36 = vld [vmem:[%s8076_s1 + $0xfac] ss:$16 sps:$4 sm:$0xff]  }
 0x1bf   : > { %4028 = vmatpush1.bf16.msra.mxu0 %v5982_v24  ;;  %4397 = vmatpush1.bf16.msra.mxu1 %v5985_v37  ;;  %v6072_v24 = vld [vmem:[%s8076_s1 + $0xfa0] ss:$16 sps:$4 sm:$0xff]   ;;  %v6075_v37 = vld [vmem:[%s8076_s1 + $0xfa8] ss:$16 sps:$4 sm:$0xff]  }
 0x1c0   : > { %4029 = vmatprep.subr.bf16.mxu0 %v5990_v38  ;;  %4398 = vmatprep.subr.bf16.mxu1 %v5993_v40  ;;  %v6080_v38 = vld [vmem:[%s8076_s1 + $0xfc4] ss:$16 sps:$4 sm:$0xff]   ;;  %v6083_v40 = vld [vmem:[%s8076_s1 + $0xfcc] ss:$16 sps:$4 sm:$0xff]  }
 0x1c3   : > { %4030 = vmatpush1.bf16.msra.mxu0 %v5988_v29  ;;  %4399 = vmatpush1.bf16.msra.mxu1 %v5991_v43  ;;  %v6081_v29 = vld [vmem:[%s8076_s1 + $0xfc8] ss:$16 sps:$4 sm:$0xff]   ;;  %v6086_v43 = vld [vmem:[%s8076_s1 + $0xfe4] ss:$16 sps:$4 sm:$0xff]  }
 0x1c4   : > { %4040 = vmatprep.subr.bf16.mxu0 %v5996_v44  ;;  %4409 = vmatprep.subr.bf16.mxu1 %v5999_v35  ;;  %v6089_v44 = vld [vmem:[%s8076_s1 + $0xfec] ss:$16 sps:$4 sm:$0xff]   ;;  %v6084_v35 = vld [vmem:[%s8076_s1 + $0xfe0] ss:$16 sps:$4 sm:$0xff]  }
 0x1c6   : > { %4032 = vmatmul.mubr.bf16.vlgmr.msra.gmra.mrb[0].mxu0 %v7459_v39  ;;  %4401 = vmatmul.mubr.bf16.vlgmr.msra.gmra.mrb[0].mxu1 %v7459_v39  ;;  %v6011_v39 = vld [vmem:[%s8076_s1 + $0xe4c] ss:$16 sps:$4 sm:$0xff]  }
 0x1c7   : > { %4041 = vmatpush1.bf16.msra.mxu0 %v5994_v46  ;;  %4410 = vmatpush1.bf16.msra.mxu1 %v5997_v47  ;;  %v6087_v46 = vld [vmem:[%s8076_s1 + $0xfe8] ss:$16 sps:$4 sm:$0xff]   ;;  %v6093_v47 = vld [vmem:[%s8076_s1 + $0x1004] ss:$16 sps:$4 sm:$0xff]  }
 0x1c8   : > { %4042 = vmatprep.subr.bf16.mxu0 %v6002_v34  ;;  %4411 = vmatprep.subr.bf16.mxu1 %v6005_v49  ;;  %v6096_v34 = vld [vmem:[%s8076_s1 + $0x100c] ss:$16 sps:$4 sm:$0xff]   ;;  %v7859_v49 = vld.sshfl [vmem:[%s6376_s30 + $0x20] sm:$0x33 pattern:$0x76325410] }
 0x1c9   : > { %4072 = vmatprep.mubr.bf16.mxu0 %v846_v48  ;;  %4441 = vmatprep.mubr.bf16.mxu1 %v846_v48  ;;  %v6091_v48 = vld [vmem:[%s8076_s1 + $0x1000] ss:$16 sps:$4 sm:$0xff]  }
 0x1cb   : > { %4043 = vmatpush1.bf16.msra.mxu0 %v6000_v50  ;;  %4412 = vmatpush1.bf16.msra.mxu1 %v6003_v51  ;;  %v6094_v50 = vld [vmem:[%s8076_s1 + $0x1008] ss:$16 sps:$4 sm:$0xff]   ;;  %v6099_v51 = vld [vmem:[%s8076_s1 + $0x1024] ss:$16 sps:$4 sm:$0xff]  }
 0x1cc   : > { %4044 = vmatprep.subr.bf16.mxu0 %v6008_v52  ;;  %4413 = vmatprep.subr.bf16.mxu1 %v6011_v39  ;;  %v6102_v52 = vld [vmem:[%s8076_s1 + $0x102c] ss:$16 sps:$4 sm:$0xff]   ;;  %v854_v39 = vcombine.high %v7859_v49, %v7859_v49 }
 0x1cf   : > { %4045 = vmatpush1.bf16.msra.mxu0 %v6006_v53  ;;  %4414 = vmatpush1.bf16.msra.mxu1 %v6009_v54  ;;  %v6097_v53 = vld [vmem:[%s8076_s1 + $0x1020] ss:$16 sps:$4 sm:$0xff]   ;;  %v6100_v54 = vld [vmem:[%s8076_s1 + $0x1028] ss:$16 sps:$4 sm:$0xff]  }
 0x1d0   : > { %4046 = vmatprep.subr.bf16.mxu0 %v6014_v55  ;;  %4415 = vmatprep.subr.bf16.mxu1 %v6017_v56  ;;  %v6105_v55 = vld [vmem:[%s8076_s1 + $0x1044] ss:$16 sps:$4 sm:$0xff]   ;;  %v6103_v56 = vld [vmem:[%s8076_s1 + $0x1040] ss:$16 sps:$4 sm:$0xff]  }
 0x1d3   : > { %4047 = vmatpush1.bf16.msra.mxu0 %v6012_v57  ;;  %4416 = vmatpush1.bf16.msra.mxu1 %v6015_v58  ;;  %v6106_v57 = vld [vmem:[%s8076_s1 + $0x1048] ss:$16 sps:$4 sm:$0xff]   ;;  %v6111_v58 = vld [vmem:[%s8076_s1 + $0x1064] ss:$16 sps:$4 sm:$0xff]  }
 0x1d4   : > { %4048 = vmatprep.subr.bf16.mxu0 %v6020_v59  ;;  %4417 = vmatprep.subr.bf16.mxu1 %v6023_v60  ;;  %v6114_v59 = vld [vmem:[%s8076_s1 + $0x106c] ss:$16 sps:$4 sm:$0xff]   ;;  %v6109_v60 = vld [vmem:[%s8076_s1 + $0x1060] ss:$16 sps:$4 sm:$0xff]  }
 0x1d7   : > { %4049 = vmatpush1.bf16.msra.mxu0 %v6018_v61  ;;  %4418 = vmatpush1.bf16.msra.mxu1 %v6021_v62  ;;  %v6112_v61 = vld [vmem:[%s8076_s1 + $0x1068] ss:$16 sps:$4 sm:$0xff]   ;;  %v6117_v62 = vld [vmem:[%s8076_s1 + $0x1084] ss:$16 sps:$4 sm:$0xff]  }
 0x1d8   : > { %4050 = vmatprep.subr.bf16.mxu0 %v6026_v63  ;;  %4419 = vmatprep.subr.bf16.mxu1 %v6029_v0  ;;  %v6120_v63 = vld [vmem:[%s8076_s1 + $0x108c] ss:$16 sps:$4 sm:$0xff]   ;;  %v6115_v0 = vld [vmem:[%s8076_s1 + $0x1080] ss:$16 sps:$4 sm:$0xff]  }
 0x1db   : > { %4051 = vmatpush1.bf16.msra.mxu0 %v6024_v1  ;;  %4420 = vmatpush1.bf16.msra.mxu1 %v6027_v2  ;;  %v6118_v1 = vld [vmem:[%s8076_s1 + $0x1088] ss:$16 sps:$4 sm:$0xff]   ;;  %v6123_v2 = vld [vmem:[%s8076_s1 + $0x10a4] ss:$16 sps:$4 sm:$0xff]  }
 0x1dc   : > { %4052 = vmatprep.subr.bf16.mxu0 %v6032_v3  ;;  %4421 = vmatprep.subr.bf16.mxu1 %v6035_v4  ;;  %v6126_v3 = vld [vmem:[%s8076_s1 + $0x10ac] ss:$16 sps:$4 sm:$0xff]   ;;  %v6121_v4 = vld [vmem:[%s8076_s1 + $0x10a0] ss:$16 sps:$4 sm:$0xff]  }
 0x1df   : > { %4053 = vmatpush1.bf16.msra.mxu0 %v6030_v5  ;;  %4422 = vmatpush1.bf16.msra.mxu1 %v6033_v6  ;;  %v6124_v5 = vld [vmem:[%s8076_s1 + $0x10a8] ss:$16 sps:$4 sm:$0xff]   ;;  %v6129_v6 = vld [vmem:[%s8076_s1 + $0x10c4] ss:$16 sps:$4 sm:$0xff]  }
 0x1e0   : > { %4054 = vmatprep.subr.bf16.mxu0 %v6038_v7  ;;  %4423 = vmatprep.subr.bf16.mxu1 %v6041_v8  ;;  %v6132_v7 = vld [vmem:[%s8076_s1 + $0x10cc] ss:$16 sps:$4 sm:$0xff]   ;;  %v6127_v8 = vld [vmem:[%s8076_s1 + $0x10c0] ss:$16 sps:$4 sm:$0xff]  }
 0x1e3   : > { %4055 = vmatpush1.bf16.msra.mxu0 %v6036_v9  ;;  %4424 = vmatpush1.bf16.msra.mxu1 %v6039_v10  ;;  %v6130_v9 = vld [vmem:[%s8076_s1 + $0x10c8] ss:$16 sps:$4 sm:$0xff]   ;;  %v6135_v10 = vld [vmem:[%s8076_s1 + $0x10e4] ss:$16 sps:$4 sm:$0xff]  }
 0x1e4   : > { %4056 = vmatprep.subr.bf16.mxu0 %v6044_v11  ;;  %4425 = vmatprep.subr.bf16.mxu1 %v6047_v13  ;;  %v6138_v11 = vld [vmem:[%s8076_s1 + $0x10ec] ss:$16 sps:$4 sm:$0xff]   ;;  %v6133_v13 = vld [vmem:[%s8076_s1 + $0x10e0] ss:$16 sps:$4 sm:$0xff]  }
 0x1e7   : > { %4057 = vmatpush1.bf16.msra.mxu0 %v6042_v14  ;;  %4426 = vmatpush1.bf16.msra.mxu1 %v6045_v15  ;;  %v6136_v14 = vld [vmem:[%s8076_s1 + $0x10e8] ss:$16 sps:$4 sm:$0xff]   ;;  %v6141_v15 = vld [vmem:[%s8076_s1 + $0x1104] ss:$16 sps:$4 sm:$0xff]  }
 0x1e8   : > { %4058 = vmatprep.subr.bf16.mxu0 %v6050_v16  ;;  %4427 = vmatprep.subr.bf16.mxu1 %v6053_v17  ;;  %v6144_v16 = vld [vmem:[%s8076_s1 + $0x110c] ss:$16 sps:$4 sm:$0xff]   ;;  %v6139_v17 = vld [vmem:[%s8076_s1 + $0x1100] ss:$16 sps:$4 sm:$0xff]  }
 0x1eb   : > { %4059 = vmatpush1.bf16.msra.mxu0 %v6048_v18  ;;  %4428 = vmatpush1.bf16.msra.mxu1 %v6051_v20  ;;  %v6142_v18 = vld [vmem:[%s8076_s1 + $0x1108] ss:$16 sps:$4 sm:$0xff]   ;;  %v6147_v20 = vld [vmem:[%s8076_s1 + $0x1124] ss:$16 sps:$4 sm:$0xff]  }
 0x1ec   : > { %4060 = vmatprep.subr.bf16.mxu0 %v6056_v21  ;;  %4429 = vmatprep.subr.bf16.mxu1 %v6059_v23  ;;  %v6150_v21 = vld [vmem:[%s8076_s1 + $0x112c] ss:$16 sps:$4 sm:$0xff]   ;;  %v6145_v23 = vld [vmem:[%s8076_s1 + $0x1120] ss:$16 sps:$4 sm:$0xff]  }
 0x1ef   : > { %4061 = vmatpush1.bf16.msra.mxu0 %v6054_v19  ;;  %4430 = vmatpush1.bf16.msra.mxu1 %v6057_v25  ;;  %v6148_v19 = vld [vmem:[%s8076_s1 + $0x1128] ss:$16 sps:$4 sm:$0xff]   ;;  %v6153_v25 = vld [vmem:[%s8076_s1 + $0x1144] ss:$16 sps:$4 sm:$0xff]  }
 0x1f0   : > { %4062 = vmatprep.subr.bf16.mxu0 %v6062_v12  ;;  %4431 = vmatprep.subr.bf16.mxu1 %v6065_v27  ;;  %v6156_v12 = vld [vmem:[%s8076_s1 + $0x114c] ss:$16 sps:$4 sm:$0xff]   ;;  %v6151_v27 = vld [vmem:[%s8076_s1 + $0x1140] ss:$16 sps:$4 sm:$0xff]  }
 0x1f3   : > { %4063 = vmatpush1.bf16.msra.mxu0 %v6060_v28  ;;  %4432 = vmatpush1.bf16.msra.mxu1 %v6063_v30  ;;  %v6154_v28 = vld [vmem:[%s8076_s1 + $0x1148] ss:$16 sps:$4 sm:$0xff]   ;;  %v6159_v30 = vld [vmem:[%s8076_s1 + $0x1164] ss:$16 sps:$4 sm:$0xff]  }
 0x1f4   : > { %4064 = vmatprep.subr.bf16.mxu0 %v6068_v31  ;;  %4433 = vmatprep.subr.bf16.mxu1 %v6071_v22  ;;  %v6162_v31 = vld [vmem:[%s8076_s1 + $0x116c] ss:$16 sps:$4 sm:$0xff]   ;;  %v6157_v22 = vld [vmem:[%s8076_s1 + $0x1160] ss:$16 sps:$4 sm:$0xff]  }
 0x1f7   : > { %4065 = vmatpush1.bf16.msra.mxu0 %v6066_v32  ;;  %4434 = vmatpush1.bf16.msra.mxu1 %v6069_v33  ;;  %v6160_v32 = vld [vmem:[%s8076_s1 + $0x1168] ss:$16 sps:$4 sm:$0xff]   ;;  %v6165_v33 = vld [vmem:[%s8076_s1 + $0x1184] ss:$16 sps:$4 sm:$0xff]  }
 0x1f8   : > { %4066 = vmatprep.subr.bf16.mxu0 %v6074_v26  ;;  %4435 = vmatprep.subr.bf16.mxu1 %v6077_v36  ;;  %v6168_v26 = vld [vmem:[%s8076_s1 + $0x118c] ss:$16 sps:$4 sm:$0xff]   ;;  %v6163_v36 = vld [vmem:[%s8076_s1 + $0x1180] ss:$16 sps:$4 sm:$0xff]  }
 0x1fb   : > { %4067 = vmatpush1.bf16.msra.mxu0 %v6072_v24  ;;  %4436 = vmatpush1.bf16.msra.mxu1 %v6075_v37  ;;  %v6166_v24 = vld [vmem:[%s8076_s1 + $0x1188] ss:$16 sps:$4 sm:$0xff]   ;;  %v6171_v37 = vld [vmem:[%s8076_s1 + $0x11a4] ss:$16 sps:$4 sm:$0xff]  }
 0x1fc   : > { %4068 = vmatprep.subr.bf16.mxu0 %v6080_v38  ;;  %4437 = vmatprep.subr.bf16.mxu1 %v6083_v40  ;;  %v6174_v38 = vld [vmem:[%s8076_s1 + $0x11ac] ss:$16 sps:$4 sm:$0xff]   ;;  %v6169_v40 = vld [vmem:[%s8076_s1 + $0x11a0] ss:$16 sps:$4 sm:$0xff]  }
 0x1ff   : > { %4069 = vmatpush1.bf16.msra.mxu0 %v6078_v41  ;;  %4438 = vmatpush1.bf16.msra.mxu1 %v6081_v29  ;;  %v6172_v41 = vld [vmem:[%s8076_s1 + $0x11a8] ss:$16 sps:$4 sm:$0xff]   ;;  %v6177_v29 = vld [vmem:[%s8076_s1 + $0x11c4] ss:$16 sps:$4 sm:$0xff]  }
 0x200   : > { %4070 = vmatprep.subr.bf16.mxu0 %v6086_v43  ;;  %4439 = vmatprep.subr.bf16.mxu1 %v6089_v44  ;;  %v6180_v43 = vld [vmem:[%s8076_s1 + $0x11cc] ss:$16 sps:$4 sm:$0xff]   ;;  %v6175_v44 = vld [vmem:[%s8076_s1 + $0x11c0] ss:$16 sps:$4 sm:$0xff]  }
 0x203   : > { %4071 = vmatpush1.bf16.msra.mxu0 %v6084_v35  ;;  %4440 = vmatpush1.bf16.msra.mxu1 %v6087_v46  ;;  %v6178_v35 = vld [vmem:[%s8076_s1 + $0x11c8] ss:$16 sps:$4 sm:$0xff]   ;;  %v6183_v46 = vld [vmem:[%s8076_s1 + $0x11e4] ss:$16 sps:$4 sm:$0xff]  }
 0x204   : > { %4081 = vmatprep.subr.bf16.mxu0 %v6093_v47  ;;  %4450 = vmatprep.subr.bf16.mxu1 %v6096_v34  ;;  %v6186_v47 = vld [vmem:[%s8076_s1 + $0x11ec] ss:$16 sps:$4 sm:$0xff]   ;;  %v6181_v34 = vld [vmem:[%s8076_s1 + $0x11e0] ss:$16 sps:$4 sm:$0xff]  }
 0x206   : > { %4073 = vmatmul.mubr.bf16.vlgmr.msra.gmra.mrb[0].mxu0 %v7660_v45  ;;  %4442 = vmatmul.mubr.bf16.vlgmr.msra.gmra.mrb[0].mxu1 %v7660_v45  ;;  %v6108_v45 = vld [vmem:[%s8076_s1 + $0x104c] ss:$16 sps:$4 sm:$0xff]  }
 0x207   : > { %4082 = vmatpush1.bf16.msra.mxu0 %v6091_v48  ;;  %4451 = vmatpush1.bf16.msra.mxu1 %v6094_v50  ;;  %v6184_v48 = vld [vmem:[%s8076_s1 + $0x11e8] ss:$16 sps:$4 sm:$0xff]   ;;  %v756_v50 = vsub.s32 0, %v6356_v42 }
 0x208   : > { %4083 = vmatprep.subr.bf16.mxu0 %v6099_v51  ;;  %4452 = vmatprep.subr.bf16.mxu1 %v6102_v52  ;;  %v764_v51 = vsub.s32 2, %v6356_v42  ;;  %v752_v52 = vld [vmem:[%s8077_s2] sm:$0xf] }
 0x209   : > { %4113 = vmatprep.mubr.bf16.mxu0 %v854_v39  ;;  %4482 = vmatprep.mubr.bf16.mxu1 %v854_v39  ;;  %v760_v39 = vsub.s32 1, %v6356_v42 }
 0x20b   : > { %4084 = vmatpush1.bf16.msra.mxu0 %v6097_v53  ;;  %4453 = vmatpush1.bf16.msra.mxu1 %v6100_v54  ;;  %v768_v53 = vsub.s32 3, %v6356_v42  ;;  %v757_v54 = vrot.slane %v752_v52, %v756_v50 }
 0x20c   : > { %4085 = vmatprep.subr.bf16.mxu0 %v6105_v55  ;;  %4454 = vmatprep.subr.bf16.mxu1 %v6108_v45  ;;  %v765_v55 = vrot.slane %v752_v52, %v764_v51  ;;  %v761_v45 = vrot.slane %v752_v52, %v760_v39 }
 0x20f   : > { %4086 = vmatpush1.bf16.msra.mxu0 %v6103_v56  ;;  %4455 = vmatpush1.bf16.msra.mxu1 %v6106_v57  ;;  %v769_v56 = vrot.slane %v752_v52, %v768_v53 }
 0x210   : > { %4087 = vmatprep.subr.bf16.mxu0 %v6111_v58  ;;  %4456 = vmatprep.subr.bf16.mxu1 %v6114_v59 }
 0x213   : > { %4088 = vmatpush1.bf16.msra.mxu0 %v6109_v60  ;;  %4457 = vmatpush1.bf16.msra.mxu1 %v6112_v61 }
 0x214   : > { %4089 = vmatprep.subr.bf16.mxu0 %v6117_v62  ;;  %4458 = vmatprep.subr.bf16.mxu1 %v6120_v63 }
 0x217   : > { %4090 = vmatpush1.bf16.msra.mxu0 %v6115_v0  ;;  %4459 = vmatpush1.bf16.msra.mxu1 %v6118_v1 }
 0x218   : > { %4091 = vmatprep.subr.bf16.mxu0 %v6123_v2  ;;  %4460 = vmatprep.subr.bf16.mxu1 %v6126_v3 }
 0x21b   : > { %4092 = vmatpush1.bf16.msra.mxu0 %v6121_v4  ;;  %4461 = vmatpush1.bf16.msra.mxu1 %v6124_v5 }
 0x21c   : > { %4093 = vmatprep.subr.bf16.mxu0 %v6129_v6  ;;  %4462 = vmatprep.subr.bf16.mxu1 %v6132_v7 }
 0x21f   : > { %4094 = vmatpush1.bf16.msra.mxu0 %v6127_v8  ;;  %4463 = vmatpush1.bf16.msra.mxu1 %v6130_v9 }
 0x220   : > { %4095 = vmatprep.subr.bf16.mxu0 %v6135_v10  ;;  %4464 = vmatprep.subr.bf16.mxu1 %v6138_v11 }
 0x223   : > { %4096 = vmatpush1.bf16.msra.mxu0 %v6133_v13  ;;  %4465 = vmatpush1.bf16.msra.mxu1 %v6136_v14 }
 0x224   : > { %4097 = vmatprep.subr.bf16.mxu0 %v6141_v15  ;;  %4466 = vmatprep.subr.bf16.mxu1 %v6144_v16 }
 0x227   : > { %4098 = vmatpush1.bf16.msra.mxu0 %v6139_v17  ;;  %4467 = vmatpush1.bf16.msra.mxu1 %v6142_v18 }
 0x228   : > { %4099 = vmatprep.subr.bf16.mxu0 %v6147_v20  ;;  %4468 = vmatprep.subr.bf16.mxu1 %v6150_v21 }
 0x22b   : > { %4100 = vmatpush1.bf16.msra.mxu0 %v6145_v23  ;;  %4469 = vmatpush1.bf16.msra.mxu1 %v6148_v19 }
 0x22c   : > { %4101 = vmatprep.subr.bf16.mxu0 %v6153_v25  ;;  %4470 = vmatprep.subr.bf16.mxu1 %v6156_v12 }
 0x22f   : > { %4102 = vmatpush1.bf16.msra.mxu0 %v6151_v27  ;;  %4471 = vmatpush1.bf16.msra.mxu1 %v6154_v28 }
 0x230   : > { %4103 = vmatprep.subr.bf16.mxu0 %v6159_v30  ;;  %4472 = vmatprep.subr.bf16.mxu1 %v6162_v31 }
 0x233   : > { %4104 = vmatpush1.bf16.msra.mxu0 %v6157_v22  ;;  %4473 = vmatpush1.bf16.msra.mxu1 %v6160_v32 }
 0x234   : > { %4105 = vmatprep.subr.bf16.mxu0 %v6165_v33  ;;  %4474 = vmatprep.subr.bf16.mxu1 %v6168_v26 }
 0x237   : > { %4106 = vmatpush1.bf16.msra.mxu0 %v6163_v36  ;;  %4475 = vmatpush1.bf16.msra.mxu1 %v6166_v24 }
 0x238   : > { %4107 = vmatprep.subr.bf16.mxu0 %v6171_v37  ;;  %4476 = vmatprep.subr.bf16.mxu1 %v6174_v38 }
 0x23b   : > { %4108 = vmatpush1.bf16.msra.mxu0 %v6169_v40  ;;  %4477 = vmatpush1.bf16.msra.mxu1 %v6172_v41 }
 0x23c   : > { %4109 = vmatprep.subr.bf16.mxu0 %v6177_v29  ;;  %4478 = vmatprep.subr.bf16.mxu1 %v6180_v43 }
 0x23f   : > { %4110 = vmatpush1.bf16.msra.mxu0 %v6175_v44  ;;  %4479 = vmatpush1.bf16.msra.mxu1 %v6178_v35 }
 0x240   : > { %4111 = vmatprep.subr.bf16.mxu0 %v6183_v46  ;;  %4480 = vmatprep.subr.bf16.mxu1 %v6186_v47 }
 0x243   : > { %4112 = vmatpush1.bf16.msra.mxu0 %v6181_v34  ;;  %4481 = vmatpush1.bf16.msra.mxu1 %v6184_v48 }
 0x246   : > { %4114 = vmatmul.mubr.bf16.vlgmr.msra.gmra.mrb[0].mxu0 %v7859_v49  ;;  %4483 = vmatmul.mubr.bf16.vlgmr.msra.gmra.mrb[0].mxu1 %v7859_v49 }
 0x319   : > { %v4115_v57 = vpop.f32.mrb[0].mxu0  ;;  %v4484_v58 = vpop.f32.mrb[0].mxu1 }
 0x31a   : > { %v5241_v49 = vadd.f32 %v4115_v57, %v757_v54  ;;  %v5243_v59 = vadd.f32 %v4484_v58, %v765_v55  ;;  %v4117_v60 = vpop.f32.mrb[1].mxu0  ;;  %v4486_v61 = vpop.f32.mrb[1].mxu1 }
 0x31b   : > { %v5242_v62 = vadd.f32 %v4117_v60, %v761_v45  ;;  %v5244_v63 = vadd.f32 %v4486_v61, %v769_v56  ;;  %v4119_v0 = vpop.f32.mrb[2].mxu0  ;;  %v4488_v1 = vpop.f32.mrb[2].mxu1 }
 0x31c   : > { %v4492_v2 = vsel %vm4491_vm0, %v5241_v49, 0.0  ;;  %v4506_v3 = vsel %vm4491_vm0, %v5243_v59, 0.0  ;;  %v4120_v42 = vpop.f32.mrb[3].mxu0  ;;  %v4489_v4 = vpop.f32.mrb[3].mxu1 }
 0x31d   : > { %v4493_v5 = vrot.slane %v4492_v2, 4  ;;  %v4507_v6 = vrot.slane %v4506_v3, 4  ;;  %v4499_v7 = vsel %vm4491_vm0, %v5242_v62, 0.0  ;;  %v4513_v8 = vsel %vm4491_vm0, %v5244_v63, 0.0 }
 0x31e   : > { %v4500_v9 = vrot.slane %v4499_v7, 4  ;;  %v4514_v10 = vrot.slane %v4513_v8, 4 }
 0x31f   : > { %v4494_v11 = vadd.f32 %v4493_v5, %v4492_v2  ;;  %v4508_v13 = vadd.f32 %v4507_v6, %v4506_v3 }
 0x320   : > { %v4501_v14 = vadd.f32 %v4500_v9, %v4499_v7  ;;  %v4515_v15 = vadd.f32 %v4514_v10, %v4513_v8 }
 0x321   : > { %v4495_v16 = vrot.slane %v4494_v11, 2  ;;  %v4509_v17 = vrot.slane %v4508_v13, 2 }
 0x322   : > { %v4502_v18 = vrot.slane %v4501_v14, 2  ;;  %v4516_v20 = vrot.slane %v4515_v15, 2 }
 0x323   : > { %v4496_v21 = vadd.f32 %v4495_v16, %v4494_v11  ;;  %v4510_v23 = vadd.f32 %v4509_v17, %v4508_v13 }
 0x324   : > { %v4503_v19 = vadd.f32 %v4502_v18, %v4501_v14  ;;  %v4517_v25 = vadd.f32 %v4516_v20, %v4515_v15 }
 0x325   : > { %v4497_v12 = vrot.slane %v4496_v21, 1  ;;  %v4511_v27 = vrot.slane %v4510_v23, 1 }
 0x326   : > { %v4504_v28 = vrot.slane %v4503_v19, 1  ;;  %v4518_v30 = vrot.slane %v4517_v25, 1 }
 0x327   : > { %v4498_v31 = vadd.f32 %v4497_v12, %v4496_v21  ;;  %v4512_v22 = vadd.f32 %v4511_v27, %v4510_v23 }
 0x328   : > { %v4505_v32 = vadd.f32 %v4504_v28, %v4503_v19  ;;  %v4519_v33 = vadd.f32 %v4518_v30, %v4517_v25 }
 0x329   : > { %v4520_v26 = vmul.f32 0.25, %v4498_v31  ;;  %v4522_v36 = vmul.f32 0.25, %v4512_v22 }
 0x32a   : > { %v4521_v24 = vmul.f32 0.25, %v4505_v32  ;;  %v4523_v37 = vmul.f32 0.25, %v4519_v33 }
 0x32b   : > { %v4524_v38 = vsub.f32 %v5241_v49, %v4520_v26  ;;  %v4526_v40 = vsub.f32 %v5243_v59, %v4522_v36 }
 0x32c   : > { %v4525_v41 = vsub.f32 %v5242_v62, %v4521_v24  ;;  %v4527_v29 = vsub.f32 %v5244_v63, %v4523_v37 }
 0x32d   : > { %v4528_v43 = vmul.f32 %v4524_v38, %v4524_v38  ;;  %v4530_v44 = vmul.f32 %v4526_v40, %v4526_v40 }
 0x32e   : > { %v4529_v35 = vmul.f32 %v4525_v41, %v4525_v41  ;;  %v4531_v46 = vmul.f32 %v4527_v29, %v4527_v29 }
 0x32f   : > { %v4532_v47 = vsel %vm4491_vm0, %v4528_v43, 0.0  ;;  %v4546_v34 = vsel %vm4491_vm0, %v4530_v44, 0.0 }
 0x330   : > { %v4533_v48 = vrot.slane %v4532_v47, 4  ;;  %v4547_v50 = vrot.slane %v4546_v34, 4  ;;  %v4539_v51 = vsel %vm4491_vm0, %v4529_v35, 0.0  ;;  %v4553_v52 = vsel %vm4491_vm0, %v4531_v46, 0.0 }
 0x331   : > { %v4540_v39 = vrot.slane %v4539_v51, 4  ;;  %v4554_v53 = vrot.slane %v4553_v52, 4 }
 0x332   : > { %v4534_v54 = vadd.f32 %v4533_v48, %v4532_v47  ;;  %v4548_v55 = vadd.f32 %v4547_v50, %v4546_v34 }
 0x333   : > { %v4541_v45 = vadd.f32 %v4540_v39, %v4539_v51  ;;  %v4555_v56 = vadd.f32 %v4554_v53, %v4553_v52 }
 0x334   : > { %v4535_v57 = vrot.slane %v4534_v54, 2  ;;  %v4549_v58 = vrot.slane %v4548_v55, 2 }
 0x335   : > { %v4542_v49 = vrot.slane %v4541_v45, 2  ;;  %v4556_v59 = vrot.slane %v4555_v56, 2 }
 0x336   : > { %v4536_v60 = vadd.f32 %v4535_v57, %v4534_v54  ;;  %v4550_v61 = vadd.f32 %v4549_v58, %v4548_v55 }
 0x337   : > { %v4543_v62 = vadd.f32 %v4542_v49, %v4541_v45  ;;  %v4557_v63 = vadd.f32 %v4556_v59, %v4555_v56 }
 0x338   : > { %v4537_v0 = vrot.slane %v4536_v60, 1  ;;  %v4551_v1 = vrot.slane %v4550_v61, 1 }
 0x339   : > { %v4544_v2 = vrot.slane %v4543_v62, 1  ;;  %v4558_v3 = vrot.slane %v4557_v63, 1 }
 0x33a   : > { %v4538_v42 = vadd.f32 %v4537_v0, %v4536_v60  ;;  %v4552_v4 = vadd.f32 %v4551_v1, %v4550_v61 }
 0x33b   : > { %v4545_v5 = vadd.f32 %v4544_v2, %v4543_v62  ;;  %v4559_v6 = vadd.f32 %v4558_v3, %v4557_v63 }
 0x33c   : > { %v4560_v7 = vmul.f32 0.25, %v4538_v42  ;;  %v4562_v8 = vmul.f32 0.25, %v4552_v4 }
 0x33d   : > { %v4561_v9 = vmul.f32 0.25, %v4545_v5  ;;  %v4563_v10 = vmul.f32 0.25, %v4559_v6 }
 0x33e   : > { %v4564_v11 = vadd.f32 1e-05, %v4560_v7  ;;  %v4566_v13 = vadd.f32 1e-05, %v4562_v8 }
 0x33f   : > { %v4565_v14 = vadd.f32 1e-05, %v4561_v9  ;;  %v4567_v15 = vadd.f32 1e-05, %v4563_v10 }
 0x340   : > { %6187 = vrsqrt.f32 %v4564_v11 }
 0x341   : > { %6189 = vrsqrt.f32 %v4566_v13 }
 0x342   : > { %6191 = vrsqrt.f32 %v4565_v14 }
 0x343   : > { %6193 = vrsqrt.f32 %v4567_v15 }
 0x34a   : > { %v6188_v16 = vpop.eup %6187 }
 0x34b   : > { %v6190_v17 = vpop.eup %6189  ;;  %v4572_v18 = vmul.f32 %v6188_v16, %v4524_v38 }
 0x34c   : > { %v6192_v20 = vpop.eup %6191  ;;  %v4574_v21 = vmul.f32 %v6190_v17, %v4526_v40 }
 0x34d   : > { %v6194_v23 = vpop.eup %6193  ;;  %vm4576_vm1 = vcmp.ge.f32.partialorder %v4572_v18, 0.0  ;;  %v4580_v19 = vmul.f32 0.2, %v4572_v18  ;;  %v4573_v25 = vmul.f32 %v6192_v20, %v4525_v41 }
 0x34e   : > { %vm4578_vm2 = vcmp.ge.f32.partialorder %v4574_v21, 0.0  ;;  %v4582_v12 = vmul.f32 0.2, %v4574_v21  ;;  %v4575_v27 = vmul.f32 %v6194_v23, %v4527_v29 }
 0x34f   : > { %v4584_v28 = vsel %vm4576_vm1, %v4572_v18, %v4580_v19  ;;  %vm4577_vm3 = vcmp.ge.f32.partialorder %v4573_v25, 0.0  ;;  %v4581_v30 = vmul.f32 0.2, %v4573_v25 }
 0x350   : > { %v4586_v31 = vsel %vm4578_vm2, %v4574_v21, %v4582_v12  ;;  %vm4579_vm4 = vcmp.ge.f32.partialorder %v4575_v27, 0.0  ;;  %v4583_v22 = vmul.f32 0.2, %v4575_v27 }
 0x351   : > { %v4585_v32 = vsel %vm4577_vm3, %v4573_v25, %v4581_v30 }
 0x352   : > { %v4592_v33 = vcombine.low %v4584_v28, %v4585_v32  ;;  %v4587_v26 = vsel %vm4579_vm4, %v4575_v27, %v4583_v22 }
 0x353   : > { %v4593_v36 = vcombine.low %v4586_v31, %v4587_v26 }
 0x354   : > { %4596 = vst [vmem:[%s170_s14] sm:$0xff] %v4592_v33 }
 0x355   : > { %4597 = vst [vmem:[%s170_s14 + $0x8] sm:$0xff] %v4593_v36 }
 0x356 PF: > { %s13_s12 = sadd.s32 1, %s6201_s12  }
 0x357   : > { %p10_p4 = scmp.ge.s32.totalorder %s13_s12, 4  }
 0x359   :  { %12 = sbr.rel (!%p10_p4) target bundleno = 1 (0x1), region = 62 }

// kernel: ce_discriminator.9
= control target key start
LH: loop header
LB: loop body
LE: loop exit
PB: predicated region body
PF: predicated region fallthrough
CT: control target
= control target key end

     0   :  { %s5187_s1 = inlined_call_operand.vmem [shape: bf16[4608,128], index: 1, kind: input, shape index: {}]   ;;  %s5188_s0 = inlined_call_operand.vmem [shape: bf16[8,4608], index: 0, kind: input, shape index: {}]   ;;  %s5189_s2 = inlined_call_operand.vmem [shape: f32[1,128], index: 2, kind: input, shape index: {}]   ;;  %s5190_s3 = inlined_call_operand.vmem [shape: f32[8,128], index: 3, kind: output, shape index: {}]  }
   0x1   :  { %v3916_v0 = vld [vmem:[%s5187_s1 + $0x40] sm:$0xff]   ;;  %v3920_v4 = vld [vmem:[%s5187_s1 + $0x48] sm:$0xff]   ;;  %v3924_v8 = vld [vmem:[%s5187_s1 + $0x50] sm:$0xff]  }
   0x2   :  { %v3917_v1 = vld [vmem:[%s5187_s1 + $0xc0] sm:$0xff]   ;;  %3520 = vmatprep.subr.bf16.mxu0 %v3916_v0  ;;  %v3921_v5 = vld [vmem:[%s5187_s1 + $0xc8] sm:$0xff]   ;;  %v3925_v9 = vld [vmem:[%s5187_s1 + $0xd0] sm:$0xff]  }
   0x3   :  { %v3918_v2 = vld [vmem:[%s5187_s1] sm:$0xff]   ;;  %3542 = vmatprep.subr.bf16.mxu1 %v3917_v1  ;;  %v3922_v6 = vld [vmem:[%s5187_s1 + $0x8] sm:$0xff]   ;;  %v3926_v10 = vld [vmem:[%s5187_s1 + $0x10] sm:$0xff]  }
   0x4   :  { %v3919_v3 = vld [vmem:[%s5187_s1 + $0x80] sm:$0xff]   ;;  %3521 = vmatpush3.bf16.msra.mxu0 %v3918_v2  ;;  %v3923_v7 = vld [vmem:[%s5187_s1 + $0x88] sm:$0xff]   ;;  %v3927_v11 = vld [vmem:[%s5187_s1 + $0x90] sm:$0xff]  }
   0x5   :  { %3543 = vmatpush3.bf16.msra.mxu1 %v3919_v3  ;;  %3522 = vmatprep.subr.bf16.mxu0 %v3920_v4  ;;  %v3928_v12 = vld [vmem:[%s5187_s1 + $0x58] sm:$0xff]   ;;  %v3932_v16 = vld [vmem:[%s5187_s1 + $0x60] sm:$0xff]   ;;  %v3936_v20 = vld [vmem:[%s5187_s1 + $0x68] sm:$0xff]  }
   0x6   :  { %3544 = vmatprep.subr.bf16.mxu1 %v3921_v5  ;;  %v3929_v13 = vld [vmem:[%s5187_s1 + $0xd8] sm:$0xff]   ;;  %v3933_v17 = vld [vmem:[%s5187_s1 + $0xe0] sm:$0xff]   ;;  %v3937_v21 = vld [vmem:[%s5187_s1 + $0xe8] sm:$0xff]  }
   0x7   :  { %v3930_v14 = vld [vmem:[%s5187_s1 + $0x18] sm:$0xff]   ;;  %v3934_v18 = vld [vmem:[%s5187_s1 + $0x20] sm:$0xff]   ;;  %v3938_v22 = vld [vmem:[%s5187_s1 + $0x28] sm:$0xff]  }
   0x8   :  { %3523 = vmatpush3.bf16.msra.mxu0 %v3922_v6  ;;  %v3931_v15 = vld [vmem:[%s5187_s1 + $0x98] sm:$0xff]   ;;  %v3935_v19 = vld [vmem:[%s5187_s1 + $0xa0] sm:$0xff]   ;;  %v3939_v23 = vld [vmem:[%s5187_s1 + $0xa8] sm:$0xff]  }
   0x9   :  { %3545 = vmatpush3.bf16.msra.mxu1 %v3923_v7  ;;  %3524 = vmatprep.subr.bf16.mxu0 %v3924_v8  ;;  %v3940_v24 = vld [vmem:[%s5187_s1 + $0x70] sm:$0xff]   ;;  %v3944_v28 = vld [vmem:[%s5187_s1 + $0x78] sm:$0xff]   ;;  %v15_v32 = vld [vmem:[%s5188_s0] sm:$0xff] }
   0xa   :  { %3546 = vmatprep.subr.bf16.mxu1 %v3925_v9  ;;  %v3941_v25 = vld [vmem:[%s5187_s1 + $0xf0] sm:$0xff]   ;;  %v3945_v29 = vld [vmem:[%s5187_s1 + $0xf8] sm:$0xff]   ;;  %v16_v33 = vld [vmem:[%s5188_s0 + $0x8] sm:$0xff]  ;;  %v3196_v34 = vcombine.low %v15_v32, %v15_v32  ;;  %v3197_v35 = vcombine.high %v15_v32, %v15_v32 }
   0xb   :  { %v3942_v26 = vld [vmem:[%s5187_s1 + $0x30] sm:$0xff]   ;;  %v3946_v30 = vld [vmem:[%s5187_s1 + $0x38] sm:$0xff]   ;;  %v3198_v36 = vcombine.low %v16_v33, %v16_v33  ;;  %v3199_v37 = vcombine.high %v16_v33, %v16_v33  ;;  %v3952_v38 = vld [vmem:[%s5187_s1 + $0x140] sm:$0xff]  }
   0xc   :  { %3525 = vmatpush3.bf16.msra.mxu0 %v3926_v10  ;;  %v3943_v27 = vld [vmem:[%s5187_s1 + $0xb0] sm:$0xff]   ;;  %v3947_v31 = vld [vmem:[%s5187_s1 + $0xb8] sm:$0xff]   ;;  %v3953_v39 = vld [vmem:[%s5187_s1 + $0x1c0] sm:$0xff]   ;;  %2502 = vmatprep.mubr.bf16.mxu0 %v3197_v35 }
   0xd   :  { %3547 = vmatpush3.bf16.msra.mxu1 %v3927_v11  ;;  %3526 = vmatprep.subr.bf16.mxu0 %v3928_v12  ;;  %v3954_v40 = vld [vmem:[%s5187_s1 + $0x100] sm:$0xff]   ;;  %v3956_v42 = vld [vmem:[%s5187_s1 + $0x148] sm:$0xff]   ;;  %v3960_v46 = vld [vmem:[%s5187_s1 + $0x150] sm:$0xff]  }
   0xe   :  { %3548 = vmatprep.subr.bf16.mxu1 %v3929_v13  ;;  %2542 = vmatprep.mubr.bf16.mxu1 %v3199_v37  ;;  %v3955_v41 = vld [vmem:[%s5187_s1 + $0x180] sm:$0xff]   ;;  %v3957_v43 = vld [vmem:[%s5187_s1 + $0x1c8] sm:$0xff]   ;;  %v3961_v47 = vld [vmem:[%s5187_s1 + $0x1d0] sm:$0xff]  }
   0xf   :  { %v3958_v44 = vld [vmem:[%s5187_s1 + $0x108] sm:$0xff]   ;;  %v3962_v48 = vld [vmem:[%s5187_s1 + $0x110] sm:$0xff]   ;;  %v3964_v50 = vld [vmem:[%s5187_s1 + $0x158] sm:$0xff]  }
  0x10   :  { %3527 = vmatpush3.bf16.msra.mxu0 %v3930_v14  ;;  %v3959_v45 = vld [vmem:[%s5187_s1 + $0x188] sm:$0xff]   ;;  %v3963_v49 = vld [vmem:[%s5187_s1 + $0x190] sm:$0xff]   ;;  %v3965_v51 = vld [vmem:[%s5187_s1 + $0x1d8] sm:$0xff]  }
  0x11   :  { %3549 = vmatpush3.bf16.msra.mxu1 %v3931_v15  ;;  %3528 = vmatprep.subr.bf16.mxu0 %v3932_v16  ;;  %v3966_v52 = vld [vmem:[%s5187_s1 + $0x118] sm:$0xff]   ;;  %v3968_v54 = vld [vmem:[%s5187_s1 + $0x160] sm:$0xff]   ;;  %v3972_v58 = vld [vmem:[%s5187_s1 + $0x168] sm:$0xff]  }
  0x12   :  { %3550 = vmatprep.subr.bf16.mxu1 %v3933_v17  ;;  %v3967_v53 = vld [vmem:[%s5187_s1 + $0x198] sm:$0xff]   ;;  %v3969_v55 = vld [vmem:[%s5187_s1 + $0x1e0] sm:$0xff]   ;;  %v3973_v59 = vld [vmem:[%s5187_s1 + $0x1e8] sm:$0xff]  }
  0x13   :  { %v3970_v56 = vld [vmem:[%s5187_s1 + $0x120] sm:$0xff]   ;;  %v3974_v60 = vld [vmem:[%s5187_s1 + $0x128] sm:$0xff]   ;;  %v3976_v62 = vld [vmem:[%s5187_s1 + $0x170] sm:$0xff]  }
  0x14   :  { %3529 = vmatpush3.bf16.msra.mxu0 %v3934_v18  ;;  %v3971_v57 = vld [vmem:[%s5187_s1 + $0x1a0] sm:$0xff]   ;;  %v3975_v61 = vld [vmem:[%s5187_s1 + $0x1a8] sm:$0xff]   ;;  %v3977_v63 = vld [vmem:[%s5187_s1 + $0x1f0] sm:$0xff]  }
  0x15   :  { %3551 = vmatpush3.bf16.msra.mxu1 %v3935_v19  ;;  %3530 = vmatprep.subr.bf16.mxu0 %v3936_v20  ;;  %v3978_v0 = vld [vmem:[%s5187_s1 + $0x130] sm:$0xff]   ;;  %v3980_v2 = vld [vmem:[%s5187_s1 + $0x178] sm:$0xff]   ;;  %v3988_v12 = vld [vmem:[%s5187_s1 + $0x240] sm:$0xff]  }
  0x16   :  { %3552 = vmatprep.subr.bf16.mxu1 %v3937_v21  ;;  %v3979_v1 = vld [vmem:[%s5187_s1 + $0x1b0] sm:$0xff]   ;;  %v3981_v3 = vld [vmem:[%s5187_s1 + $0x1f8] sm:$0xff]   ;;  %v3989_v13 = vld [vmem:[%s5187_s1 + $0x2c0] sm:$0xff]  }
  0x17   :  { %v3982_v4 = vld [vmem:[%s5187_s1 + $0x138] sm:$0xff]   ;;  %v17_v6 = vld [vmem:[%s5188_s0 + $0x10] sm:$0xff]  ;;  %v3990_v14 = vld [vmem:[%s5187_s1 + $0x200] sm:$0xff]  }
  0x18   :  { %3531 = vmatpush3.bf16.msra.mxu0 %v3938_v22  ;;  %v3983_v5 = vld [vmem:[%s5187_s1 + $0x1b8] sm:$0xff]   ;;  %v3200_v7 = vcombine.low %v17_v6, %v17_v6  ;;  %v3201_v8 = vcombine.high %v17_v6, %v17_v6  ;;  %v3991_v15 = vld [vmem:[%s5187_s1 + $0x280] sm:$0xff]   ;;  %v3992_v16 = vld [vmem:[%s5187_s1 + $0x248] sm:$0xff]  }
  0x19   :  { %3553 = vmatpush3.bf16.msra.mxu1 %v3939_v23  ;;  %3532 = vmatprep.subr.bf16.mxu0 %v3940_v24  ;;  %v18_v9 = vld [vmem:[%s5188_s0 + $0x18] sm:$0xff]  ;;  %v3993_v17 = vld [vmem:[%s5187_s1 + $0x2c8] sm:$0xff]   ;;  %v3996_v20 = vld [vmem:[%s5187_s1 + $0x250] sm:$0xff]  }
  0x1a   :  { %3554 = vmatprep.subr.bf16.mxu1 %v3941_v25  ;;  %v3202_v10 = vcombine.low %v18_v9, %v18_v9  ;;  %v3203_v11 = vcombine.high %v18_v9, %v18_v9  ;;  %v3994_v18 = vld [vmem:[%s5187_s1 + $0x208] sm:$0xff]   ;;  %v3997_v21 = vld [vmem:[%s5187_s1 + $0x2d0] sm:$0xff]   ;;  %v4000_v24 = vld [vmem:[%s5187_s1 + $0x258] sm:$0xff]  }
  0x1b   :  { %v3995_v19 = vld [vmem:[%s5187_s1 + $0x288] sm:$0xff]   ;;  %v3998_v22 = vld [vmem:[%s5187_s1 + $0x210] sm:$0xff]   ;;  %v4001_v25 = vld [vmem:[%s5187_s1 + $0x2d8] sm:$0xff]  }
  0x1c   :  { %3533 = vmatpush3.bf16.msra.mxu0 %v3942_v26  ;;  %v3999_v23 = vld [vmem:[%s5187_s1 + $0x290] sm:$0xff]   ;;  %v4002_v26 = vld [vmem:[%s5187_s1 + $0x218] sm:$0xff]   ;;  %v4008_v32 = vld [vmem:[%s5187_s1 + $0x268] sm:$0xff]  }
  0x1d   :  { %3555 = vmatpush3.bf16.msra.mxu1 %v3943_v27  ;;  %3534 = vmatprep.subr.bf16.mxu0 %v3944_v28  ;;  %v4003_v27 = vld [vmem:[%s5187_s1 + $0x298] sm:$0xff]   ;;  %v4004_v28 = vld [vmem:[%s5187_s1 + $0x260] sm:$0xff]   ;;  %v4009_v33 = vld [vmem:[%s5187_s1 + $0x2e8] sm:$0xff]  }
  0x1e   :  { %3556 = vmatprep.subr.bf16.mxu1 %v3945_v29  ;;  %v4005_v29 = vld [vmem:[%s5187_s1 + $0x2e0] sm:$0xff]   ;;  %v4011_v35 = vld [vmem:[%s5187_s1 + $0x2a8] sm:$0xff]   ;;  %v4013_v37 = vld [vmem:[%s5187_s1 + $0x2f0] sm:$0xff]  }
  0x1f   :  { %v4044_v6 = vld [vmem:[%s5187_s1 + $0x368] sm:$0xff]  }
  0x20   :  { %3535 = vmatpush3.bf16.msra.mxu0 %v3946_v30  ;;  %v4006_v30 = vld [vmem:[%s5187_s1 + $0x220] sm:$0xff]   ;;  %v4047_v9 = vld [vmem:[%s5187_s1 + $0x3a8] sm:$0xff]  }
  0x21   :  { %3557 = vmatpush3.bf16.msra.mxu1 %v3947_v31  ;;  %3564 = vmatprep.subr.bf16.mxu0 %v3952_v38  ;;  %v4007_v31 = vld [vmem:[%s5187_s1 + $0x2a0] sm:$0xff]   ;;  %v4014_v38 = vld [vmem:[%s5187_s1 + $0x230] sm:$0xff]  }
  0x22   :  { %3586 = vmatprep.subr.bf16.mxu1 %v3953_v39  ;;  %v4015_v39 = vld [vmem:[%s5187_s1 + $0x2b0] sm:$0xff]  }
  0x23   :  { %2503 = vmatmul.mubr.bf16.vlgmr.msra.gmra.mrb[0].mxu0 %v3196_v34  ;;  %v4010_v34 = vld [vmem:[%s5187_s1 + $0x228] sm:$0xff]  }
  0x24   :  { %2543 = vmatmul.mubr.bf16.vlgmr.msra.gmra.mrb[0].mxu1 %v3198_v36  ;;  %3565 = vmatpush3.bf16.msra.mxu0 %v3954_v40  ;;  %v4012_v36 = vld [vmem:[%s5187_s1 + $0x270] sm:$0xff]   ;;  %v4016_v40 = vld [vmem:[%s5187_s1 + $0x278] sm:$0xff]  }
  0x25   :  { %3587 = vmatpush3.bf16.msra.mxu1 %v3955_v41  ;;  %3566 = vmatprep.subr.bf16.mxu0 %v3956_v42  ;;  %v4017_v41 = vld [vmem:[%s5187_s1 + $0x2f8] sm:$0xff]  }
  0x26   :  { %3588 = vmatprep.subr.bf16.mxu1 %v3957_v43  ;;  %2582 = vmatprep.mubr.bf16.mxu0 %v3201_v8  ;;  %v4018_v42 = vld [vmem:[%s5187_s1 + $0x238] sm:$0xff]   ;;  %v4046_v8 = vld [vmem:[%s5187_s1 + $0x328] sm:$0xff]  }
  0x27   :  { %2622 = vmatprep.mubr.bf16.mxu1 %v3203_v11  ;;  %v4019_v43 = vld [vmem:[%s5187_s1 + $0x2b8] sm:$0xff]   ;;  %v4049_v11 = vld [vmem:[%s5187_s1 + $0x3f0] sm:$0xff]  }
  0x28   :  { %3567 = vmatpush3.bf16.msra.mxu0 %v3958_v44  ;;  %v19_v44 = vld [vmem:[%s5188_s0 + $0x20] sm:$0xff] }
  0x29   :  { %3589 = vmatpush3.bf16.msra.mxu1 %v3959_v45  ;;  %3568 = vmatprep.subr.bf16.mxu0 %v3960_v46  ;;  %v20_v45 = vld [vmem:[%s5188_s0 + $0x28] sm:$0xff]  ;;  %v3204_v46 = vcombine.low %v19_v44, %v19_v44 }
  0x2a   :  { %3590 = vmatprep.subr.bf16.mxu1 %v3961_v47  ;;  %v3205_v47 = vcombine.high %v19_v44, %v19_v44  ;;  %v4080_v44 = vld [vmem:[%s5187_s1 + $0x468] sm:$0xff]  }
  0x2c   :  { %3569 = vmatpush3.bf16.msra.mxu0 %v3962_v48  ;;  %v3206_v48 = vcombine.low %v20_v45, %v20_v45 }
  0x2d   :  { %3591 = vmatpush3.bf16.msra.mxu1 %v3963_v49  ;;  %3570 = vmatprep.subr.bf16.mxu0 %v3964_v50  ;;  %v3207_v49 = vcombine.high %v20_v45, %v20_v45  ;;  %v4024_v50 = vld [vmem:[%s5187_s1 + $0x340] sm:$0xff]   ;;  %v4081_v45 = vld [vmem:[%s5187_s1 + $0x4e8] sm:$0xff]  }
  0x2e   :  { %3592 = vmatprep.subr.bf16.mxu1 %v3965_v51  ;;  %v4025_v51 = vld [vmem:[%s5187_s1 + $0x3c0] sm:$0xff]  }
  0x30   :  { %3571 = vmatpush3.bf16.msra.mxu0 %v3966_v52  ;;  %v4026_v52 = vld [vmem:[%s5187_s1 + $0x300] sm:$0xff]  }
  0x31   :  { %3593 = vmatpush3.bf16.msra.mxu1 %v3967_v53  ;;  %3572 = vmatprep.subr.bf16.mxu0 %v3968_v54  ;;  %v4027_v53 = vld [vmem:[%s5187_s1 + $0x380] sm:$0xff]   ;;  %v4028_v54 = vld [vmem:[%s5187_s1 + $0x348] sm:$0xff]  }
  0x32   :  { %3594 = vmatprep.subr.bf16.mxu1 %v3969_v55  ;;  %v4029_v55 = vld [vmem:[%s5187_s1 + $0x3c8] sm:$0xff]  }
  0x34   :  { %3573 = vmatpush3.bf16.msra.mxu0 %v3970_v56  ;;  %v4030_v56 = vld [vmem:[%s5187_s1 + $0x308] sm:$0xff]  }
  0x35   :  { %3595 = vmatpush3.bf16.msra.mxu1 %v3971_v57  ;;  %3574 = vmatprep.subr.bf16.mxu0 %v3972_v58  ;;  %v4031_v57 = vld [vmem:[%s5187_s1 + $0x388] sm:$0xff]   ;;  %v4032_v58 = vld [vmem:[%s5187_s1 + $0x350] sm:$0xff]  }
  0x36   :  { %3596 = vmatprep.subr.bf16.mxu1 %v3973_v59  ;;  %v4033_v59 = vld [vmem:[%s5187_s1 + $0x3d0] sm:$0xff]  }
  0x38   :  { %3575 = vmatpush3.bf16.msra.mxu0 %v3974_v60  ;;  %v4034_v60 = vld [vmem:[%s5187_s1 + $0x310] sm:$0xff]  }
  0x39   :  { %3597 = vmatpush3.bf16.msra.mxu1 %v3975_v61  ;;  %3576 = vmatprep.subr.bf16.mxu0 %v3976_v62  ;;  %v4035_v61 = vld [vmem:[%s5187_s1 + $0x390] sm:$0xff]   ;;  %v4036_v62 = vld [vmem:[%s5187_s1 + $0x358] sm:$0xff]  }
  0x3a   :  { %3598 = vmatprep.subr.bf16.mxu1 %v3977_v63  ;;  %v4037_v63 = vld [vmem:[%s5187_s1 + $0x3d8] sm:$0xff]  }
  0x3c   :  { %3577 = vmatpush3.bf16.msra.mxu0 %v3978_v0  ;;  %v4038_v0 = vld [vmem:[%s5187_s1 + $0x318] sm:$0xff]  }
  0x3d   :  { %3599 = vmatpush3.bf16.msra.mxu1 %v3979_v1  ;;  %3578 = vmatprep.subr.bf16.mxu0 %v3980_v2  ;;  %v4039_v1 = vld [vmem:[%s5187_s1 + $0x398] sm:$0xff]   ;;  %v4040_v2 = vld [vmem:[%s5187_s1 + $0x360] sm:$0xff]  }
  0x3e   :  { %3600 = vmatprep.subr.bf16.mxu1 %v3981_v3  ;;  %v4041_v3 = vld [vmem:[%s5187_s1 + $0x3e0] sm:$0xff]  }
  0x40   :  { %3579 = vmatpush3.bf16.msra.mxu0 %v3982_v4  ;;  %v4042_v4 = vld [vmem:[%s5187_s1 + $0x320] sm:$0xff]  }
  0x41   :  { %3601 = vmatpush3.bf16.msra.mxu1 %v3983_v5  ;;  %3608 = vmatprep.subr.bf16.mxu0 %v3988_v12  ;;  %v4043_v5 = vld [vmem:[%s5187_s1 + $0x3a0] sm:$0xff]   ;;  %v4050_v12 = vld [vmem:[%s5187_s1 + $0x330] sm:$0xff]  }
  0x42   :  { %3630 = vmatprep.subr.bf16.mxu1 %v3989_v13  ;;  %v4051_v13 = vld [vmem:[%s5187_s1 + $0x3b0] sm:$0xff]  }
  0x43   :  { %2583 = vmatmul.mubr.bf16.vlgmr.msra.gmra.mrb[4].mxu0 %v3200_v7  ;;  %v4045_v7 = vld [vmem:[%s5187_s1 + $0x3e8] sm:$0xff]  }
  0x44   :  { %2623 = vmatmul.mubr.bf16.vlgmr.msra.gmra.mrb[4].mxu1 %v3202_v10  ;;  %3609 = vmatpush3.bf16.msra.mxu0 %v3990_v14  ;;  %v4048_v10 = vld [vmem:[%s5187_s1 + $0x370] sm:$0xff]   ;;  %v4052_v14 = vld [vmem:[%s5187_s1 + $0x378] sm:$0xff]  }
  0x45   :  { %3631 = vmatpush3.bf16.msra.mxu1 %v3991_v15  ;;  %3610 = vmatprep.subr.bf16.mxu0 %v3992_v16  ;;  %v4053_v15 = vld [vmem:[%s5187_s1 + $0x3f8] sm:$0xff]  }
  0x46   :  { %3632 = vmatprep.subr.bf16.mxu1 %v3993_v17  ;;  %2662 = vmatprep.mubr.bf16.mxu0 %v3205_v47  ;;  %v4054_v16 = vld [vmem:[%s5187_s1 + $0x338] sm:$0xff]   ;;  %v4083_v47 = vld [vmem:[%s5187_s1 + $0x4a8] sm:$0xff]  }
  0x47   :  { %2702 = vmatprep.mubr.bf16.mxu1 %v3207_v49  ;;  %v4055_v17 = vld [vmem:[%s5187_s1 + $0x3b8] sm:$0xff]   ;;  %v4085_v49 = vld [vmem:[%s5187_s1 + $0x4f0] sm:$0xff]  }
  0x48   :  { %3611 = vmatpush3.bf16.msra.mxu0 %v3994_v18  ;;  %v21_v18 = vld [vmem:[%s5188_s0 + $0x30] sm:$0xff] }
  0x49   :  { %3633 = vmatpush3.bf16.msra.mxu1 %v3995_v19  ;;  %3612 = vmatprep.subr.bf16.mxu0 %v3996_v20  ;;  %v22_v19 = vld [vmem:[%s5188_s0 + $0x38] sm:$0xff]  ;;  %v3208_v20 = vcombine.low %v21_v18, %v21_v18 }
  0x4a   :  { %3634 = vmatprep.subr.bf16.mxu1 %v3997_v21  ;;  %v3209_v21 = vcombine.high %v21_v18, %v21_v18  ;;  %v4116_v18 = vld [vmem:[%s5187_s1 + $0x568] sm:$0xff]  }
  0x4c   :  { %3613 = vmatpush3.bf16.msra.mxu0 %v3998_v22  ;;  %v3210_v22 = vcombine.low %v22_v19, %v22_v19 }
  0x4d   :  { %3635 = vmatpush3.bf16.msra.mxu1 %v3999_v23  ;;  %3614 = vmatprep.subr.bf16.mxu0 %v4000_v24  ;;  %v4060_v23 = vld [vmem:[%s5187_s1 + $0x440] sm:$0xff]   ;;  %v3211_v24 = vcombine.high %v22_v19, %v22_v19  ;;  %v4117_v19 = vld [vmem:[%s5187_s1 + $0x5e8] sm:$0xff]  }
  0x4e   :  { %3636 = vmatprep.subr.bf16.mxu1 %v4001_v25  ;;  %v4061_v25 = vld [vmem:[%s5187_s1 + $0x4c0] sm:$0xff]  }
  0x50   :  { %3615 = vmatpush3.bf16.msra.mxu0 %v4002_v26  ;;  %v4062_v26 = vld [vmem:[%s5187_s1 + $0x400] sm:$0xff]  }
  0x51   :  { %3637 = vmatpush3.bf16.msra.mxu1 %v4003_v27  ;;  %3616 = vmatprep.subr.bf16.mxu0 %v4004_v28  ;;  %v4063_v27 = vld [vmem:[%s5187_s1 + $0x480] sm:$0xff]   ;;  %v4064_v28 = vld [vmem:[%s5187_s1 + $0x448] sm:$0xff]  }
  0x52   :  { %3638 = vmatprep.subr.bf16.mxu1 %v4005_v29  ;;  %v4065_v29 = vld [vmem:[%s5187_s1 + $0x4c8] sm:$0xff]  }
  0x54   :  { %3617 = vmatpush3.bf16.msra.mxu0 %v4006_v30  ;;  %v4066_v30 = vld [vmem:[%s5187_s1 + $0x408] sm:$0xff]  }
  0x55   :  { %3639 = vmatpush3.bf16.msra.mxu1 %v4007_v31  ;;  %3618 = vmatprep.subr.bf16.mxu0 %v4008_v32  ;;  %v4067_v31 = vld [vmem:[%s5187_s1 + $0x488] sm:$0xff]   ;;  %v4068_v32 = vld [vmem:[%s5187_s1 + $0x450] sm:$0xff]  }
  0x56   :  { %3640 = vmatprep.subr.bf16.mxu1 %v4009_v33  ;;  %v4069_v33 = vld [vmem:[%s5187_s1 + $0x4d0] sm:$0xff]  }
  0x58   :  { %3619 = vmatpush3.bf16.msra.mxu0 %v4010_v34  ;;  %v4070_v34 = vld [vmem:[%s5187_s1 + $0x410] sm:$0xff]  }
  0x59   :  { %3641 = vmatpush3.bf16.msra.mxu1 %v4011_v35  ;;  %3620 = vmatprep.subr.bf16.mxu0 %v4012_v36  ;;  %v4071_v35 = vld [vmem:[%s5187_s1 + $0x490] sm:$0xff]   ;;  %v4072_v36 = vld [vmem:[%s5187_s1 + $0x458] sm:$0xff]  }
  0x5a   :  { %3642 = vmatprep.subr.bf16.mxu1 %v4013_v37  ;;  %v4073_v37 = vld [vmem:[%s5187_s1 + $0x4d8] sm:$0xff]  }
  0x5c   :  { %3621 = vmatpush3.bf16.msra.mxu0 %v4014_v38  ;;  %v4074_v38 = vld [vmem:[%s5187_s1 + $0x418] sm:$0xff]  }
  0x5d   :  { %3643 = vmatpush3.bf16.msra.mxu1 %v4015_v39  ;;  %3622 = vmatprep.subr.bf16.mxu0 %v4016_v40  ;;  %v4075_v39 = vld [vmem:[%s5187_s1 + $0x498] sm:$0xff]   ;;  %v4076_v40 = vld [vmem:[%s5187_s1 + $0x460] sm:$0xff]  }
  0x5e   :  { %3644 = vmatprep.subr.bf16.mxu1 %v4017_v41  ;;  %v4077_v41 = vld [vmem:[%s5187_s1 + $0x4e0] sm:$0xff]  }
  0x60   :  { %3623 = vmatpush3.bf16.msra.mxu0 %v4018_v42  ;;  %v4078_v42 = vld [vmem:[%s5187_s1 + $0x420] sm:$0xff]  }
  0x61   :  { %3645 = vmatpush3.bf16.msra.mxu1 %v4019_v43  ;;  %3652 = vmatprep.subr.bf16.mxu0 %v4024_v50  ;;  %v4079_v43 = vld [vmem:[%s5187_s1 + $0x4a0] sm:$0xff]   ;;  %v4086_v50 = vld [vmem:[%s5187_s1 + $0x430] sm:$0xff]  }
  0x62   :  { %3674 = vmatprep.subr.bf16.mxu1 %v4025_v51  ;;  %v4087_v51 = vld [vmem:[%s5187_s1 + $0x4b0] sm:$0xff]  }
  0x63   :  { %2663 = vmatmul.mubr.bf16.vlgmr.msra.gmra.mrb[8].mxu0 %v3204_v46  ;;  %v4082_v46 = vld [vmem:[%s5187_s1 + $0x428] sm:$0xff]  }
  0x64   :  { %2703 = vmatmul.mubr.bf16.vlgmr.msra.gmra.mrb[8].mxu1 %v3206_v48  ;;  %3653 = vmatpush3.bf16.msra.mxu0 %v4026_v52  ;;  %v4084_v48 = vld [vmem:[%s5187_s1 + $0x470] sm:$0xff]   ;;  %v4088_v52 = vld [vmem:[%s5187_s1 + $0x478] sm:$0xff]  }
  0x65   :  { %3675 = vmatpush3.bf16.msra.mxu1 %v4027_v53  ;;  %3654 = vmatprep.subr.bf16.mxu0 %v4028_v54  ;;  %v4089_v53 = vld [vmem:[%s5187_s1 + $0x4f8] sm:$0xff]  }
  0x66   :  { %3676 = vmatprep.subr.bf16.mxu1 %v4029_v55  ;;  %2742 = vmatprep.mubr.bf16.mxu0 %v3209_v21  ;;  %v4090_v54 = vld [vmem:[%s5187_s1 + $0x438] sm:$0xff]   ;;  %v4119_v21 = vld [vmem:[%s5187_s1 + $0x5a8] sm:$0xff]  }
  0x67   :  { %2782 = vmatprep.mubr.bf16.mxu1 %v3211_v24  ;;  %v4091_v55 = vld [vmem:[%s5187_s1 + $0x4b8] sm:$0xff]   ;;  %v4122_v24 = vld [vmem:[%s5187_s1 + $0x530] sm:$0xff]  }
  0x68   :  { %3655 = vmatpush3.bf16.msra.mxu0 %v4030_v56  ;;  %v23_v56 = vld [vmem:[%s5188_s0 + $0x40] sm:$0xff] }
  0x69   :  { %3677 = vmatpush3.bf16.msra.mxu1 %v4031_v57  ;;  %3656 = vmatprep.subr.bf16.mxu0 %v4032_v58  ;;  %v3212_v57 = vcombine.low %v23_v56, %v23_v56  ;;  %v3213_v58 = vcombine.high %v23_v56, %v23_v56  ;;  %v4152_v56 = vld [vmem:[%s5187_s1 + $0x668] sm:$0xff]  }
  0x6a   :  { %3678 = vmatprep.subr.bf16.mxu1 %v4033_v59  ;;  %v24_v59 = vld [vmem:[%s5188_s0 + $0x48] sm:$0xff] }
  0x6c   :  { %3657 = vmatpush3.bf16.msra.mxu0 %v4034_v60  ;;  %v3214_v60 = vcombine.low %v24_v59, %v24_v59 }
  0x6d   :  { %3679 = vmatpush3.bf16.msra.mxu1 %v4035_v61  ;;  %3658 = vmatprep.subr.bf16.mxu0 %v4036_v62  ;;  %v3215_v61 = vcombine.high %v24_v59, %v24_v59  ;;  %v4096_v62 = vld [vmem:[%s5187_s1 + $0x540] sm:$0xff]   ;;  %v4155_v59 = vld [vmem:[%s5187_s1 + $0x6a8] sm:$0xff]  }
  0x6e   :  { %3680 = vmatprep.subr.bf16.mxu1 %v4037_v63  ;;  %v4097_v63 = vld [vmem:[%s5187_s1 + $0x5c0] sm:$0xff]  }
  0x70   :  { %3659 = vmatpush3.bf16.msra.mxu0 %v4038_v0  ;;  %v4098_v0 = vld [vmem:[%s5187_s1 + $0x500] sm:$0xff]  }
  0x71   :  { %3681 = vmatpush3.bf16.msra.mxu1 %v4039_v1  ;;  %3660 = vmatprep.subr.bf16.mxu0 %v4040_v2  ;;  %v4099_v1 = vld [vmem:[%s5187_s1 + $0x580] sm:$0xff]   ;;  %v4100_v2 = vld [vmem:[%s5187_s1 + $0x548] sm:$0xff]  }
  0x72   :  { %3682 = vmatprep.subr.bf16.mxu1 %v4041_v3  ;;  %v4101_v3 = vld [vmem:[%s5187_s1 + $0x5c8] sm:$0xff]  }
  0x74   :  { %3661 = vmatpush3.bf16.msra.mxu0 %v4042_v4  ;;  %v4102_v4 = vld [vmem:[%s5187_s1 + $0x508] sm:$0xff]  }
  0x75   :  { %3683 = vmatpush3.bf16.msra.mxu1 %v4043_v5  ;;  %3662 = vmatprep.subr.bf16.mxu0 %v4044_v6  ;;  %v4103_v5 = vld [vmem:[%s5187_s1 + $0x588] sm:$0xff]   ;;  %v4104_v6 = vld [vmem:[%s5187_s1 + $0x550] sm:$0xff]  }
  0x76   :  { %3684 = vmatprep.subr.bf16.mxu1 %v4045_v7  ;;  %v4105_v7 = vld [vmem:[%s5187_s1 + $0x5d0] sm:$0xff]  }
  0x78   :  { %3663 = vmatpush3.bf16.msra.mxu0 %v4046_v8  ;;  %v4106_v8 = vld [vmem:[%s5187_s1 + $0x510] sm:$0xff]  }
  0x79   :  { %3685 = vmatpush3.bf16.msra.mxu1 %v4047_v9  ;;  %3664 = vmatprep.subr.bf16.mxu0 %v4048_v10  ;;  %v4107_v9 = vld [vmem:[%s5187_s1 + $0x590] sm:$0xff]   ;;  %v4108_v10 = vld [vmem:[%s5187_s1 + $0x558] sm:$0xff]  }
  0x7a   :  { %3686 = vmatprep.subr.bf16.mxu1 %v4049_v11  ;;  %v4109_v11 = vld [vmem:[%s5187_s1 + $0x5d8] sm:$0xff]  }
  0x7c   :  { %3665 = vmatpush3.bf16.msra.mxu0 %v4050_v12  ;;  %v4110_v12 = vld [vmem:[%s5187_s1 + $0x518] sm:$0xff]  }
  0x7d   :  { %3687 = vmatpush3.bf16.msra.mxu1 %v4051_v13  ;;  %3666 = vmatprep.subr.bf16.mxu0 %v4052_v14  ;;  %v4111_v13 = vld [vmem:[%s5187_s1 + $0x598] sm:$0xff]   ;;  %v4112_v14 = vld [vmem:[%s5187_s1 + $0x560] sm:$0xff]  }
  0x7e   :  { %3688 = vmatprep.subr.bf16.mxu1 %v4053_v15  ;;  %v4113_v15 = vld [vmem:[%s5187_s1 + $0x5e0] sm:$0xff]  }
  0x80   :  { %3667 = vmatpush3.bf16.msra.mxu0 %v4054_v16  ;;  %v4114_v16 = vld [vmem:[%s5187_s1 + $0x520] sm:$0xff]  }
  0x81   :  { %3689 = vmatpush3.bf16.msra.mxu1 %v4055_v17  ;;  %3696 = vmatprep.subr.bf16.mxu0 %v4060_v23  ;;  %v4115_v17 = vld [vmem:[%s5187_s1 + $0x5a0] sm:$0xff]   ;;  %v4121_v23 = vld [vmem:[%s5187_s1 + $0x5f0] sm:$0xff]  }
  0x82   :  { %3718 = vmatprep.subr.bf16.mxu1 %v4061_v25  ;;  %v4123_v25 = vld [vmem:[%s5187_s1 + $0x5b0] sm:$0xff]  }
  0x83   :  { %2743 = vmatmul.mubr.bf16.vlgmr.msra.gmra.mrb[12].mxu0 %v3208_v20  ;;  %v4118_v20 = vld [vmem:[%s5187_s1 + $0x528] sm:$0xff]  }
  0x84   :  { %2783 = vmatmul.mubr.bf16.vlgmr.msra.gmra.mrb[12].mxu1 %v3210_v22  ;;  %3697 = vmatpush3.bf16.msra.mxu0 %v4062_v26  ;;  %v4120_v22 = vld [vmem:[%s5187_s1 + $0x570] sm:$0xff]   ;;  %v4124_v26 = vld [vmem:[%s5187_s1 + $0x578] sm:$0xff]  }
  0x85   :  { %3719 = vmatpush3.bf16.msra.mxu1 %v4063_v27  ;;  %3698 = vmatprep.subr.bf16.mxu0 %v4064_v28  ;;  %v4125_v27 = vld [vmem:[%s5187_s1 + $0x5f8] sm:$0xff]  }
  0x86   :  { %3720 = vmatprep.subr.bf16.mxu1 %v4065_v29  ;;  %2822 = vmatprep.mubr.bf16.mxu0 %v3213_v58  ;;  %v4126_v28 = vld [vmem:[%s5187_s1 + $0x538] sm:$0xff]   ;;  %v4154_v58 = vld [vmem:[%s5187_s1 + $0x628] sm:$0xff]  }
  0x87   :  { %2862 = vmatprep.mubr.bf16.mxu1 %v3215_v61  ;;  %v4127_v29 = vld [vmem:[%s5187_s1 + $0x5b8] sm:$0xff]   ;;  %v4157_v61 = vld [vmem:[%s5187_s1 + $0x6f0] sm:$0xff]  }
  0x88   :  { %3699 = vmatpush3.bf16.msra.mxu0 %v4066_v30  ;;  %v25_v30 = vld [vmem:[%s5188_s0 + $0x50] sm:$0xff] }
  0x89   :  { %3721 = vmatpush3.bf16.msra.mxu1 %v4067_v31  ;;  %3700 = vmatprep.subr.bf16.mxu0 %v4068_v32  ;;  %v26_v31 = vld [vmem:[%s5188_s0 + $0x58] sm:$0xff]  ;;  %v3216_v32 = vcombine.low %v25_v30, %v25_v30 }
  0x8a   :  { %3722 = vmatprep.subr.bf16.mxu1 %v4069_v33  ;;  %v3217_v33 = vcombine.high %v25_v30, %v25_v30  ;;  %v4187_v30 = vld [vmem:[%s5187_s1 + $0x7a0] sm:$0xff]  }
  0x8c   :  { %3701 = vmatpush3.bf16.msra.mxu0 %v4070_v34  ;;  %v3218_v34 = vcombine.low %v26_v31, %v26_v31 }
  0x8d   :  { %3723 = vmatpush3.bf16.msra.mxu1 %v4071_v35  ;;  %3702 = vmatprep.subr.bf16.mxu0 %v4072_v36  ;;  %v3219_v35 = vcombine.high %v26_v31, %v26_v31  ;;  %v4132_v36 = vld [vmem:[%s5187_s1 + $0x640] sm:$0xff]  }
  0x8e   :  { %3724 = vmatprep.subr.bf16.mxu1 %v4073_v37  ;;  %v4133_v37 = vld [vmem:[%s5187_s1 + $0x6c0] sm:$0xff]  }
  0x90   :  { %3703 = vmatpush3.bf16.msra.mxu0 %v4074_v38  ;;  %v4134_v38 = vld [vmem:[%s5187_s1 + $0x600] sm:$0xff]  }
  0x91   :  { %3725 = vmatpush3.bf16.msra.mxu1 %v4075_v39  ;;  %3704 = vmatprep.subr.bf16.mxu0 %v4076_v40  ;;  %v4135_v39 = vld [vmem:[%s5187_s1 + $0x680] sm:$0xff]   ;;  %v4136_v40 = vld [vmem:[%s5187_s1 + $0x648] sm:$0xff]  }
  0x92   :  { %3726 = vmatprep.subr.bf16.mxu1 %v4077_v41  ;;  %v4137_v41 = vld [vmem:[%s5187_s1 + $0x6c8] sm:$0xff]  }
  0x94   :  { %3705 = vmatpush3.bf16.msra.mxu0 %v4078_v42  ;;  %v4138_v42 = vld [vmem:[%s5187_s1 + $0x608] sm:$0xff]  }
  0x95   :  { %3727 = vmatpush3.bf16.msra.mxu1 %v4079_v43  ;;  %3706 = vmatprep.subr.bf16.mxu0 %v4080_v44  ;;  %v4139_v43 = vld [vmem:[%s5187_s1 + $0x688] sm:$0xff]   ;;  %v4140_v44 = vld [vmem:[%s5187_s1 + $0x650] sm:$0xff]  }
  0x96   :  { %3728 = vmatprep.subr.bf16.mxu1 %v4081_v45  ;;  %v4141_v45 = vld [vmem:[%s5187_s1 + $0x6d0] sm:$0xff]  }
  0x98   :  { %3707 = vmatpush3.bf16.msra.mxu0 %v4082_v46  ;;  %v4142_v46 = vld [vmem:[%s5187_s1 + $0x610] sm:$0xff]  }
  0x99   :  { %3729 = vmatpush3.bf16.msra.mxu1 %v4083_v47  ;;  %3708 = vmatprep.subr.bf16.mxu0 %v4084_v48  ;;  %v4143_v47 = vld [vmem:[%s5187_s1 + $0x690] sm:$0xff]   ;;  %v4144_v48 = vld [vmem:[%s5187_s1 + $0x658] sm:$0xff]  }
  0x9a   :  { %3730 = vmatprep.subr.bf16.mxu1 %v4085_v49  ;;  %v4145_v49 = vld [vmem:[%s5187_s1 + $0x6d8] sm:$0xff]  }
  0x9c   :  { %3709 = vmatpush3.bf16.msra.mxu0 %v4086_v50  ;;  %v4146_v50 = vld [vmem:[%s5187_s1 + $0x618] sm:$0xff]  }
  0x9d   :  { %3731 = vmatpush3.bf16.msra.mxu1 %v4087_v51  ;;  %3710 = vmatprep.subr.bf16.mxu0 %v4088_v52  ;;  %v4147_v51 = vld [vmem:[%s5187_s1 + $0x698] sm:$0xff]   ;;  %v4148_v52 = vld [vmem:[%s5187_s1 + $0x660] sm:$0xff]  }
  0x9e   :  { %3732 = vmatprep.subr.bf16.mxu1 %v4089_v53  ;;  %v4149_v53 = vld [vmem:[%s5187_s1 + $0x6e0] sm:$0xff]  }
  0xa0   :  { %3711 = vmatpush3.bf16.msra.mxu0 %v4090_v54  ;;  %v4150_v54 = vld [vmem:[%s5187_s1 + $0x620] sm:$0xff]  }
  0xa1   :  { %3733 = vmatpush3.bf16.msra.mxu1 %v4091_v55  ;;  %3740 = vmatprep.subr.bf16.mxu0 %v4096_v62  ;;  %v4151_v55 = vld [vmem:[%s5187_s1 + $0x6a0] sm:$0xff]   ;;  %v4158_v62 = vld [vmem:[%s5187_s1 + $0x630] sm:$0xff]  }
  0xa2   :  { %3762 = vmatprep.subr.bf16.mxu1 %v4097_v63  ;;  %v4159_v63 = vld [vmem:[%s5187_s1 + $0x6b0] sm:$0xff]  }
  0xa3   :  { %2823 = vmatmul.mubr.bf16.vlgmr.msra.gmra.mrb[16].mxu0 %v3212_v57  ;;  %v4153_v57 = vld [vmem:[%s5187_s1 + $0x6e8] sm:$0xff]  }
  0xa4   :  { %2863 = vmatmul.mubr.bf16.vlgmr.msra.gmra.mrb[16].mxu1 %v3214_v60  ;;  %3741 = vmatpush3.bf16.msra.mxu0 %v4098_v0  ;;  %v4156_v60 = vld [vmem:[%s5187_s1 + $0x670] sm:$0xff]   ;;  %v4160_v0 = vld [vmem:[%s5187_s1 + $0x678] sm:$0xff]  }
  0xa5   :  { %3763 = vmatpush3.bf16.msra.mxu1 %v4099_v1  ;;  %3742 = vmatprep.subr.bf16.mxu0 %v4100_v2  ;;  %v4161_v1 = vld [vmem:[%s5187_s1 + $0x6f8] sm:$0xff]  }
  0xa6   :  { %3764 = vmatprep.subr.bf16.mxu1 %v4101_v3  ;;  %2902 = vmatprep.mubr.bf16.mxu0 %v3217_v33  ;;  %v4162_v2 = vld [vmem:[%s5187_s1 + $0x638] sm:$0xff]  }
  0xa7   :  { %2942 = vmatprep.mubr.bf16.mxu1 %v3219_v35  ;;  %v4163_v3 = vld [vmem:[%s5187_s1 + $0x6b8] sm:$0xff]  }
  0xa8   :  { %3743 = vmatpush3.bf16.msra.mxu0 %v4102_v4  ;;  %v27_v4 = vld [vmem:[%s5188_s0 + $0x60] sm:$0xff] }
  0xa9   :  { %3765 = vmatpush3.bf16.msra.mxu1 %v4103_v5  ;;  %3744 = vmatprep.subr.bf16.mxu0 %v4104_v6  ;;  %v28_v5 = vld [vmem:[%s5188_s0 + $0x68] sm:$0xff]  ;;  %v3220_v6 = vcombine.low %v27_v4, %v27_v4 }
  0xaa   :  { %3766 = vmatprep.subr.bf16.mxu1 %v4105_v7  ;;  %v3221_v7 = vcombine.high %v27_v4, %v27_v4  ;;  %v4211_v4 = vld [vmem:[%s5187_s1 + $0x888] sm:$0xff]  }
  0xac   :  { %3745 = vmatpush3.bf16.msra.mxu0 %v4106_v8  ;;  %v3222_v8 = vcombine.low %v28_v5, %v28_v5 }
  0xad   :  { %3767 = vmatpush3.bf16.msra.mxu1 %v4107_v9  ;;  %3746 = vmatprep.subr.bf16.mxu0 %v4108_v10  ;;  %v4168_v9 = vld [vmem:[%s5187_s1 + $0x740] sm:$0xff]   ;;  %v3223_v10 = vcombine.high %v28_v5, %v28_v5  ;;  %v4212_v5 = vld [vmem:[%s5187_s1 + $0x850] sm:$0xff]  }
  0xae   :  { %3768 = vmatprep.subr.bf16.mxu1 %v4109_v11  ;;  %v4169_v11 = vld [vmem:[%s5187_s1 + $0x7c0] sm:$0xff]  }
  0xb0   :  { %3747 = vmatpush3.bf16.msra.mxu0 %v4110_v12  ;;  %v4170_v12 = vld [vmem:[%s5187_s1 + $0x700] sm:$0xff]  }
  0xb1   :  { %3769 = vmatpush3.bf16.msra.mxu1 %v4111_v13  ;;  %3748 = vmatprep.subr.bf16.mxu0 %v4112_v14  ;;  %v4171_v13 = vld [vmem:[%s5187_s1 + $0x780] sm:$0xff]   ;;  %v4172_v14 = vld [vmem:[%s5187_s1 + $0x748] sm:$0xff]  }
  0xb2   :  { %3770 = vmatprep.subr.bf16.mxu1 %v4113_v15  ;;  %v4173_v15 = vld [vmem:[%s5187_s1 + $0x7c8] sm:$0xff]  }
  0xb4   :  { %3749 = vmatpush3.bf16.msra.mxu0 %v4114_v16  ;;  %v4174_v16 = vld [vmem:[%s5187_s1 + $0x708] sm:$0xff]  }
  0xb5   :  { %3771 = vmatpush3.bf16.msra.mxu1 %v4115_v17  ;;  %3750 = vmatprep.subr.bf16.mxu0 %v4116_v18  ;;  %v4175_v17 = vld [vmem:[%s5187_s1 + $0x788] sm:$0xff]   ;;  %v4176_v18 = vld [vmem:[%s5187_s1 + $0x750] sm:$0xff]  }
  0xb6   :  { %3772 = vmatprep.subr.bf16.mxu1 %v4117_v19  ;;  %v4177_v19 = vld [vmem:[%s5187_s1 + $0x7d0] sm:$0xff]  }
  0xb8   :  { %3751 = vmatpush3.bf16.msra.mxu0 %v4118_v20  ;;  %v4178_v20 = vld [vmem:[%s5187_s1 + $0x710] sm:$0xff]  }
  0xb9   :  { %3773 = vmatpush3.bf16.msra.mxu1 %v4119_v21  ;;  %3752 = vmatprep.subr.bf16.mxu0 %v4120_v22  ;;  %v4179_v21 = vld [vmem:[%s5187_s1 + $0x790] sm:$0xff]   ;;  %v4180_v22 = vld [vmem:[%s5187_s1 + $0x758] sm:$0xff]  }
  0xba   :  { %3774 = vmatprep.subr.bf16.mxu1 %v4121_v23  ;;  %v4181_v23 = vld [vmem:[%s5187_s1 + $0x7d8] sm:$0xff]  }
  0xbc   :  { %3753 = vmatpush3.bf16.msra.mxu0 %v4122_v24  ;;  %v4182_v24 = vld [vmem:[%s5187_s1 + $0x718] sm:$0xff]  }
  0xbd   :  { %3775 = vmatpush3.bf16.msra.mxu1 %v4123_v25  ;;  %3754 = vmatprep.subr.bf16.mxu0 %v4124_v26  ;;  %v4183_v25 = vld [vmem:[%s5187_s1 + $0x798] sm:$0xff]   ;;  %v4184_v26 = vld [vmem:[%s5187_s1 + $0x760] sm:$0xff]  }
  0xbe   :  { %3776 = vmatprep.subr.bf16.mxu1 %v4125_v27  ;;  %v4185_v27 = vld [vmem:[%s5187_s1 + $0x7e0] sm:$0xff]  }
  0xc0   :  { %3755 = vmatpush3.bf16.msra.mxu0 %v4126_v28  ;;  %v4186_v28 = vld [vmem:[%s5187_s1 + $0x720] sm:$0xff]  }
  0xc1   :  { %3777 = vmatpush3.bf16.msra.mxu1 %v4127_v29  ;;  %3784 = vmatprep.subr.bf16.mxu0 %v4132_v36 }
  0xc2   :  { %3806 = vmatprep.subr.bf16.mxu1 %v4133_v37  ;;  %v4188_v37 = vld [vmem:[%s5187_s1 + $0x768] sm:$0xff]  }
  0xc3   :  { %2903 = vmatmul.mubr.bf16.vlgmr.msra.gmra.mrb[20].mxu0 %v3216_v32  ;;  %v3195_v32 = vld [vmem:[%s5189_s2] ss:$0 sm:$0xff] }
  0xc4   :  { %2943 = vmatmul.mubr.bf16.vlgmr.msra.gmra.mrb[20].mxu1 %v3218_v34  ;;  %3785 = vmatpush3.bf16.msra.mxu0 %v4134_v38 }
  0xc5   :  { %3807 = vmatpush3.bf16.msra.mxu1 %v4135_v39  ;;  %3786 = vmatprep.subr.bf16.mxu0 %v4136_v40  ;;  %v4189_v39 = vld [vmem:[%s5187_s1 + $0x7e8] sm:$0xff]  }
  0xc6   :  { %3808 = vmatprep.subr.bf16.mxu1 %v4137_v41  ;;  %2982 = vmatprep.mubr.bf16.mxu0 %v3221_v7  ;;  %v4214_v7 = vld [vmem:[%s5187_s1 + $0x810] sm:$0xff]  }
  0xc7   :  { %3022 = vmatprep.mubr.bf16.mxu1 %v3223_v10  ;;  %v4217_v10 = vld [vmem:[%s5187_s1 + $0x8d8] sm:$0xff]  }
  0xc8   :  { %3787 = vmatpush3.bf16.msra.mxu0 %v4138_v42  ;;  %v4190_v42 = vld [vmem:[%s5187_s1 + $0x728] sm:$0xff]  }
  0xc9   :  { %3809 = vmatpush3.bf16.msra.mxu1 %v4139_v43  ;;  %3788 = vmatprep.subr.bf16.mxu0 %v4140_v44  ;;  %v4191_v44 = vld [vmem:[%s5187_s1 + $0x7a8] sm:$0xff]  }
  0xca   :  { %3810 = vmatprep.subr.bf16.mxu1 %v4141_v45 }
  0xcc   :  { %3789 = vmatpush3.bf16.msra.mxu0 %v4142_v46 }
  0xcd   :  { %3811 = vmatpush3.bf16.msra.mxu1 %v4143_v47  ;;  %3790 = vmatprep.subr.bf16.mxu0 %v4144_v48  ;;  %v4192_v47 = vld [vmem:[%s5187_s1 + $0x770] sm:$0xff]  }
  0xce   :  { %3812 = vmatprep.subr.bf16.mxu1 %v4145_v49  ;;  %v4193_v48 = vld [vmem:[%s5187_s1 + $0x7f0] sm:$0xff]  }
  0xcf   :  { %v4194_v49 = vld [vmem:[%s5187_s1 + $0x730] sm:$0xff]  }
  0xd0   :  { %3791 = vmatpush3.bf16.msra.mxu0 %v4146_v50  ;;  %v4195_v50 = vld [vmem:[%s5187_s1 + $0x7b0] sm:$0xff]  }
  0xd1   :  { %3813 = vmatpush3.bf16.msra.mxu1 %v4147_v51  ;;  %3792 = vmatprep.subr.bf16.mxu0 %v4148_v52  ;;  %v4196_v51 = vld [vmem:[%s5187_s1 + $0x778] sm:$0xff]  }
  0xd2   :  { %3814 = vmatprep.subr.bf16.mxu1 %v4149_v53  ;;  %v4197_v52 = vld [vmem:[%s5187_s1 + $0x7f8] sm:$0xff]  }
  0xd3   :  { %v4198_v53 = vld [vmem:[%s5187_s1 + $0x738] sm:$0xff]  }
  0xd4   :  { %3793 = vmatpush3.bf16.msra.mxu0 %v4150_v54  ;;  %v4199_v54 = vld [vmem:[%s5187_s1 + $0x7b8] sm:$0xff]  }
  0xd5   :  { %3815 = vmatpush3.bf16.msra.mxu1 %v4151_v55  ;;  %3794 = vmatprep.subr.bf16.mxu0 %v4152_v56  ;;  %v29_v55 = vld [vmem:[%s5188_s0 + $0x70] sm:$0xff]  ;;  %v30_v56 = vld [vmem:[%s5188_s0 + $0x78] sm:$0xff] }
  0xd6   :  { %3816 = vmatprep.subr.bf16.mxu1 %v4153_v57  ;;  %v3224_v57 = vcombine.low %v29_v55, %v29_v55 }
  0xd8   :  { %3795 = vmatpush3.bf16.msra.mxu0 %v4154_v58  ;;  %v3225_v58 = vcombine.high %v29_v55, %v29_v55 }
  0xd9   :  { %3817 = vmatpush3.bf16.msra.mxu1 %v4155_v59  ;;  %3796 = vmatprep.subr.bf16.mxu0 %v4156_v60  ;;  %v3226_v59 = vcombine.low %v30_v56, %v30_v56  ;;  %v3227_v60 = vcombine.high %v30_v56, %v30_v56 }
  0xda   :  { %3818 = vmatprep.subr.bf16.mxu1 %v4157_v61  ;;  %v4204_v61 = vld [vmem:[%s5187_s1 + $0x840] sm:$0xff]  }
  0xdc   :  { %3797 = vmatpush3.bf16.msra.mxu0 %v4158_v62  ;;  %v4205_v62 = vld [vmem:[%s5187_s1 + $0x8c0] sm:$0xff]  }
  0xdd   :  { %3819 = vmatpush3.bf16.msra.mxu1 %v4159_v63  ;;  %3798 = vmatprep.subr.bf16.mxu0 %v4160_v0  ;;  %v4206_v63 = vld [vmem:[%s5187_s1 + $0x800] sm:$0xff]  }
  0xde   :  { %3820 = vmatprep.subr.bf16.mxu1 %v4161_v1  ;;  %v4207_v0 = vld [vmem:[%s5187_s1 + $0x880] sm:$0xff]   ;;  %v4208_v1 = vld [vmem:[%s5187_s1 + $0x848] sm:$0xff]  }
  0xe0   :  { %3799 = vmatpush3.bf16.msra.mxu0 %v4162_v2  ;;  %v4209_v2 = vld [vmem:[%s5187_s1 + $0x8c8] sm:$0xff]  }
  0xe1   :  { %3821 = vmatpush3.bf16.msra.mxu1 %v4163_v3  ;;  %3828 = vmatprep.subr.bf16.mxu0 %v4168_v9  ;;  %v4210_v3 = vld [vmem:[%s5187_s1 + $0x808] sm:$0xff]   ;;  %v4216_v9 = vld [vmem:[%s5187_s1 + $0x858] sm:$0xff]  }
  0xe2   :  { %3850 = vmatprep.subr.bf16.mxu1 %v4169_v11  ;;  %v4218_v11 = vld [vmem:[%s5187_s1 + $0x818] sm:$0xff]  }
  0xe3   :  { %2983 = vmatmul.mubr.bf16.vlgmr.msra.gmra.mrb[24].mxu0 %v3220_v6  ;;  %v4213_v6 = vld [vmem:[%s5187_s1 + $0x8d0] sm:$0xff]  }
  0xe4   :  { %3023 = vmatmul.mubr.bf16.vlgmr.msra.gmra.mrb[24].mxu1 %v3222_v8  ;;  %3829 = vmatpush3.bf16.msra.mxu0 %v4170_v12  ;;  %v4215_v8 = vld [vmem:[%s5187_s1 + $0x890] sm:$0xff]   ;;  %v4219_v12 = vld [vmem:[%s5187_s1 + $0x898] sm:$0xff]  }
  0xe5   :  { %3851 = vmatpush3.bf16.msra.mxu1 %v4171_v13  ;;  %3830 = vmatprep.subr.bf16.mxu0 %v4172_v14  ;;  %v4220_v13 = vld [vmem:[%s5187_s1 + $0x860] sm:$0xff]  }
  0xe6   :  { %3852 = vmatprep.subr.bf16.mxu1 %v4173_v15  ;;  %3062 = vmatprep.mubr.bf16.mxu0 %v3225_v58  ;;  %v4221_v14 = vld [vmem:[%s5187_s1 + $0x8e0] sm:$0xff]  }
  0xe7   :  { %3102 = vmatprep.mubr.bf16.mxu1 %v3227_v60  ;;  %v4222_v15 = vld [vmem:[%s5187_s1 + $0x820] sm:$0xff]  }
  0xe8   :  { %3831 = vmatpush3.bf16.msra.mxu0 %v4174_v16 }
  0xe9   :  { %3853 = vmatpush3.bf16.msra.mxu1 %v4175_v17  ;;  %3832 = vmatprep.subr.bf16.mxu0 %v4176_v18  ;;  %v4223_v17 = vld [vmem:[%s5187_s1 + $0x8a0] sm:$0xff]  }
  0xea   :  { %3854 = vmatprep.subr.bf16.mxu1 %v4177_v19 }
  0xec   :  { %3833 = vmatpush3.bf16.msra.mxu0 %v4178_v20 }
  0xed   :  { %3855 = vmatpush3.bf16.msra.mxu1 %v4179_v21  ;;  %3834 = vmatprep.subr.bf16.mxu0 %v4180_v22 }
  0xee   :  { %3856 = vmatprep.subr.bf16.mxu1 %v4181_v23  ;;  %v4224_v23 = vld [vmem:[%s5187_s1 + $0x868] sm:$0xff]  }
  0xf0   :  { %3835 = vmatpush3.bf16.msra.mxu0 %v4182_v24 }
  0xf1   :  { %3857 = vmatpush3.bf16.msra.mxu1 %v4183_v25  ;;  %3836 = vmatprep.subr.bf16.mxu0 %v4184_v26  ;;  %v4225_v25 = vld [vmem:[%s5187_s1 + $0x8e8] sm:$0xff]  }
  0xf2   :  { %3858 = vmatprep.subr.bf16.mxu1 %v4185_v27 }
  0xf4   :  { %3837 = vmatpush3.bf16.msra.mxu0 %v4186_v28  ;;  %v4226_v28 = vld [vmem:[%s5187_s1 + $0x828] sm:$0xff]  }
  0xf5   :  { %3859 = vmatpush3.bf16.msra.mxu1 %v4187_v30  ;;  %3838 = vmatprep.subr.bf16.mxu0 %v4188_v37  ;;  %v4227_v30 = vld [vmem:[%s5187_s1 + $0x8a8] sm:$0xff]   ;;  %v4232_v37 = vld [vmem:[%s5187_s1 + $0x878] sm:$0xff]  }
  0xf6   :  { %v3536_v29 = vpop.f32.mrb[0].mxu0  ;;  %3860 = vmatprep.subr.bf16.mxu1 %v4189_v39  ;;  %v4234_v39 = vld [vmem:[%s5187_s1 + $0x838] sm:$0xff]  }
  0xf7   :  { %v3558_v31 = vpop.f32.mrb[0].mxu1  ;;  %v3537_v33 = vpop.f32.mrb[1].mxu0 }
  0xf8   :  { %v3559_v34 = vpop.f32.mrb[1].mxu1  ;;  %v3538_v35 = vadd.f32 %v3537_v33, %v3536_v29  ;;  %v3539_v38 = vpop.f32.mrb[2].mxu0  ;;  %3839 = vmatpush3.bf16.msra.mxu0 %v4190_v42  ;;  %v4228_v33 = vld [vmem:[%s5187_s1 + $0x870] sm:$0xff]   ;;  %v32_v42 = vld [vmem:[%s5188_s0 + $0x88] sm:$0xff] }
  0xf9   :  { %v3560_v36 = vadd.f32 %v3559_v34, %v3558_v31  ;;  %v3561_v40 = vpop.f32.mrb[2].mxu1  ;;  %v3540_v43 = vpop.f32.mrb[3].mxu0  ;;  %3861 = vmatpush3.bf16.msra.mxu1 %v4191_v44  ;;  %3840 = vmatprep.subr.bf16.mxu0 %v4192_v47  ;;  %v4229_v34 = vld [vmem:[%s5187_s1 + $0x8f0] sm:$0xff]   ;;  %v4233_v38 = vld [vmem:[%s5187_s1 + $0x8f8] sm:$0xff]  }
  0xfa   :  { %v2505_v41 = vadd.f32 %v3538_v35, %v3195_v32  ;;  %v3562_v45 = vpop.f32.mrb[3].mxu1  ;;  %3862 = vmatprep.subr.bf16.mxu1 %v4193_v48  ;;  %v4230_v35 = vld [vmem:[%s5187_s1 + $0x830] sm:$0xff]   ;;  %v4235_v40 = vld [vmem:[%s5187_s1 + $0x8b8] sm:$0xff]  }
  0xfb   :  { %v3230_v45 = vcombine.low %v32_v42, %v32_v42 }
  0xfc   :  { %v5049_v46 = vadd.f32 %v3560_v36, %v2505_v41  ;;  %3841 = vmatpush3.bf16.msra.mxu0 %v4194_v49  ;;  %v4231_v36 = vld [vmem:[%s5187_s1 + $0x8b0] sm:$0xff]   ;;  %v31_v41 = vld [vmem:[%s5188_s0 + $0x80] sm:$0xff] }
  0xfd   :  { %3863 = vmatpush3.bf16.msra.mxu1 %v4195_v50  ;;  %3842 = vmatprep.subr.bf16.mxu0 %v4196_v51  ;;  %v3228_v43 = vcombine.low %v31_v41, %v31_v41  ;;  %v3229_v44 = vcombine.high %v31_v41, %v31_v41 }
  0xfe   :  { %3864 = vmatprep.subr.bf16.mxu1 %v4197_v52 }
 0x100   :  { %3843 = vmatpush3.bf16.msra.mxu0 %v4198_v53 }
 0x101   :  { %3865 = vmatpush3.bf16.msra.mxu1 %v4199_v54  ;;  %3872 = vmatprep.subr.bf16.mxu0 %v4204_v61 }
 0x102   :  { %3894 = vmatprep.subr.bf16.mxu1 %v4205_v62 }
 0x103   :  { %3063 = vmatmul.mubr.bf16.vlgmr.msra.gmra.mrb[28].mxu0 %v3224_v57 }
 0x104   :  { %3103 = vmatmul.mubr.bf16.vlgmr.msra.gmra.mrb[28].mxu1 %v3226_v59  ;;  %3873 = vmatpush3.bf16.msra.mxu0 %v4206_v63 }
 0x105   :  { %3895 = vmatpush3.bf16.msra.mxu1 %v4207_v0  ;;  %3874 = vmatprep.subr.bf16.mxu0 %v4208_v1 }
 0x106   :  { %3896 = vmatprep.subr.bf16.mxu1 %v4209_v2  ;;  %3142 = vmatprep.mubr.bf16.mxu0 %v3229_v44 }
 0x108   :  { %3875 = vmatpush3.bf16.msra.mxu0 %v4210_v3 }
 0x109   :  { %3897 = vmatpush3.bf16.msra.mxu1 %v4211_v4  ;;  %3876 = vmatprep.subr.bf16.mxu0 %v4212_v5 }
 0x10a   :  { %3898 = vmatprep.subr.bf16.mxu1 %v4213_v6 }
 0x10c   :  { %3877 = vmatpush3.bf16.msra.mxu0 %v4214_v7 }
 0x10d   :  { %3899 = vmatpush3.bf16.msra.mxu1 %v4215_v8  ;;  %3878 = vmatprep.subr.bf16.mxu0 %v4216_v9 }
 0x10e   :  { %3900 = vmatprep.subr.bf16.mxu1 %v4217_v10 }
 0x110   :  { %3879 = vmatpush3.bf16.msra.mxu0 %v4218_v11 }
 0x111   :  { %3901 = vmatpush3.bf16.msra.mxu1 %v4219_v12  ;;  %3880 = vmatprep.subr.bf16.mxu0 %v4220_v13 }
 0x112   :  { %3902 = vmatprep.subr.bf16.mxu1 %v4221_v14 }
 0x114   :  { %3881 = vmatpush3.bf16.msra.mxu0 %v4222_v15 }
 0x115   :  { %3903 = vmatpush3.bf16.msra.mxu1 %v4223_v17  ;;  %3882 = vmatprep.subr.bf16.mxu0 %v4224_v23 }
 0x116   :  { %v3580_v16 = vpop.f32.mrb[4].mxu0  ;;  %3904 = vmatprep.subr.bf16.mxu1 %v4225_v25 }
 0x117   :  { %v3602_v18 = vpop.f32.mrb[4].mxu1  ;;  %v3581_v19 = vpop.f32.mrb[5].mxu0 }
 0x118   :  { %v3603_v20 = vpop.f32.mrb[5].mxu1  ;;  %v3582_v21 = vadd.f32 %v3581_v19, %v3580_v16  ;;  %v3583_v24 = vpop.f32.mrb[6].mxu0  ;;  %3883 = vmatpush3.bf16.msra.mxu0 %v4226_v28 }
 0x119   :  { %v3604_v22 = vadd.f32 %v3603_v20, %v3602_v18  ;;  %v3605_v26 = vpop.f32.mrb[6].mxu1  ;;  %v3584_v29 = vpop.f32.mrb[7].mxu0  ;;  %3905 = vmatpush3.bf16.msra.mxu1 %v4227_v30  ;;  %3884 = vmatprep.subr.bf16.mxu0 %v4228_v33 }
 0x11a   :  { %v2585_v27 = vadd.f32 %v3582_v21, %v5049_v46  ;;  %v3606_v31 = vpop.f32.mrb[7].mxu1  ;;  %3906 = vmatprep.subr.bf16.mxu1 %v4229_v34  ;;  %v3231_v46 = vcombine.high %v32_v42, %v32_v42 }
 0x11c   :  { %v2625_v32 = vadd.f32 %v3604_v22, %v2585_v27  ;;  %3885 = vmatpush3.bf16.msra.mxu0 %v4230_v35  ;;  %3182 = vmatprep.mubr.bf16.mxu1 %v3231_v46 }
 0x11d   :  { %3907 = vmatpush3.bf16.msra.mxu1 %v4231_v36  ;;  %3886 = vmatprep.subr.bf16.mxu0 %v4232_v37 }
 0x11e   :  { %3908 = vmatprep.subr.bf16.mxu1 %v4233_v38 }
 0x120   :  { %3887 = vmatpush3.bf16.msra.mxu0 %v4234_v39 }
 0x121   :  { %3909 = vmatpush3.bf16.msra.mxu1 %v4235_v40 }
 0x123   :  { %3143 = vmatmul.mubr.bf16.vlgmr.msra.gmra.mrb[32].mxu0 %v3228_v43 }
 0x124   :  { %3183 = vmatmul.mubr.bf16.vlgmr.msra.gmra.mrb[32].mxu1 %v3230_v45 }
 0x136   :  { %v3624_v47 = vpop.f32.mrb[8].mxu0 }
 0x137   :  { %v3646_v48 = vpop.f32.mrb[8].mxu1  ;;  %v3625_v49 = vpop.f32.mrb[9].mxu0 }
 0x138   :  { %v3626_v50 = vadd.f32 %v3625_v49, %v3624_v47  ;;  %v3647_v51 = vpop.f32.mrb[9].mxu1  ;;  %v3627_v52 = vpop.f32.mrb[10].mxu0 }
 0x139   :  { %v3648_v53 = vadd.f32 %v3647_v51, %v3646_v48  ;;  %v3649_v54 = vpop.f32.mrb[10].mxu1  ;;  %v3628_v55 = vpop.f32.mrb[11].mxu0 }
 0x13a   :  { %v2665_v56 = vadd.f32 %v3626_v50, %v2625_v32  ;;  %v3650_v57 = vpop.f32.mrb[11].mxu1 }
 0x13c   :  { %v2705_v58 = vadd.f32 %v3648_v53, %v2665_v56 }
 0x156   :  { %v3668_v59 = vpop.f32.mrb[12].mxu0 }
 0x157   :  { %v3690_v60 = vpop.f32.mrb[12].mxu1  ;;  %v3669_v61 = vpop.f32.mrb[13].mxu0 }
 0x158   :  { %v3670_v62 = vadd.f32 %v3669_v61, %v3668_v59  ;;  %v3691_v63 = vpop.f32.mrb[13].mxu1  ;;  %v3671_v0 = vpop.f32.mrb[14].mxu0 }
 0x159   :  { %v3692_v1 = vadd.f32 %v3691_v63, %v3690_v60  ;;  %v3693_v2 = vpop.f32.mrb[14].mxu1  ;;  %v3672_v3 = vpop.f32.mrb[15].mxu0 }
 0x15a   :  { %v2745_v4 = vadd.f32 %v3670_v62, %v2705_v58  ;;  %v3694_v5 = vpop.f32.mrb[15].mxu1 }
 0x15c   :  { %v2785_v6 = vadd.f32 %v3692_v1, %v2745_v4 }
 0x176   :  { %v3712_v7 = vpop.f32.mrb[16].mxu0 }
 0x177   :  { %v3734_v8 = vpop.f32.mrb[16].mxu1  ;;  %v3713_v9 = vpop.f32.mrb[17].mxu0 }
 0x178   :  { %v3735_v10 = vpop.f32.mrb[17].mxu1  ;;  %v3714_v11 = vadd.f32 %v3713_v9, %v3712_v7  ;;  %v3715_v13 = vpop.f32.mrb[18].mxu0 }
 0x179   :  { %v3736_v12 = vadd.f32 %v3735_v10, %v3734_v8  ;;  %v3737_v14 = vpop.f32.mrb[18].mxu1  ;;  %v3716_v15 = vpop.f32.mrb[19].mxu0 }
 0x17a   :  { %v3738_v16 = vpop.f32.mrb[19].mxu1  ;;  %v2825_v17 = vadd.f32 %v3714_v11, %v2785_v6 }
 0x17c   :  { %v2865_v18 = vadd.f32 %v3736_v12, %v2825_v17 }
 0x196   :  { %v3756_v19 = vpop.f32.mrb[20].mxu0 }
 0x197   :  { %v3778_v20 = vpop.f32.mrb[20].mxu1  ;;  %v3757_v21 = vpop.f32.mrb[21].mxu0 }
 0x198   :  { %v3758_v22 = vadd.f32 %v3757_v21, %v3756_v19  ;;  %v3779_v23 = vpop.f32.mrb[21].mxu1  ;;  %v3759_v24 = vpop.f32.mrb[22].mxu0 }
 0x199   :  { %v3780_v25 = vadd.f32 %v3779_v23, %v3778_v20  ;;  %v3781_v26 = vpop.f32.mrb[22].mxu1  ;;  %v3760_v27 = vpop.f32.mrb[23].mxu0 }
 0x19a   :  { %v2905_v28 = vadd.f32 %v3758_v22, %v2865_v18  ;;  %v3782_v29 = vpop.f32.mrb[23].mxu1 }
 0x19c   :  { %v2945_v30 = vadd.f32 %v3780_v25, %v2905_v28 }
 0x1b6   :  { %v3800_v31 = vpop.f32.mrb[24].mxu0 }
 0x1b7   :  { %v3822_v32 = vpop.f32.mrb[24].mxu1  ;;  %v3801_v33 = vpop.f32.mrb[25].mxu0 }
 0x1b8   :  { %v3802_v34 = vadd.f32 %v3801_v33, %v3800_v31  ;;  %v3823_v35 = vpop.f32.mrb[25].mxu1  ;;  %v3803_v36 = vpop.f32.mrb[26].mxu0 }
 0x1b9   :  { %v3824_v37 = vadd.f32 %v3823_v35, %v3822_v32  ;;  %v3825_v38 = vpop.f32.mrb[26].mxu1  ;;  %v3804_v39 = vpop.f32.mrb[27].mxu0 }
 0x1ba   :  { %v2985_v40 = vadd.f32 %v3802_v34, %v2945_v30  ;;  %v3826_v41 = vpop.f32.mrb[27].mxu1 }
 0x1bc   :  { %v3025_v42 = vadd.f32 %v3824_v37, %v2985_v40 }
 0x1d6   :  { %v3844_v43 = vpop.f32.mrb[28].mxu0 }
 0x1d7   :  { %v3866_v44 = vpop.f32.mrb[28].mxu1  ;;  %v3845_v45 = vpop.f32.mrb[29].mxu0 }
 0x1d8   :  { %v3846_v46 = vadd.f32 %v3845_v45, %v3844_v43  ;;  %v3867_v47 = vpop.f32.mrb[29].mxu1  ;;  %v3847_v48 = vpop.f32.mrb[30].mxu0 }
 0x1d9   :  { %v3868_v49 = vadd.f32 %v3867_v47, %v3866_v44  ;;  %v3869_v50 = vpop.f32.mrb[30].mxu1  ;;  %v3848_v51 = vpop.f32.mrb[31].mxu0 }
 0x1da   :  { %v3065_v52 = vadd.f32 %v3846_v46, %v3025_v42  ;;  %v3870_v53 = vpop.f32.mrb[31].mxu1 }
 0x1dc   :  { %v3105_v54 = vadd.f32 %v3868_v49, %v3065_v52 }
 0x1f6   :  { %v3888_v55 = vpop.f32.mrb[32].mxu0 }
 0x1f7   :  { %v3910_v56 = vpop.f32.mrb[32].mxu1  ;;  %v3889_v57 = vpop.f32.mrb[33].mxu0 }
 0x1f8   :  { %v3890_v58 = vadd.f32 %v3889_v57, %v3888_v55  ;;  %v3911_v59 = vpop.f32.mrb[33].mxu1  ;;  %v3891_v60 = vpop.f32.mrb[34].mxu0 }
 0x1f9   :  { %v3912_v61 = vadd.f32 %v3911_v59, %v3910_v56  ;;  %v3913_v62 = vpop.f32.mrb[34].mxu1  ;;  %v3892_v63 = vpop.f32.mrb[35].mxu0 }
 0x1fa   :  { %v3145_v0 = vadd.f32 %v3890_v58, %v3105_v54  ;;  %v3914_v1 = vpop.f32.mrb[35].mxu1 }
 0x1fc   :  { %v3185_v2 = vadd.f32 %v3912_v61, %v3145_v0 }
 0x1fe   :  { %3190 = vst [vmem:[%s5190_s3] sm:$0xff] %v3185_v2 }

</bundles_post_ra>
